<compile_context>
chip_gen: v7x
topology: tpu7x:2x2x1
jax: 0.10.0
libtpu: 0.0.40
codegen_flags: <defaults>
</compile_context>

<pallas_src>
import math
import jax
import jax.numpy as jnp
from jax.experimental import pallas as pl
from jax.experimental.pallas import tpu as pltpu

# ---- small synthetic TinyBERT-like config ----
HIDDEN = 128          # == MAX_LENGTH (LSTM input_size) == hidden size
NUM_HEADS = 2
HEAD_DIM = HIDDEN // NUM_HEADS
PAD_HEAD = 128        # each head slab zero-padded to a full 128-lane tile
QKV_WIDTH = 3 * NUM_HEADS * PAD_HEAD
INTERMEDIATE = 512
NUM_LAYERS = 2
VOCAB = 64
MAX_POS = 16
SEQ = 8
BATCH = 2
NUM_CLASSES = 4
LN_EPS = 1e-12

_BF16 = jnp.bfloat16
_F32 = jnp.float32


# ---------------- in-kernel helpers (all f32) ----------------
def _layernorm(x, g, b):
    mu = jnp.mean(x, axis=-1, keepdims=True)
    xc = x - mu
    var = jnp.mean(xc * xc, axis=-1, keepdims=True)
    return xc * jax.lax.rsqrt(var + LN_EPS) * g + b


def _gelu(x):
    # TODO(synk): HF BERT 'gelu' is erf-based; tanh approximation used (Mosaic-safe EUP op).
    return 0.5 * x * (1.0 + jnp.tanh(0.7978845608028654 * (x + 0.044715 * x * x * x)))


def _softmax(x):
    m = jnp.max(x, axis=-1, keepdims=True)
    e = jnp.exp(x - m)
    # divide -> reciprocal-multiply on the EUP slot (otherwise idle here)
    return e * pl.reciprocal(jnp.sum(e, axis=-1, keepdims=True), approx=True)


def _dot(a_f32, w_bf16):
    # bf16 x bf16 MXU matmul with f32 accumulation.
    return jnp.dot(a_f32.astype(_BF16), w_bf16, preferred_element_type=_F32)


# ---------------- the single fused kernel ----------------
def fused_forward_kernel(*refs):
    # ---- unpack refs (inputs..., output) ----
    emb_ref, mask_ref, embg_ref, embb_ref = refs[0:4]
    idx = 4
    layer_refs = []
    for _ in range(NUM_LAYERS):
        layer_refs.append(refs[idx:idx + 12])
        idx += 12
    wih_ref, whh_ref, blstm_ref, wc_ref, bc_ref = refs[idx:idx + 5]
    o_ref = refs[idx + 5]

    N, H = emb_ref.shape                      # N = SEQ * BATCH (time-major rows)
    scale = 1.0 / math.sqrt(HEAD_DIM)
    mask_full = mask_ref[...]                 # (N, N) additive: 0 in-block/valid, -1e9 else

    # ---- embedding LayerNorm (rows are (seq, batch) time-major) ----
    x = _layernorm(emb_ref[...], embg_ref[...], embb_ref[...])         # (N, H) f32

    # ---- 2 BERT encoder layers ----
    for (wqkv, bqkv, wo, bo, ln1g, ln1b,
         wi, bi, wf2, bf2, ln2g, ln2b) in layer_refs:
        # single fused, head-padded QKV projection for all rows
        qkv = _dot(x, wqkv[...]) + bqkv[...]                            # (N, QKV_WIDTH) f32
        wo_full = wo[...]                                               # (NUM_HEADS*128, H) bf16

        attn = None
        for hh in range(NUM_HEADS):
            # 128-lane-aligned head slabs (pad lanes are exactly zero)
            q = qkv[:, (0 * NUM_HEADS + hh) * PAD_HEAD:(0 * NUM_HEADS + hh + 1) * PAD_HEAD]
            k = qkv[:, (1 * NUM_HEADS + hh) * PAD_HEAD:(1 * NUM_HEADS + hh + 1) * PAD_HEAD]
            v = qkv[:, (2 * NUM_HEADS + hh) * PAD_HEAD:(2 * NUM_HEADS + hh + 1) * PAD_HEAD]
            # q @ k^T over ALL rows at once; block-diagonal mask keeps batches independent.
            s = jax.lax.dot_general(
                q.astype(_BF16), k.astype(_BF16),
                dimension_numbers=(((1,), (1,)), ((), ())),
                preferred_element_type=_F32)                            # (N, N)
            p = _softmax(s * scale + mask_full)
            ctx = _dot(p, v.astype(_BF16))                              # (N, 128) pad lanes = 0
            # fold the output projection per head (no lane-concat of heads)
            part = _dot(ctx, wo_full[hh * PAD_HEAD:(hh + 1) * PAD_HEAD, :])   # (N, H)
            attn = part if attn is None else attn + part
        attn = attn + bo[...]                                           # (N, H)

        h1 = _layernorm(x + attn, ln1g[...], ln1b[...])
        inter = _gelu(_dot(h1, wi[...]) + bi[...])                      # (N, INTERMEDIATE)
        ffn = _dot(inter, wf2[...]) + bf2[...]                          # (N, H)
        x = _layernorm(h1 + ffn, ln2g[...], ln2b[...])

    # ---- LSTM (PyTorch gate order [i | f | g | o]) + classifier head ----
    # Input projection for all timesteps hoisted out of the recurrent loop; rows are
    # time-major so each step reads a contiguous (BATCH, 4H) slice.  Input+hidden biases
    # are pre-folded into blstm.
    gx = _dot(x, wih_ref[...]) + blstm_ref[...]                         # (N, 4H)
    whh = whh_ref[...]                                                  # (H, 4H) bf16

    h_t = jnp.zeros((BATCH, H), _F32)
    c_t = jnp.zeros((BATCH, H), _F32)
    for t in range(SEQ):
        gates = gx[t * BATCH:(t + 1) * BATCH, :] + _dot(h_t, whh)       # (BATCH, 4H)
        i_g = jax.nn.sigmoid(gates[:, 0:H])
        f_g = jax.nn.sigmoid(gates[:, H:2 * H])
        g_g = jnp.tanh(gates[:, 2 * H:3 * H])
        o_g = jax.nn.sigmoid(gates[:, 3 * H:4 * H])
        c_t = f_g * c_t + i_g * g_g
        h_t = o_g * jnp.tanh(c_t)

    # lstm_out[:, -1, :] == final hidden state of a single-layer unidirectional LSTM
    # TODO(synk): like the PyTorch reference, padded positions still feed the recurrence.
    o_ref[...] = _dot(h_t, wc_ref[...]) + bc_ref[...]                   # (BATCH, NUM_CLASSES)


# ---------------- Pallas wrapper (single call, no grid) ----------------
def bert_lstm_fused_pallas(emb_tm, mask_full, params):
    args = [emb_tm, mask_full, params["emb_ln_g"], params["emb_ln_b"]]
    for lp in params["layers"]:
        args += [lp["wqkv"], lp["bqkv"], lp["wo"], lp["bo"], lp["ln1g"], lp["ln1b"],
                 lp["wi"], lp["bi"], lp["wf"], lp["bf"], lp["ln2g"], lp["ln2b"]]
    args += [params["lstm_wih"], params["lstm_whh"], params["lstm_b"],
             params["cls_w"], params["cls_b"]]
    return pl.pallas_call(
        fused_forward_kernel,
        out_shape=jax.ShapeDtypeStruct((BATCH, NUM_CLASSES), jnp.float32),
        # All inputs are full-array VMEM residents; total footprint ~2 MB, far below the
        # default scoped VMEM limit on every generation.
        compiler_params=pltpu.CompilerParams(vmem_limit_bytes=32 * 1024 * 1024),
    )(*args)


# ---------------- parameters & forward ----------------
def _pad_head_lanes(w):
    # (H, H) per-head 64-lane columns -> (H, NUM_HEADS*128), zero pad to full lane tiles.
    blocks = []
    for hh in range(NUM_HEADS):
        blk = w[:, hh * HEAD_DIM:(hh + 1) * HEAD_DIM]
        blocks.append(jnp.pad(blk, ((0, 0), (0, PAD_HEAD - HEAD_DIM))))
    return jnp.concatenate(blocks, axis=1)


def _pad_head_rows(w):
    # (H, H) per-head 64 rows -> (NUM_HEADS*128, H), zero pad to aligned row slabs.
    blocks = []
    for hh in range(NUM_HEADS):
        blk = w[hh * HEAD_DIM:(hh + 1) * HEAD_DIM, :]
        blocks.append(jnp.pad(blk, ((0, PAD_HEAD - HEAD_DIM), (0, 0))))
    return jnp.concatenate(blocks, axis=0)


def init_params(key):
    keys = jax.random.split(key, 128)
    it = iter(keys)

    def nrm(shape, scale=0.02):
        return scale * jax.random.normal(next(it), shape, dtype=_F32)

    def zeros(shape, dtype=_F32):
        return jnp.zeros(shape, dtype)

    def ones(shape, dtype=_F32):
        return jnp.ones(shape, dtype)

    p = {
        "word_emb": nrm((VOCAB, HIDDEN)),
        "pos_emb": nrm((MAX_POS, HIDDEN)),
        "type_emb": nrm((2, HIDDEN)),
        "emb_ln_g": ones((1, HIDDEN)),
        "emb_ln_b": zeros((1, HIDDEN)),
        "layers": [],
    }
    for _ in range(NUM_LAYERS):
        wq, wk, wv = nrm((HIDDEN, HIDDEN)), nrm((HIDDEN, HIDDEN)), nrm((HIDDEN, HIDDEN))
        wo = nrm((HIDDEN, HIDDEN))
        # Head-padded fused QKV weight (H, 3*NUM_HEADS*128) and padded W_O rows (lane/sublane
        # aligned slices in-kernel); pad entries are exactly zero so results are unchanged.
        wqkv_pad = jnp.concatenate(
            [_pad_head_lanes(wq), _pad_head_lanes(wk), _pad_head_lanes(wv)], axis=1)
        wo_pad = _pad_head_rows(wo)
        p["layers"].append(dict(
            wqkv=wqkv_pad.astype(_BF16), bqkv=zeros((1, QKV_WIDTH)),
            wo=wo_pad.astype(_BF16), bo=zeros((1, HIDDEN)),
            ln1g=ones((1, HIDDEN)), ln1b=zeros((1, HIDDEN)),
            wi=nrm((HIDDEN, INTERMEDIATE)).astype(_BF16), bi=zeros((1, INTERMEDIATE)),
            wf=nrm((INTERMEDIATE, HIDDEN)).astype(_BF16), bf=zeros((1, HIDDEN)),
            ln2g=ones((1, HIDDEN)), ln2b=zeros((1, HIDDEN)),
        ))
    s = 1.0 / math.sqrt(HIDDEN)
    p["lstm_wih"] = nrm((HIDDEN, 4 * HIDDEN), s).astype(_BF16)
    p["lstm_whh"] = nrm((HIDDEN, 4 * HIDDEN), s).astype(_BF16)
    p["lstm_b"] = zeros((1, 4 * HIDDEN))          # bih + bhh folded
    p["cls_w"] = nrm((HIDDEN, NUM_CLASSES)).astype(_BF16)
    p["cls_b"] = zeros((1, NUM_CLASSES))
    return p


@jax.jit
def bert_lstm_forward(input_ids, attention_mask, params):
    B, S = input_ids.shape
    N = B * S
    # embeddings (gather is glue, done in plain JAX; XLA fuses the adds)
    tok = jnp.take(params["word_emb"], input_ids, axis=0)           # (B,S,H)
    pos = params["pos_emb"][:S][None, :, :]                          # (1,S,H)
    typ = params["type_emb"][0][None, None, :]                       # (1,1,H)
    emb = (tok + pos + typ).astype(_F32)                             # (B,S,H)

    # time-major row ordering (row i -> seq i//B, batch i%B): contiguous LSTM-step reads
    emb_tm = jnp.transpose(emb, (1, 0, 2)).reshape(N, HIDDEN)

    # combined additive attention mask over all N rows:
    #   0 where query/key are in the same batch element AND the key token is valid,
    #   -1e9 elsewhere (cross-batch or padded key) -> block-diagonal attention.
    b_idx = jnp.arange(N) % B
    key_valid = jnp.transpose(attention_mask, (1, 0)).reshape(N)     # (N,) in time-major order
    same_batch = b_idx[:, None] == b_idx[None, :]
    valid = same_batch & (key_valid[None, :] > 0)
    mask_full = jnp.where(valid, 0.0, -1e9).astype(_F32)             # (N, N)

    # whole model (emb LN -> 2 BERT layers -> LSTM -> classifier) in one Pallas call
    return bert_lstm_fused_pallas(emb_tm, mask_full, params)


if __name__ == "__main__":
    key = jax.random.PRNGKey(0)
    pkey, ikey = jax.random.split(key)
    params = init_params(pkey)

    input_ids = jax.random.randint(ikey, (BATCH, SEQ), 0, VOCAB, dtype=jnp.int32)
    attention_mask = jnp.array(
        [[1] * SEQ,
         [1] * (SEQ - 3) + [0] * 3], dtype=jnp.int32)

    logits = bert_lstm_forward(input_ids, attention_mask, params)
    jax.block_until_ready(logits)
    assert logits.shape == (BATCH, NUM_CLASSES)
    assert bool(jnp.all(jnp.isfinite(logits)))
    print("KERNEL_OK")
</pallas_src>

<mosaic_0001>
module attributes {stable_mosaic.version = 11 : i64} {
  func.func @fused_forward_kernel(%arg0: memref<16x128xf32, #tpu.memory_space<vmem>>, %arg1: memref<16x16xf32, #tpu.memory_space<vmem>>, %arg2: memref<1x128xf32, #tpu.memory_space<vmem>>, %arg3: memref<1x128xf32, #tpu.memory_space<vmem>>, %arg4: memref<128x768xbf16, #tpu.memory_space<vmem>>, %arg5: memref<1x768xf32, #tpu.memory_space<vmem>>, %arg6: memref<256x128xbf16, #tpu.memory_space<vmem>>, %arg7: memref<1x128xf32, #tpu.memory_space<vmem>>, %arg8: memref<1x128xf32, #tpu.memory_space<vmem>>, %arg9: memref<1x128xf32, #tpu.memory_space<vmem>>, %arg10: memref<128x512xbf16, #tpu.memory_space<vmem>>, %arg11: memref<1x512xf32, #tpu.memory_space<vmem>>, %arg12: memref<512x128xbf16, #tpu.memory_space<vmem>>, %arg13: memref<1x128xf32, #tpu.memory_space<vmem>>, %arg14: memref<1x128xf32, #tpu.memory_space<vmem>>, %arg15: memref<1x128xf32, #tpu.memory_space<vmem>>, %arg16: memref<128x768xbf16, #tpu.memory_space<vmem>>, %arg17: memref<1x768xf32, #tpu.memory_space<vmem>>, %arg18: memref<256x128xbf16, #tpu.memory_space<vmem>>, %arg19: memref<1x128xf32, #tpu.memory_space<vmem>>, %arg20: memref<1x128xf32, #tpu.memory_space<vmem>>, %arg21: memref<1x128xf32, #tpu.memory_space<vmem>>, %arg22: memref<128x512xbf16, #tpu.memory_space<vmem>>, %arg23: memref<1x512xf32, #tpu.memory_space<vmem>>, %arg24: memref<512x128xbf16, #tpu.memory_space<vmem>>, %arg25: memref<1x128xf32, #tpu.memory_space<vmem>>, %arg26: memref<1x128xf32, #tpu.memory_space<vmem>>, %arg27: memref<1x128xf32, #tpu.memory_space<vmem>>, %arg28: memref<128x512xbf16, #tpu.memory_space<vmem>>, %arg29: memref<128x512xbf16, #tpu.memory_space<vmem>>, %arg30: memref<1x512xf32, #tpu.memory_space<vmem>>, %arg31: memref<128x4xbf16, #tpu.memory_space<vmem>>, %arg32: memref<1x4xf32, #tpu.memory_space<vmem>>, %arg33: memref<2x4xf32, #tpu.memory_space<vmem>>) attributes {dimension_semantics = [], scalar_prefetch = 0 : i64, scratch_operands = 0 : i64, tpu.core_type = #tpu.core_type<tc>} {
    %c0 = arith.constant 0 : index
    %c0_0 = arith.constant 0 : index
    %0 = vector.load %arg1[%c0, %c0_0] : memref<16x16xf32, #tpu.memory_space<vmem>>, vector<16x16xf32>
    %c0_1 = arith.constant 0 : index
    %c0_2 = arith.constant 0 : index
    %1 = vector.load %arg0[%c0_1, %c0_2] : memref<16x128xf32, #tpu.memory_space<vmem>>, vector<16x128xf32>
    %c0_3 = arith.constant 0 : index
    %c0_4 = arith.constant 0 : index
    %2 = vector.load %arg2[%c0_3, %c0_4] : memref<1x128xf32, #tpu.memory_space<vmem>>, vector<1x128xf32>
    %c0_5 = arith.constant 0 : index
    %c0_6 = arith.constant 0 : index
    %3 = vector.load %arg3[%c0_5, %c0_6] : memref<1x128xf32, #tpu.memory_space<vmem>>, vector<1x128xf32>
    %cst = arith.constant dense<0.000000e+00> : vector<16xf32>
    %4 = vector.multi_reduction <add>, %1, %cst [1] : vector<16x128xf32> to vector<16xf32>
    %5 = vector.shape_cast %4 : vector<16xf32> to vector<16x1xf32>
    %cst_7 = arith.constant 1.280000e+02 : f32
    %6 = vector.broadcast %cst_7 : f32 to vector<16x1xf32>
    %7 = arith.divf %5, %6 : vector<16x1xf32>
    %8 = vector.broadcast %7 : vector<16x1xf32> to vector<16x128xf32>
    %9 = arith.subf %1, %8 : vector<16x128xf32>
    %10 = arith.mulf %9, %9 : vector<16x128xf32>
    %cst_8 = arith.constant dense<0.000000e+00> : vector<16xf32>
    %11 = vector.multi_reduction <add>, %10, %cst_8 [1] : vector<16x128xf32> to vector<16xf32>
    %12 = vector.shape_cast %11 : vector<16xf32> to vector<16x1xf32>
    %cst_9 = arith.constant 1.280000e+02 : f32
    %13 = vector.broadcast %cst_9 : f32 to vector<16x1xf32>
    %14 = arith.divf %12, %13 : vector<16x1xf32>
    %cst_10 = arith.constant 9.99999996E-13 : f32
    %15 = vector.broadcast %cst_10 : f32 to vector<16x1xf32>
    %16 = arith.addf %14, %15 : vector<16x1xf32>
    %17 = math.rsqrt %16 : vector<16x1xf32>
    %18 = vector.broadcast %17 : vector<16x1xf32> to vector<16x128xf32>
    %19 = arith.mulf %9, %18 : vector<16x128xf32>
    %20 = vector.broadcast %2 : vector<1x128xf32> to vector<16x128xf32>
    %21 = arith.mulf %19, %20 : vector<16x128xf32>
    %22 = vector.broadcast %3 : vector<1x128xf32> to vector<16x128xf32>
    %23 = arith.addf %21, %22 : vector<16x128xf32>
    %c0_11 = arith.constant 0 : index
    %c0_12 = arith.constant 0 : index
    %24 = vector.load %arg4[%c0_11, %c0_12] : memref<128x768xbf16, #tpu.memory_space<vmem>>, vector<128x768xbf16>
    %25 = arith.truncf %23 : vector<16x128xf32> to vector<16x128xbf16>
    %cst_13 = arith.constant dense<0.000000e+00> : vector<16x768xf32>
    %26 = tpu.matmul %25, %24, %cst_13 {dimension_numbers = #tpu.dot_dimension_numbers<[1], [0], [0], [1], [0, 0, 1, 1], [], []>} : vector<16x128xbf16>, vector<128x768xbf16>, vector<16x768xf32> -> vector<16x768xf32>
    %c0_14 = arith.constant 0 : index
    %c0_15 = arith.constant 0 : index
    %27 = vector.load %arg5[%c0_14, %c0_15] : memref<1x768xf32, #tpu.memory_space<vmem>>, vector<1x768xf32>
    %28 = vector.broadcast %27 : vector<1x768xf32> to vector<16x768xf32>
    %29 = arith.addf %26, %28 : vector<16x768xf32>
    %c0_16 = arith.constant 0 : index
    %c0_17 = arith.constant 0 : index
    %30 = vector.load %arg6[%c0_16, %c0_17] : memref<256x128xbf16, #tpu.memory_space<vmem>>, vector<256x128xbf16>
    %31 = vector.extract_strided_slice %29 {offsets = [0, 0], sizes = [16, 128], strides = [1, 1]} : vector<16x768xf32> to vector<16x128xf32>
    %32 = vector.extract_strided_slice %29 {offsets = [0, 256], sizes = [16, 128], strides = [1, 1]} : vector<16x768xf32> to vector<16x128xf32>
    %33 = vector.extract_strided_slice %29 {offsets = [0, 512], sizes = [16, 128], strides = [1, 1]} : vector<16x768xf32> to vector<16x128xf32>
    %34 = arith.truncf %31 : vector<16x128xf32> to vector<16x128xbf16>
    %35 = arith.truncf %32 : vector<16x128xf32> to vector<16x128xbf16>
    %cst_18 = arith.constant dense<0.000000e+00> : vector<16x16xf32>
    %36 = tpu.matmul %34, %35, %cst_18 {dimension_numbers = #tpu.dot_dimension_numbers<[1], [1], [0], [0], [0, 0, 1, 0], [], []>} : vector<16x128xbf16>, vector<16x128xbf16>, vector<16x16xf32> -> vector<16x16xf32>
    %cst_19 = arith.constant 1.250000e-01 : f32
    %37 = vector.broadcast %cst_19 : f32 to vector<16x16xf32>
    %38 = arith.mulf %36, %37 : vector<16x16xf32>
    %39 = arith.addf %38, %0 : vector<16x16xf32>
    %cst_20 = arith.constant dense<0xFF800000> : vector<16xf32>
    %40 = vector.multi_reduction <maximumf>, %39, %cst_20 [1] : vector<16x16xf32> to vector<16xf32>
    %41 = vector.shape_cast %40 : vector<16xf32> to vector<16x1xf32>
    %42 = vector.broadcast %41 : vector<16x1xf32> to vector<16x16xf32>
    %43 = arith.subf %39, %42 : vector<16x16xf32>
    %44 = math.exp %43 : vector<16x16xf32>
    %cst_21 = arith.constant dense<0.000000e+00> : vector<16xf32>
    %45 = vector.multi_reduction <add>, %44, %cst_21 [1] : vector<16x16xf32> to vector<16xf32>
    %46 = vector.shape_cast %45 : vector<16xf32> to vector<16x1xf32>
    %47 = tpu.reciprocal %46 {approx = true} : vector<16x1xf32> -> vector<16x1xf32>
    %48 = vector.broadcast %47 : vector<16x1xf32> to vector<16x16xf32>
    %49 = arith.mulf %44, %48 : vector<16x16xf32>
    %50 = arith.truncf %33 : vector<16x128xf32> to vector<16x128xbf16>
    %51 = arith.truncf %49 : vector<16x16xf32> to vector<16x16xbf16>
    %cst_22 = arith.constant dense<0.000000e+00> : vector<16x128xf32>
    %52 = tpu.matmul %51, %50, %cst_22 {dimension_numbers = #tpu.dot_dimension_numbers<[1], [0], [0], [1], [0, 0, 1, 1], [], []>} : vector<16x16xbf16>, vector<16x128xbf16>, vector<16x128xf32> -> vector<16x128xf32>
    %53 = vector.extract_strided_slice %30 {offsets = [0, 0], sizes = [128, 128], strides = [1, 1]} : vector<256x128xbf16> to vector<128x128xbf16>
    %54 = arith.truncf %52 : vector<16x128xf32> to vector<16x128xbf16>
    %cst_23 = arith.constant dense<0.000000e+00> : vector<16x128xf32>
    %55 = tpu.matmul %54, %53, %cst_23 {dimension_numbers = #tpu.dot_dimension_numbers<[1], [0], [0], [1], [0, 0, 1, 1], [], []>} : vector<16x128xbf16>, vector<128x128xbf16>, vector<16x128xf32> -> vector<16x128xf32>
    %56 = vector.extract_strided_slice %29 {offsets = [0, 128], sizes = [16, 128], strides = [1, 1]} : vector<16x768xf32> to vector<16x128xf32>
    %57 = vector.extract_strided_slice %29 {offsets = [0, 384], sizes = [16, 128], strides = [1, 1]} : vector<16x768xf32> to vector<16x128xf32>
    %58 = vector.extract_strided_slice %29 {offsets = [0, 640], sizes = [16, 128], strides = [1, 1]} : vector<16x768xf32> to vector<16x128xf32>
    %59 = arith.truncf %56 : vector<16x128xf32> to vector<16x128xbf16>
    %60 = arith.truncf %57 : vector<16x128xf32> to vector<16x128xbf16>
    %cst_24 = arith.constant dense<0.000000e+00> : vector<16x16xf32>
    %61 = tpu.matmul %59, %60, %cst_24 {dimension_numbers = #tpu.dot_dimension_numbers<[1], [1], [0], [0], [0, 0, 1, 0], [], []>} : vector<16x128xbf16>, vector<16x128xbf16>, vector<16x16xf32> -> vector<16x16xf32>
    %cst_25 = arith.constant 1.250000e-01 : f32
    %62 = vector.broadcast %cst_25 : f32 to vector<16x16xf32>
    %63 = arith.mulf %61, %62 : vector<16x16xf32>
    %64 = arith.addf %63, %0 : vector<16x16xf32>
    %cst_26 = arith.constant dense<0xFF800000> : vector<16xf32>
    %65 = vector.multi_reduction <maximumf>, %64, %cst_26 [1] : vector<16x16xf32> to vector<16xf32>
    %66 = vector.shape_cast %65 : vector<16xf32> to vector<16x1xf32>
    %67 = vector.broadcast %66 : vector<16x1xf32> to vector<16x16xf32>
    %68 = arith.subf %64, %67 : vector<16x16xf32>
    %69 = math.exp %68 : vector<16x16xf32>
    %cst_27 = arith.constant dense<0.000000e+00> : vector<16xf32>
    %70 = vector.multi_reduction <add>, %69, %cst_27 [1] : vector<16x16xf32> to vector<16xf32>
    %71 = vector.shape_cast %70 : vector<16xf32> to vector<16x1xf32>
    %72 = tpu.reciprocal %71 {approx = true} : vector<16x1xf32> -> vector<16x1xf32>
    %73 = vector.broadcast %72 : vector<16x1xf32> to vector<16x16xf32>
    %74 = arith.mulf %69, %73 : vector<16x16xf32>
    %75 = arith.truncf %58 : vector<16x128xf32> to vector<16x128xbf16>
    %76 = arith.truncf %74 : vector<16x16xf32> to vector<16x16xbf16>
    %cst_28 = arith.constant dense<0.000000e+00> : vector<16x128xf32>
    %77 = tpu.matmul %76, %75, %cst_28 {dimension_numbers = #tpu.dot_dimension_numbers<[1], [0], [0], [1], [0, 0, 1, 1], [], []>} : vector<16x16xbf16>, vector<16x128xbf16>, vector<16x128xf32> -> vector<16x128xf32>
    %78 = vector.extract_strided_slice %30 {offsets = [128, 0], sizes = [128, 128], strides = [1, 1]} : vector<256x128xbf16> to vector<128x128xbf16>
    %79 = arith.truncf %77 : vector<16x128xf32> to vector<16x128xbf16>
    %cst_29 = arith.constant dense<0.000000e+00> : vector<16x128xf32>
    %80 = tpu.matmul %79, %78, %cst_29 {dimension_numbers = #tpu.dot_dimension_numbers<[1], [0], [0], [1], [0, 0, 1, 1], [], []>} : vector<16x128xbf16>, vector<128x128xbf16>, vector<16x128xf32> -> vector<16x128xf32>
    %81 = arith.addf %55, %80 : vector<16x128xf32>
    %c0_30 = arith.constant 0 : index
    %c0_31 = arith.constant 0 : index
    %82 = vector.load %arg7[%c0_30, %c0_31] : memref<1x128xf32, #tpu.memory_space<vmem>>, vector<1x128xf32>
    %83 = vector.broadcast %82 : vector<1x128xf32> to vector<16x128xf32>
    %84 = arith.addf %81, %83 : vector<16x128xf32>
    %85 = arith.addf %23, %84 : vector<16x128xf32>
    %c0_32 = arith.constant 0 : index
    %c0_33 = arith.constant 0 : index
    %86 = vector.load %arg8[%c0_32, %c0_33] : memref<1x128xf32, #tpu.memory_space<vmem>>, vector<1x128xf32>
    %c0_34 = arith.constant 0 : index
    %c0_35 = arith.constant 0 : index
    %87 = vector.load %arg9[%c0_34, %c0_35] : memref<1x128xf32, #tpu.memory_space<vmem>>, vector<1x128xf32>
    %cst_36 = arith.constant dense<0.000000e+00> : vector<16xf32>
    %88 = vector.multi_reduction <add>, %85, %cst_36 [1] : vector<16x128xf32> to vector<16xf32>
    %89 = vector.shape_cast %88 : vector<16xf32> to vector<16x1xf32>
    %cst_37 = arith.constant 1.280000e+02 : f32
    %90 = vector.broadcast %cst_37 : f32 to vector<16x1xf32>
    %91 = arith.divf %89, %90 : vector<16x1xf32>
    %92 = vector.broadcast %91 : vector<16x1xf32> to vector<16x128xf32>
    %93 = arith.subf %85, %92 : vector<16x128xf32>
    %94 = arith.mulf %93, %93 : vector<16x128xf32>
    %cst_38 = arith.constant dense<0.000000e+00> : vector<16xf32>
    %95 = vector.multi_reduction <add>, %94, %cst_38 [1] : vector<16x128xf32> to vector<16xf32>
    %96 = vector.shape_cast %95 : vector<16xf32> to vector<16x1xf32>
    %cst_39 = arith.constant 1.280000e+02 : f32
    %97 = vector.broadcast %cst_39 : f32 to vector<16x1xf32>
    %98 = arith.divf %96, %97 : vector<16x1xf32>
    %cst_40 = arith.constant 9.99999996E-13 : f32
    %99 = vector.broadcast %cst_40 : f32 to vector<16x1xf32>
    %100 = arith.addf %98, %99 : vector<16x1xf32>
    %101 = math.rsqrt %100 : vector<16x1xf32>
    %102 = vector.broadcast %101 : vector<16x1xf32> to vector<16x128xf32>
    %103 = arith.mulf %93, %102 : vector<16x128xf32>
    %104 = vector.broadcast %86 : vector<1x128xf32> to vector<16x128xf32>
    %105 = arith.mulf %103, %104 : vector<16x128xf32>
    %106 = vector.broadcast %87 : vector<1x128xf32> to vector<16x128xf32>
    %107 = arith.addf %105, %106 : vector<16x128xf32>
    %c0_41 = arith.constant 0 : index
    %c0_42 = arith.constant 0 : index
    %108 = vector.load %arg10[%c0_41, %c0_42] : memref<128x512xbf16, #tpu.memory_space<vmem>>, vector<128x512xbf16>
    %109 = arith.truncf %107 : vector<16x128xf32> to vector<16x128xbf16>
    %cst_43 = arith.constant dense<0.000000e+00> : vector<16x512xf32>
    %110 = tpu.matmul %109, %108, %cst_43 {dimension_numbers = #tpu.dot_dimension_numbers<[1], [0], [0], [1], [0, 0, 1, 1], [], []>} : vector<16x128xbf16>, vector<128x512xbf16>, vector<16x512xf32> -> vector<16x512xf32>
    %c0_44 = arith.constant 0 : index
    %c0_45 = arith.constant 0 : index
    %111 = vector.load %arg11[%c0_44, %c0_45] : memref<1x512xf32, #tpu.memory_space<vmem>>, vector<1x512xf32>
    %112 = vector.broadcast %111 : vector<1x512xf32> to vector<16x512xf32>
    %113 = arith.addf %110, %112 : vector<16x512xf32>
    %cst_46 = arith.constant 5.000000e-01 : f32
    %114 = vector.broadcast %cst_46 : f32 to vector<16x512xf32>
    %115 = arith.mulf %114, %113 : vector<16x512xf32>
    %cst_47 = arith.constant 4.471500e-02 : f32
    %116 = vector.broadcast %cst_47 : f32 to vector<16x512xf32>
    %117 = arith.mulf %116, %113 : vector<16x512xf32>
    %118 = arith.mulf %117, %113 : vector<16x512xf32>
    %119 = arith.mulf %118, %113 : vector<16x512xf32>
    %120 = arith.addf %113, %119 : vector<16x512xf32>
    %cst_48 = arith.constant 0.797884583 : f32
    %121 = vector.broadcast %cst_48 : f32 to vector<16x512xf32>
    %122 = arith.mulf %121, %120 : vector<16x512xf32>
    %123 = math.tanh %122 : vector<16x512xf32>
    %cst_49 = arith.constant 1.000000e+00 : f32
    %124 = vector.broadcast %cst_49 : f32 to vector<16x512xf32>
    %125 = arith.addf %124, %123 : vector<16x512xf32>
    %126 = arith.mulf %115, %125 : vector<16x512xf32>
    %c0_50 = arith.constant 0 : index
    %c0_51 = arith.constant 0 : index
    %127 = vector.load %arg12[%c0_50, %c0_51] : memref<512x128xbf16, #tpu.memory_space<vmem>>, vector<512x128xbf16>
    %128 = arith.truncf %126 : vector<16x512xf32> to vector<16x512xbf16>
    %cst_52 = arith.constant dense<0.000000e+00> : vector<16x128xf32>
    %129 = tpu.matmul %128, %127, %cst_52 {dimension_numbers = #tpu.dot_dimension_numbers<[1], [0], [0], [1], [0, 0, 1, 1], [], []>} : vector<16x512xbf16>, vector<512x128xbf16>, vector<16x128xf32> -> vector<16x128xf32>
    %c0_53 = arith.constant 0 : index
    %c0_54 = arith.constant 0 : index
    %130 = vector.load %arg13[%c0_53, %c0_54] : memref<1x128xf32, #tpu.memory_space<vmem>>, vector<1x128xf32>
    %131 = vector.broadcast %130 : vector<1x128xf32> to vector<16x128xf32>
    %132 = arith.addf %129, %131 : vector<16x128xf32>
    %133 = arith.addf %107, %132 : vector<16x128xf32>
    %c0_55 = arith.constant 0 : index
    %c0_56 = arith.constant 0 : index
    %134 = vector.load %arg14[%c0_55, %c0_56] : memref<1x128xf32, #tpu.memory_space<vmem>>, vector<1x128xf32>
    %c0_57 = arith.constant 0 : index
    %c0_58 = arith.constant 0 : index
    %135 = vector.load %arg15[%c0_57, %c0_58] : memref<1x128xf32, #tpu.memory_space<vmem>>, vector<1x128xf32>
    %cst_59 = arith.constant dense<0.000000e+00> : vector<16xf32>
    %136 = vector.multi_reduction <add>, %133, %cst_59 [1] : vector<16x128xf32> to vector<16xf32>
    %137 = vector.shape_cast %136 : vector<16xf32> to vector<16x1xf32>
    %cst_60 = arith.constant 1.280000e+02 : f32
    %138 = vector.broadcast %cst_60 : f32 to vector<16x1xf32>
    %139 = arith.divf %137, %138 : vector<16x1xf32>
    %140 = vector.broadcast %139 : vector<16x1xf32> to vector<16x128xf32>
    %141 = arith.subf %133, %140 : vector<16x128xf32>
    %142 = arith.mulf %141, %141 : vector<16x128xf32>
    %cst_61 = arith.constant dense<0.000000e+00> : vector<16xf32>
    %143 = vector.multi_reduction <add>, %142, %cst_61 [1] : vector<16x128xf32> to vector<16xf32>
    %144 = vector.shape_cast %143 : vector<16xf32> to vector<16x1xf32>
    %cst_62 = arith.constant 1.280000e+02 : f32
    %145 = vector.broadcast %cst_62 : f32 to vector<16x1xf32>
    %146 = arith.divf %144, %145 : vector<16x1xf32>
    %cst_63 = arith.constant 9.99999996E-13 : f32
    %147 = vector.broadcast %cst_63 : f32 to vector<16x1xf32>
    %148 = arith.addf %146, %147 : vector<16x1xf32>
    %149 = math.rsqrt %148 : vector<16x1xf32>
    %150 = vector.broadcast %149 : vector<16x1xf32> to vector<16x128xf32>
    %151 = arith.mulf %141, %150 : vector<16x128xf32>
    %152 = vector.broadcast %134 : vector<1x128xf32> to vector<16x128xf32>
    %153 = arith.mulf %151, %152 : vector<16x128xf32>
    %154 = vector.broadcast %135 : vector<1x128xf32> to vector<16x128xf32>
    %155 = arith.addf %153, %154 : vector<16x128xf32>
    %c0_64 = arith.constant 0 : index
    %c0_65 = arith.constant 0 : index
    %156 = vector.load %arg16[%c0_64, %c0_65] : memref<128x768xbf16, #tpu.memory_space<vmem>>, vector<128x768xbf16>
    %157 = arith.truncf %155 : vector<16x128xf32> to vector<16x128xbf16>
    %cst_66 = arith.constant dense<0.000000e+00> : vector<16x768xf32>
    %158 = tpu.matmul %157, %156, %cst_66 {dimension_numbers = #tpu.dot_dimension_numbers<[1], [0], [0], [1], [0, 0, 1, 1], [], []>} : vector<16x128xbf16>, vector<128x768xbf16>, vector<16x768xf32> -> vector<16x768xf32>
    %c0_67 = arith.constant 0 : index
    %c0_68 = arith.constant 0 : index
    %159 = vector.load %arg17[%c0_67, %c0_68] : memref<1x768xf32, #tpu.memory_space<vmem>>, vector<1x768xf32>
    %160 = vector.broadcast %159 : vector<1x768xf32> to vector<16x768xf32>
    %161 = arith.addf %158, %160 : vector<16x768xf32>
    %c0_69 = arith.constant 0 : index
    %c0_70 = arith.constant 0 : index
    %162 = vector.load %arg18[%c0_69, %c0_70] : memref<256x128xbf16, #tpu.memory_space<vmem>>, vector<256x128xbf16>
    %163 = vector.extract_strided_slice %161 {offsets = [0, 0], sizes = [16, 128], strides = [1, 1]} : vector<16x768xf32> to vector<16x128xf32>
    %164 = vector.extract_strided_slice %161 {offsets = [0, 256], sizes = [16, 128], strides = [1, 1]} : vector<16x768xf32> to vector<16x128xf32>
    %165 = vector.extract_strided_slice %161 {offsets = [0, 512], sizes = [16, 128], strides = [1, 1]} : vector<16x768xf32> to vector<16x128xf32>
    %166 = arith.truncf %163 : vector<16x128xf32> to vector<16x128xbf16>
    %167 = arith.truncf %164 : vector<16x128xf32> to vector<16x128xbf16>
    %cst_71 = arith.constant dense<0.000000e+00> : vector<16x16xf32>
    %168 = tpu.matmul %166, %167, %cst_71 {dimension_numbers = #tpu.dot_dimension_numbers<[1], [1], [0], [0], [0, 0, 1, 0], [], []>} : vector<16x128xbf16>, vector<16x128xbf16>, vector<16x16xf32> -> vector<16x16xf32>
    %cst_72 = arith.constant 1.250000e-01 : f32
    %169 = vector.broadcast %cst_72 : f32 to vector<16x16xf32>
    %170 = arith.mulf %168, %169 : vector<16x16xf32>
    %171 = arith.addf %170, %0 : vector<16x16xf32>
    %cst_73 = arith.constant dense<0xFF800000> : vector<16xf32>
    %172 = vector.multi_reduction <maximumf>, %171, %cst_73 [1] : vector<16x16xf32> to vector<16xf32>
    %173 = vector.shape_cast %172 : vector<16xf32> to vector<16x1xf32>
    %174 = vector.broadcast %173 : vector<16x1xf32> to vector<16x16xf32>
    %175 = arith.subf %171, %174 : vector<16x16xf32>
    %176 = math.exp %175 : vector<16x16xf32>
    %cst_74 = arith.constant dense<0.000000e+00> : vector<16xf32>
    %177 = vector.multi_reduction <add>, %176, %cst_74 [1] : vector<16x16xf32> to vector<16xf32>
    %178 = vector.shape_cast %177 : vector<16xf32> to vector<16x1xf32>
    %179 = tpu.reciprocal %178 {approx = true} : vector<16x1xf32> -> vector<16x1xf32>
    %180 = vector.broadcast %179 : vector<16x1xf32> to vector<16x16xf32>
    %181 = arith.mulf %176, %180 : vector<16x16xf32>
    %182 = arith.truncf %165 : vector<16x128xf32> to vector<16x128xbf16>
    %183 = arith.truncf %181 : vector<16x16xf32> to vector<16x16xbf16>
    %cst_75 = arith.constant dense<0.000000e+00> : vector<16x128xf32>
    %184 = tpu.matmul %183, %182, %cst_75 {dimension_numbers = #tpu.dot_dimension_numbers<[1], [0], [0], [1], [0, 0, 1, 1], [], []>} : vector<16x16xbf16>, vector<16x128xbf16>, vector<16x128xf32> -> vector<16x128xf32>
    %185 = vector.extract_strided_slice %162 {offsets = [0, 0], sizes = [128, 128], strides = [1, 1]} : vector<256x128xbf16> to vector<128x128xbf16>
    %186 = arith.truncf %184 : vector<16x128xf32> to vector<16x128xbf16>
    %cst_76 = arith.constant dense<0.000000e+00> : vector<16x128xf32>
    %187 = tpu.matmul %186, %185, %cst_76 {dimension_numbers = #tpu.dot_dimension_numbers<[1], [0], [0], [1], [0, 0, 1, 1], [], []>} : vector<16x128xbf16>, vector<128x128xbf16>, vector<16x128xf32> -> vector<16x128xf32>
    %188 = vector.extract_strided_slice %161 {offsets = [0, 128], sizes = [16, 128], strides = [1, 1]} : vector<16x768xf32> to vector<16x128xf32>
    %189 = vector.extract_strided_slice %161 {offsets = [0, 384], sizes = [16, 128], strides = [1, 1]} : vector<16x768xf32> to vector<16x128xf32>
    %190 = vector.extract_strided_slice %161 {offsets = [0, 640], sizes = [16, 128], strides = [1, 1]} : vector<16x768xf32> to vector<16x128xf32>
    %191 = arith.truncf %188 : vector<16x128xf32> to vector<16x128xbf16>
    %192 = arith.truncf %189 : vector<16x128xf32> to vector<16x128xbf16>
    %cst_77 = arith.constant dense<0.000000e+00> : vector<16x16xf32>
    %193 = tpu.matmul %191, %192, %cst_77 {dimension_numbers = #tpu.dot_dimension_numbers<[1], [1], [0], [0], [0, 0, 1, 0], [], []>} : vector<16x128xbf16>, vector<16x128xbf16>, vector<16x16xf32> -> vector<16x16xf32>
    %cst_78 = arith.constant 1.250000e-01 : f32
    %194 = vector.broadcast %cst_78 : f32 to vector<16x16xf32>
    %195 = arith.mulf %193, %194 : vector<16x16xf32>
    %196 = arith.addf %195, %0 : vector<16x16xf32>
    %cst_79 = arith.constant dense<0xFF800000> : vector<16xf32>
    %197 = vector.multi_reduction <maximumf>, %196, %cst_79 [1] : vector<16x16xf32> to vector<16xf32>
    %198 = vector.shape_cast %197 : vector<16xf32> to vector<16x1xf32>
    %199 = vector.broadcast %198 : vector<16x1xf32> to vector<16x16xf32>
    %200 = arith.subf %196, %199 : vector<16x16xf32>
    %201 = math.exp %200 : vector<16x16xf32>
    %cst_80 = arith.constant dense<0.000000e+00> : vector<16xf32>
    %202 = vector.multi_reduction <add>, %201, %cst_80 [1] : vector<16x16xf32> to vector<16xf32>
    %203 = vector.shape_cast %202 : vector<16xf32> to vector<16x1xf32>
    %204 = tpu.reciprocal %203 {approx = true} : vector<16x1xf32> -> vector<16x1xf32>
    %205 = vector.broadcast %204 : vector<16x1xf32> to vector<16x16xf32>
    %206 = arith.mulf %201, %205 : vector<16x16xf32>
    %207 = arith.truncf %190 : vector<16x128xf32> to vector<16x128xbf16>
    %208 = arith.truncf %206 : vector<16x16xf32> to vector<16x16xbf16>
    %cst_81 = arith.constant dense<0.000000e+00> : vector<16x128xf32>
    %209 = tpu.matmul %208, %207, %cst_81 {dimension_numbers = #tpu.dot_dimension_numbers<[1], [0], [0], [1], [0, 0, 1, 1], [], []>} : vector<16x16xbf16>, vector<16x128xbf16>, vector<16x128xf32> -> vector<16x128xf32>
    %210 = vector.extract_strided_slice %162 {offsets = [128, 0], sizes = [128, 128], strides = [1, 1]} : vector<256x128xbf16> to vector<128x128xbf16>
    %211 = arith.truncf %209 : vector<16x128xf32> to vector<16x128xbf16>
    %cst_82 = arith.constant dense<0.000000e+00> : vector<16x128xf32>
    %212 = tpu.matmul %211, %210, %cst_82 {dimension_numbers = #tpu.dot_dimension_numbers<[1], [0], [0], [1], [0, 0, 1, 1], [], []>} : vector<16x128xbf16>, vector<128x128xbf16>, vector<16x128xf32> -> vector<16x128xf32>
    %213 = arith.addf %187, %212 : vector<16x128xf32>
    %c0_83 = arith.constant 0 : index
    %c0_84 = arith.constant 0 : index
    %214 = vector.load %arg19[%c0_83, %c0_84] : memref<1x128xf32, #tpu.memory_space<vmem>>, vector<1x128xf32>
    %215 = vector.broadcast %214 : vector<1x128xf32> to vector<16x128xf32>
    %216 = arith.addf %213, %215 : vector<16x128xf32>
    %217 = arith.addf %155, %216 : vector<16x128xf32>
    %c0_85 = arith.constant 0 : index
    %c0_86 = arith.constant 0 : index
    %218 = vector.load %arg20[%c0_85, %c0_86] : memref<1x128xf32, #tpu.memory_space<vmem>>, vector<1x128xf32>
    %c0_87 = arith.constant 0 : index
    %c0_88 = arith.constant 0 : index
    %219 = vector.load %arg21[%c0_87, %c0_88] : memref<1x128xf32, #tpu.memory_space<vmem>>, vector<1x128xf32>
    %cst_89 = arith.constant dense<0.000000e+00> : vector<16xf32>
    %220 = vector.multi_reduction <add>, %217, %cst_89 [1] : vector<16x128xf32> to vector<16xf32>
    %221 = vector.shape_cast %220 : vector<16xf32> to vector<16x1xf32>
    %cst_90 = arith.constant 1.280000e+02 : f32
    %222 = vector.broadcast %cst_90 : f32 to vector<16x1xf32>
    %223 = arith.divf %221, %222 : vector<16x1xf32>
    %224 = vector.broadcast %223 : vector<16x1xf32> to vector<16x128xf32>
    %225 = arith.subf %217, %224 : vector<16x128xf32>
    %226 = arith.mulf %225, %225 : vector<16x128xf32>
    %cst_91 = arith.constant dense<0.000000e+00> : vector<16xf32>
    %227 = vector.multi_reduction <add>, %226, %cst_91 [1] : vector<16x128xf32> to vector<16xf32>
    %228 = vector.shape_cast %227 : vector<16xf32> to vector<16x1xf32>
    %cst_92 = arith.constant 1.280000e+02 : f32
    %229 = vector.broadcast %cst_92 : f32 to vector<16x1xf32>
    %230 = arith.divf %228, %229 : vector<16x1xf32>
    %cst_93 = arith.constant 9.99999996E-13 : f32
    %231 = vector.broadcast %cst_93 : f32 to vector<16x1xf32>
    %232 = arith.addf %230, %231 : vector<16x1xf32>
    %233 = math.rsqrt %232 : vector<16x1xf32>
    %234 = vector.broadcast %233 : vector<16x1xf32> to vector<16x128xf32>
    %235 = arith.mulf %225, %234 : vector<16x128xf32>
    %236 = vector.broadcast %218 : vector<1x128xf32> to vector<16x128xf32>
    %237 = arith.mulf %235, %236 : vector<16x128xf32>
    %238 = vector.broadcast %219 : vector<1x128xf32> to vector<16x128xf32>
    %239 = arith.addf %237, %238 : vector<16x128xf32>
    %c0_94 = arith.constant 0 : index
    %c0_95 = arith.constant 0 : index
    %240 = vector.load %arg22[%c0_94, %c0_95] : memref<128x512xbf16, #tpu.memory_space<vmem>>, vector<128x512xbf16>
    %241 = arith.truncf %239 : vector<16x128xf32> to vector<16x128xbf16>
    %cst_96 = arith.constant dense<0.000000e+00> : vector<16x512xf32>
    %242 = tpu.matmul %241, %240, %cst_96 {dimension_numbers = #tpu.dot_dimension_numbers<[1], [0], [0], [1], [0, 0, 1, 1], [], []>} : vector<16x128xbf16>, vector<128x512xbf16>, vector<16x512xf32> -> vector<16x512xf32>
    %c0_97 = arith.constant 0 : index
    %c0_98 = arith.constant 0 : index
    %243 = vector.load %arg23[%c0_97, %c0_98] : memref<1x512xf32, #tpu.memory_space<vmem>>, vector<1x512xf32>
    %244 = vector.broadcast %243 : vector<1x512xf32> to vector<16x512xf32>
    %245 = arith.addf %242, %244 : vector<16x512xf32>
    %cst_99 = arith.constant 5.000000e-01 : f32
    %246 = vector.broadcast %cst_99 : f32 to vector<16x512xf32>
    %247 = arith.mulf %246, %245 : vector<16x512xf32>
    %cst_100 = arith.constant 4.471500e-02 : f32
    %248 = vector.broadcast %cst_100 : f32 to vector<16x512xf32>
    %249 = arith.mulf %248, %245 : vector<16x512xf32>
    %250 = arith.mulf %249, %245 : vector<16x512xf32>
    %251 = arith.mulf %250, %245 : vector<16x512xf32>
    %252 = arith.addf %245, %251 : vector<16x512xf32>
    %cst_101 = arith.constant 0.797884583 : f32
    %253 = vector.broadcast %cst_101 : f32 to vector<16x512xf32>
    %254 = arith.mulf %253, %252 : vector<16x512xf32>
    %255 = math.tanh %254 : vector<16x512xf32>
    %cst_102 = arith.constant 1.000000e+00 : f32
    %256 = vector.broadcast %cst_102 : f32 to vector<16x512xf32>
    %257 = arith.addf %256, %255 : vector<16x512xf32>
    %258 = arith.mulf %247, %257 : vector<16x512xf32>
    %c0_103 = arith.constant 0 : index
    %c0_104 = arith.constant 0 : index
    %259 = vector.load %arg24[%c0_103, %c0_104] : memref<512x128xbf16, #tpu.memory_space<vmem>>, vector<512x128xbf16>
    %260 = arith.truncf %258 : vector<16x512xf32> to vector<16x512xbf16>
    %cst_105 = arith.constant dense<0.000000e+00> : vector<16x128xf32>
    %261 = tpu.matmul %260, %259, %cst_105 {dimension_numbers = #tpu.dot_dimension_numbers<[1], [0], [0], [1], [0, 0, 1, 1], [], []>} : vector<16x512xbf16>, vector<512x128xbf16>, vector<16x128xf32> -> vector<16x128xf32>
    %c0_106 = arith.constant 0 : index
    %c0_107 = arith.constant 0 : index
    %262 = vector.load %arg25[%c0_106, %c0_107] : memref<1x128xf32, #tpu.memory_space<vmem>>, vector<1x128xf32>
    %263 = vector.broadcast %262 : vector<1x128xf32> to vector<16x128xf32>
    %264 = arith.addf %261, %263 : vector<16x128xf32>
    %265 = arith.addf %239, %264 : vector<16x128xf32>
    %c0_108 = arith.constant 0 : index
    %c0_109 = arith.constant 0 : index
    %266 = vector.load %arg26[%c0_108, %c0_109] : memref<1x128xf32, #tpu.memory_space<vmem>>, vector<1x128xf32>
    %c0_110 = arith.constant 0 : index
    %c0_111 = arith.constant 0 : index
    %267 = vector.load %arg27[%c0_110, %c0_111] : memref<1x128xf32, #tpu.memory_space<vmem>>, vector<1x128xf32>
    %cst_112 = arith.constant dense<0.000000e+00> : vector<16xf32>
    %268 = vector.multi_reduction <add>, %265, %cst_112 [1] : vector<16x128xf32> to vector<16xf32>
    %269 = vector.shape_cast %268 : vector<16xf32> to vector<16x1xf32>
    %cst_113 = arith.constant 1.280000e+02 : f32
    %270 = vector.broadcast %cst_113 : f32 to vector<16x1xf32>
    %271 = arith.divf %269, %270 : vector<16x1xf32>
    %272 = vector.broadcast %271 : vector<16x1xf32> to vector<16x128xf32>
    %273 = arith.subf %265, %272 : vector<16x128xf32>
    %274 = arith.mulf %273, %273 : vector<16x128xf32>
    %cst_114 = arith.constant dense<0.000000e+00> : vector<16xf32>
    %275 = vector.multi_reduction <add>, %274, %cst_114 [1] : vector<16x128xf32> to vector<16xf32>
    %276 = vector.shape_cast %275 : vector<16xf32> to vector<16x1xf32>
    %cst_115 = arith.constant 1.280000e+02 : f32
    %277 = vector.broadcast %cst_115 : f32 to vector<16x1xf32>
    %278 = arith.divf %276, %277 : vector<16x1xf32>
    %cst_116 = arith.constant 9.99999996E-13 : f32
    %279 = vector.broadcast %cst_116 : f32 to vector<16x1xf32>
    %280 = arith.addf %278, %279 : vector<16x1xf32>
    %281 = math.rsqrt %280 : vector<16x1xf32>
    %282 = vector.broadcast %281 : vector<16x1xf32> to vector<16x128xf32>
    %283 = arith.mulf %273, %282 : vector<16x128xf32>
    %284 = vector.broadcast %266 : vector<1x128xf32> to vector<16x128xf32>
    %285 = arith.mulf %283, %284 : vector<16x128xf32>
    %286 = vector.broadcast %267 : vector<1x128xf32> to vector<16x128xf32>
    %287 = arith.addf %285, %286 : vector<16x128xf32>
    %c0_117 = arith.constant 0 : index
    %c0_118 = arith.constant 0 : index
    %288 = vector.load %arg28[%c0_117, %c0_118] : memref<128x512xbf16, #tpu.memory_space<vmem>>, vector<128x512xbf16>
    %289 = arith.truncf %287 : vector<16x128xf32> to vector<16x128xbf16>
    %cst_119 = arith.constant dense<0.000000e+00> : vector<16x512xf32>
    %290 = tpu.matmul %289, %288, %cst_119 {dimension_numbers = #tpu.dot_dimension_numbers<[1], [0], [0], [1], [0, 0, 1, 1], [], []>} : vector<16x128xbf16>, vector<128x512xbf16>, vector<16x512xf32> -> vector<16x512xf32>
    %c0_120 = arith.constant 0 : index
    %c0_121 = arith.constant 0 : index
    %291 = vector.load %arg30[%c0_120, %c0_121] : memref<1x512xf32, #tpu.memory_space<vmem>>, vector<1x512xf32>
    %292 = vector.broadcast %291 : vector<1x512xf32> to vector<16x512xf32>
    %293 = arith.addf %290, %292 : vector<16x512xf32>
    %c0_122 = arith.constant 0 : index
    %c0_123 = arith.constant 0 : index
    %294 = vector.load %arg29[%c0_122, %c0_123] : memref<128x512xbf16, #tpu.memory_space<vmem>>, vector<128x512xbf16>
    %cst_124 = arith.constant 0.000000e+00 : f32
    %295 = vector.broadcast %cst_124 : f32 to vector<2x128xf32>
    %cst_125 = arith.constant 0.000000e+00 : f32
    %296 = vector.broadcast %cst_125 : f32 to vector<2x128xf32>
    %297 = vector.extract_strided_slice %293 {offsets = [0, 0], sizes = [2, 512], strides = [1, 1]} : vector<16x512xf32> to vector<2x512xf32>
    %298 = arith.truncf %295 : vector<2x128xf32> to vector<2x128xbf16>
    %cst_126 = arith.constant dense<0.000000e+00> : vector<2x512xf32>
    %299 = tpu.matmul %298, %294, %cst_126 {dimension_numbers = #tpu.dot_dimension_numbers<[1], [0], [0], [1], [0, 0, 1, 1], [], []>} : vector<2x128xbf16>, vector<128x512xbf16>, vector<2x512xf32> -> vector<2x512xf32>
    %300 = arith.addf %297, %299 : vector<2x512xf32>
    %301 = vector.extract_strided_slice %300 {offsets = [0, 0], sizes = [2, 128], strides = [1, 1]} : vector<2x512xf32> to vector<2x128xf32>
    %302 = arith.negf %301 : vector<2x128xf32>
    %303 = math.exp %302 : vector<2x128xf32>
    %cst_127 = arith.constant 1.000000e+00 : f32
    %304 = vector.broadcast %cst_127 : f32 to vector<2x128xf32>
    %305 = arith.addf %304, %303 : vector<2x128xf32>
    %306 = arith.divf %304, %305 : vector<2x128xf32>
    %307 = vector.extract_strided_slice %300 {offsets = [0, 128], sizes = [2, 128], strides = [1, 1]} : vector<2x512xf32> to vector<2x128xf32>
    %308 = arith.negf %307 : vector<2x128xf32>
    %309 = math.exp %308 : vector<2x128xf32>
    %cst_128 = arith.constant 1.000000e+00 : f32
    %310 = vector.broadcast %cst_128 : f32 to vector<2x128xf32>
    %311 = arith.addf %310, %309 : vector<2x128xf32>
    %312 = arith.divf %310, %311 : vector<2x128xf32>
    %313 = vector.extract_strided_slice %300 {offsets = [0, 256], sizes = [2, 128], strides = [1, 1]} : vector<2x512xf32> to vector<2x128xf32>
    %314 = math.tanh %313 : vector<2x128xf32>
    %315 = vector.extract_strided_slice %300 {offsets = [0, 384], sizes = [2, 128], strides = [1, 1]} : vector<2x512xf32> to vector<2x128xf32>
    %316 = arith.negf %315 : vector<2x128xf32>
    %317 = math.exp %316 : vector<2x128xf32>
    %cst_129 = arith.constant 1.000000e+00 : f32
    %318 = vector.broadcast %cst_129 : f32 to vector<2x128xf32>
    %319 = arith.addf %318, %317 : vector<2x128xf32>
    %320 = arith.divf %318, %319 : vector<2x128xf32>
    %321 = arith.mulf %312, %296 : vector<2x128xf32>
    %322 = arith.mulf %306, %314 : vector<2x128xf32>
    %323 = arith.addf %321, %322 : vector<2x128xf32>
    %324 = math.tanh %323 : vector<2x128xf32>
    %325 = arith.mulf %320, %324 : vector<2x128xf32>
    %326 = vector.extract_strided_slice %293 {offsets = [2, 0], sizes = [2, 512], strides = [1, 1]} : vector<16x512xf32> to vector<2x512xf32>
    %327 = arith.truncf %325 : vector<2x128xf32> to vector<2x128xbf16>
    %cst_130 = arith.constant dense<0.000000e+00> : vector<2x512xf32>
    %328 = tpu.matmul %327, %294, %cst_130 {dimension_numbers = #tpu.dot_dimension_numbers<[1], [0], [0], [1], [0, 0, 1, 1], [], []>} : vector<2x128xbf16>, vector<128x512xbf16>, vector<2x512xf32> -> vector<2x512xf32>
    %329 = arith.addf %326, %328 : vector<2x512xf32>
    %330 = vector.extract_strided_slice %329 {offsets = [0, 0], sizes = [2, 128], strides = [1, 1]} : vector<2x512xf32> to vector<2x128xf32>
    %331 = arith.negf %330 : vector<2x128xf32>
    %332 = math.exp %331 : vector<2x128xf32>
    %cst_131 = arith.constant 1.000000e+00 : f32
    %333 = vector.broadcast %cst_131 : f32 to vector<2x128xf32>
    %334 = arith.addf %333, %332 : vector<2x128xf32>
    %335 = arith.divf %333, %334 : vector<2x128xf32>
    %336 = vector.extract_strided_slice %329 {offsets = [0, 128], sizes = [2, 128], strides = [1, 1]} : vector<2x512xf32> to vector<2x128xf32>
    %337 = arith.negf %336 : vector<2x128xf32>
    %338 = math.exp %337 : vector<2x128xf32>
    %cst_132 = arith.constant 1.000000e+00 : f32
    %339 = vector.broadcast %cst_132 : f32 to vector<2x128xf32>
    %340 = arith.addf %339, %338 : vector<2x128xf32>
    %341 = arith.divf %339, %340 : vector<2x128xf32>
    %342 = vector.extract_strided_slice %329 {offsets = [0, 256], sizes = [2, 128], strides = [1, 1]} : vector<2x512xf32> to vector<2x128xf32>
    %343 = math.tanh %342 : vector<2x128xf32>
    %344 = vector.extract_strided_slice %329 {offsets = [0, 384], sizes = [2, 128], strides = [1, 1]} : vector<2x512xf32> to vector<2x128xf32>
    %345 = arith.negf %344 : vector<2x128xf32>
    %346 = math.exp %345 : vector<2x128xf32>
    %cst_133 = arith.constant 1.000000e+00 : f32
    %347 = vector.broadcast %cst_133 : f32 to vector<2x128xf32>
    %348 = arith.addf %347, %346 : vector<2x128xf32>
    %349 = arith.divf %347, %348 : vector<2x128xf32>
    %350 = arith.mulf %341, %323 : vector<2x128xf32>
    %351 = arith.mulf %335, %343 : vector<2x128xf32>
    %352 = arith.addf %350, %351 : vector<2x128xf32>
    %353 = math.tanh %352 : vector<2x128xf32>
    %354 = arith.mulf %349, %353 : vector<2x128xf32>
    %355 = vector.extract_strided_slice %293 {offsets = [4, 0], sizes = [2, 512], strides = [1, 1]} : vector<16x512xf32> to vector<2x512xf32>
    %356 = arith.truncf %354 : vector<2x128xf32> to vector<2x128xbf16>
    %cst_134 = arith.constant dense<0.000000e+00> : vector<2x512xf32>
    %357 = tpu.matmul %356, %294, %cst_134 {dimension_numbers = #tpu.dot_dimension_numbers<[1], [0], [0], [1], [0, 0, 1, 1], [], []>} : vector<2x128xbf16>, vector<128x512xbf16>, vector<2x512xf32> -> vector<2x512xf32>
    %358 = arith.addf %355, %357 : vector<2x512xf32>
    %359 = vector.extract_strided_slice %358 {offsets = [0, 0], sizes = [2, 128], strides = [1, 1]} : vector<2x512xf32> to vector<2x128xf32>
    %360 = arith.negf %359 : vector<2x128xf32>
    %361 = math.exp %360 : vector<2x128xf32>
    %cst_135 = arith.constant 1.000000e+00 : f32
    %362 = vector.broadcast %cst_135 : f32 to vector<2x128xf32>
    %363 = arith.addf %362, %361 : vector<2x128xf32>
    %364 = arith.divf %362, %363 : vector<2x128xf32>
    %365 = vector.extract_strided_slice %358 {offsets = [0, 128], sizes = [2, 128], strides = [1, 1]} : vector<2x512xf32> to vector<2x128xf32>
    %366 = arith.negf %365 : vector<2x128xf32>
    %367 = math.exp %366 : vector<2x128xf32>
    %cst_136 = arith.constant 1.000000e+00 : f32
    %368 = vector.broadcast %cst_136 : f32 to vector<2x128xf32>
    %369 = arith.addf %368, %367 : vector<2x128xf32>
    %370 = arith.divf %368, %369 : vector<2x128xf32>
    %371 = vector.extract_strided_slice %358 {offsets = [0, 256], sizes = [2, 128], strides = [1, 1]} : vector<2x512xf32> to vector<2x128xf32>
    %372 = math.tanh %371 : vector<2x128xf32>
    %373 = vector.extract_strided_slice %358 {offsets = [0, 384], sizes = [2, 128], strides = [1, 1]} : vector<2x512xf32> to vector<2x128xf32>
    %374 = arith.negf %373 : vector<2x128xf32>
    %375 = math.exp %374 : vector<2x128xf32>
    %cst_137 = arith.constant 1.000000e+00 : f32
    %376 = vector.broadcast %cst_137 : f32 to vector<2x128xf32>
    %377 = arith.addf %376, %375 : vector<2x128xf32>
    %378 = arith.divf %376, %377 : vector<2x128xf32>
    %379 = arith.mulf %370, %352 : vector<2x128xf32>
    %380 = arith.mulf %364, %372 : vector<2x128xf32>
    %381 = arith.addf %379, %380 : vector<2x128xf32>
    %382 = math.tanh %381 : vector<2x128xf32>
    %383 = arith.mulf %378, %382 : vector<2x128xf32>
    %384 = vector.extract_strided_slice %293 {offsets = [6, 0], sizes = [2, 512], strides = [1, 1]} : vector<16x512xf32> to vector<2x512xf32>
    %385 = arith.truncf %383 : vector<2x128xf32> to vector<2x128xbf16>
    %cst_138 = arith.constant dense<0.000000e+00> : vector<2x512xf32>
    %386 = tpu.matmul %385, %294, %cst_138 {dimension_numbers = #tpu.dot_dimension_numbers<[1], [0], [0], [1], [0, 0, 1, 1], [], []>} : vector<2x128xbf16>, vector<128x512xbf16>, vector<2x512xf32> -> vector<2x512xf32>
    %387 = arith.addf %384, %386 : vector<2x512xf32>
    %388 = vector.extract_strided_slice %387 {offsets = [0, 0], sizes = [2, 128], strides = [1, 1]} : vector<2x512xf32> to vector<2x128xf32>
    %389 = arith.negf %388 : vector<2x128xf32>
    %390 = math.exp %389 : vector<2x128xf32>
    %cst_139 = arith.constant 1.000000e+00 : f32
    %391 = vector.broadcast %cst_139 : f32 to vector<2x128xf32>
    %392 = arith.addf %391, %390 : vector<2x128xf32>
    %393 = arith.divf %391, %392 : vector<2x128xf32>
    %394 = vector.extract_strided_slice %387 {offsets = [0, 128], sizes = [2, 128], strides = [1, 1]} : vector<2x512xf32> to vector<2x128xf32>
    %395 = arith.negf %394 : vector<2x128xf32>
    %396 = math.exp %395 : vector<2x128xf32>
    %cst_140 = arith.constant 1.000000e+00 : f32
    %397 = vector.broadcast %cst_140 : f32 to vector<2x128xf32>
    %398 = arith.addf %397, %396 : vector<2x128xf32>
    %399 = arith.divf %397, %398 : vector<2x128xf32>
    %400 = vector.extract_strided_slice %387 {offsets = [0, 256], sizes = [2, 128], strides = [1, 1]} : vector<2x512xf32> to vector<2x128xf32>
    %401 = math.tanh %400 : vector<2x128xf32>
    %402 = vector.extract_strided_slice %387 {offsets = [0, 384], sizes = [2, 128], strides = [1, 1]} : vector<2x512xf32> to vector<2x128xf32>
    %403 = arith.negf %402 : vector<2x128xf32>
    %404 = math.exp %403 : vector<2x128xf32>
    %cst_141 = arith.constant 1.000000e+00 : f32
    %405 = vector.broadcast %cst_141 : f32 to vector<2x128xf32>
    %406 = arith.addf %405, %404 : vector<2x128xf32>
    %407 = arith.divf %405, %406 : vector<2x128xf32>
    %408 = arith.mulf %399, %381 : vector<2x128xf32>
    %409 = arith.mulf %393, %401 : vector<2x128xf32>
    %410 = arith.addf %408, %409 : vector<2x128xf32>
    %411 = math.tanh %410 : vector<2x128xf32>
    %412 = arith.mulf %407, %411 : vector<2x128xf32>
    %413 = vector.extract_strided_slice %293 {offsets = [8, 0], sizes = [2, 512], strides = [1, 1]} : vector<16x512xf32> to vector<2x512xf32>
    %414 = arith.truncf %412 : vector<2x128xf32> to vector<2x128xbf16>
    %cst_142 = arith.constant dense<0.000000e+00> : vector<2x512xf32>
    %415 = tpu.matmul %414, %294, %cst_142 {dimension_numbers = #tpu.dot_dimension_numbers<[1], [0], [0], [1], [0, 0, 1, 1], [], []>} : vector<2x128xbf16>, vector<128x512xbf16>, vector<2x512xf32> -> vector<2x512xf32>
    %416 = arith.addf %413, %415 : vector<2x512xf32>
    %417 = vector.extract_strided_slice %416 {offsets = [0, 0], sizes = [2, 128], strides = [1, 1]} : vector<2x512xf32> to vector<2x128xf32>
    %418 = arith.negf %417 : vector<2x128xf32>
    %419 = math.exp %418 : vector<2x128xf32>
    %cst_143 = arith.constant 1.000000e+00 : f32
    %420 = vector.broadcast %cst_143 : f32 to vector<2x128xf32>
    %421 = arith.addf %420, %419 : vector<2x128xf32>
    %422 = arith.divf %420, %421 : vector<2x128xf32>
    %423 = vector.extract_strided_slice %416 {offsets = [0, 128], sizes = [2, 128], strides = [1, 1]} : vector<2x512xf32> to vector<2x128xf32>
    %424 = arith.negf %423 : vector<2x128xf32>
    %425 = math.exp %424 : vector<2x128xf32>
    %cst_144 = arith.constant 1.000000e+00 : f32
    %426 = vector.broadcast %cst_144 : f32 to vector<2x128xf32>
    %427 = arith.addf %426, %425 : vector<2x128xf32>
    %428 = arith.divf %426, %427 : vector<2x128xf32>
    %429 = vector.extract_strided_slice %416 {offsets = [0, 256], sizes = [2, 128], strides = [1, 1]} : vector<2x512xf32> to vector<2x128xf32>
    %430 = math.tanh %429 : vector<2x128xf32>
    %431 = vector.extract_strided_slice %416 {offsets = [0, 384], sizes = [2, 128], strides = [1, 1]} : vector<2x512xf32> to vector<2x128xf32>
    %432 = arith.negf %431 : vector<2x128xf32>
    %433 = math.exp %432 : vector<2x128xf32>
    %cst_145 = arith.constant 1.000000e+00 : f32
    %434 = vector.broadcast %cst_145 : f32 to vector<2x128xf32>
    %435 = arith.addf %434, %433 : vector<2x128xf32>
    %436 = arith.divf %434, %435 : vector<2x128xf32>
    %437 = arith.mulf %428, %410 : vector<2x128xf32>
    %438 = arith.mulf %422, %430 : vector<2x128xf32>
    %439 = arith.addf %437, %438 : vector<2x128xf32>
    %440 = math.tanh %439 : vector<2x128xf32>
    %441 = arith.mulf %436, %440 : vector<2x128xf32>
    %442 = vector.extract_strided_slice %293 {offsets = [10, 0], sizes = [2, 512], strides = [1, 1]} : vector<16x512xf32> to vector<2x512xf32>
    %443 = arith.truncf %441 : vector<2x128xf32> to vector<2x128xbf16>
    %cst_146 = arith.constant dense<0.000000e+00> : vector<2x512xf32>
    %444 = tpu.matmul %443, %294, %cst_146 {dimension_numbers = #tpu.dot_dimension_numbers<[1], [0], [0], [1], [0, 0, 1, 1], [], []>} : vector<2x128xbf16>, vector<128x512xbf16>, vector<2x512xf32> -> vector<2x512xf32>
    %445 = arith.addf %442, %444 : vector<2x512xf32>
    %446 = vector.extract_strided_slice %445 {offsets = [0, 0], sizes = [2, 128], strides = [1, 1]} : vector<2x512xf32> to vector<2x128xf32>
    %447 = arith.negf %446 : vector<2x128xf32>
    %448 = math.exp %447 : vector<2x128xf32>
    %cst_147 = arith.constant 1.000000e+00 : f32
    %449 = vector.broadcast %cst_147 : f32 to vector<2x128xf32>
    %450 = arith.addf %449, %448 : vector<2x128xf32>
    %451 = arith.divf %449, %450 : vector<2x128xf32>
    %452 = vector.extract_strided_slice %445 {offsets = [0, 128], sizes = [2, 128], strides = [1, 1]} : vector<2x512xf32> to vector<2x128xf32>
    %453 = arith.negf %452 : vector<2x128xf32>
    %454 = math.exp %453 : vector<2x128xf32>
    %cst_148 = arith.constant 1.000000e+00 : f32
    %455 = vector.broadcast %cst_148 : f32 to vector<2x128xf32>
    %456 = arith.addf %455, %454 : vector<2x128xf32>
    %457 = arith.divf %455, %456 : vector<2x128xf32>
    %458 = vector.extract_strided_slice %445 {offsets = [0, 256], sizes = [2, 128], strides = [1, 1]} : vector<2x512xf32> to vector<2x128xf32>
    %459 = math.tanh %458 : vector<2x128xf32>
    %460 = vector.extract_strided_slice %445 {offsets = [0, 384], sizes = [2, 128], strides = [1, 1]} : vector<2x512xf32> to vector<2x128xf32>
    %461 = arith.negf %460 : vector<2x128xf32>
    %462 = math.exp %461 : vector<2x128xf32>
    %cst_149 = arith.constant 1.000000e+00 : f32
    %463 = vector.broadcast %cst_149 : f32 to vector<2x128xf32>
    %464 = arith.addf %463, %462 : vector<2x128xf32>
    %465 = arith.divf %463, %464 : vector<2x128xf32>
    %466 = arith.mulf %457, %439 : vector<2x128xf32>
    %467 = arith.mulf %451, %459 : vector<2x128xf32>
    %468 = arith.addf %466, %467 : vector<2x128xf32>
    %469 = math.tanh %468 : vector<2x128xf32>
    %470 = arith.mulf %465, %469 : vector<2x128xf32>
    %471 = vector.extract_strided_slice %293 {offsets = [12, 0], sizes = [2, 512], strides = [1, 1]} : vector<16x512xf32> to vector<2x512xf32>
    %472 = arith.truncf %470 : vector<2x128xf32> to vector<2x128xbf16>
    %cst_150 = arith.constant dense<0.000000e+00> : vector<2x512xf32>
    %473 = tpu.matmul %472, %294, %cst_150 {dimension_numbers = #tpu.dot_dimension_numbers<[1], [0], [0], [1], [0, 0, 1, 1], [], []>} : vector<2x128xbf16>, vector<128x512xbf16>, vector<2x512xf32> -> vector<2x512xf32>
    %474 = arith.addf %471, %473 : vector<2x512xf32>
    %475 = vector.extract_strided_slice %474 {offsets = [0, 0], sizes = [2, 128], strides = [1, 1]} : vector<2x512xf32> to vector<2x128xf32>
    %476 = arith.negf %475 : vector<2x128xf32>
    %477 = math.exp %476 : vector<2x128xf32>
    %cst_151 = arith.constant 1.000000e+00 : f32
    %478 = vector.broadcast %cst_151 : f32 to vector<2x128xf32>
    %479 = arith.addf %478, %477 : vector<2x128xf32>
    %480 = arith.divf %478, %479 : vector<2x128xf32>
    %481 = vector.extract_strided_slice %474 {offsets = [0, 128], sizes = [2, 128], strides = [1, 1]} : vector<2x512xf32> to vector<2x128xf32>
    %482 = arith.negf %481 : vector<2x128xf32>
    %483 = math.exp %482 : vector<2x128xf32>
    %cst_152 = arith.constant 1.000000e+00 : f32
    %484 = vector.broadcast %cst_152 : f32 to vector<2x128xf32>
    %485 = arith.addf %484, %483 : vector<2x128xf32>
    %486 = arith.divf %484, %485 : vector<2x128xf32>
    %487 = vector.extract_strided_slice %474 {offsets = [0, 256], sizes = [2, 128], strides = [1, 1]} : vector<2x512xf32> to vector<2x128xf32>
    %488 = math.tanh %487 : vector<2x128xf32>
    %489 = vector.extract_strided_slice %474 {offsets = [0, 384], sizes = [2, 128], strides = [1, 1]} : vector<2x512xf32> to vector<2x128xf32>
    %490 = arith.negf %489 : vector<2x128xf32>
    %491 = math.exp %490 : vector<2x128xf32>
    %cst_153 = arith.constant 1.000000e+00 : f32
    %492 = vector.broadcast %cst_153 : f32 to vector<2x128xf32>
    %493 = arith.addf %492, %491 : vector<2x128xf32>
    %494 = arith.divf %492, %493 : vector<2x128xf32>
    %495 = arith.mulf %486, %468 : vector<2x128xf32>
    %496 = arith.mulf %480, %488 : vector<2x128xf32>
    %497 = arith.addf %495, %496 : vector<2x128xf32>
    %498 = math.tanh %497 : vector<2x128xf32>
    %499 = arith.mulf %494, %498 : vector<2x128xf32>
    %500 = vector.extract_strided_slice %293 {offsets = [14, 0], sizes = [2, 512], strides = [1, 1]} : vector<16x512xf32> to vector<2x512xf32>
    %501 = arith.truncf %499 : vector<2x128xf32> to vector<2x128xbf16>
    %cst_154 = arith.constant dense<0.000000e+00> : vector<2x512xf32>
    %502 = tpu.matmul %501, %294, %cst_154 {dimension_numbers = #tpu.dot_dimension_numbers<[1], [0], [0], [1], [0, 0, 1, 1], [], []>} : vector<2x128xbf16>, vector<128x512xbf16>, vector<2x512xf32> -> vector<2x512xf32>
    %503 = arith.addf %500, %502 : vector<2x512xf32>
    %504 = vector.extract_strided_slice %503 {offsets = [0, 0], sizes = [2, 128], strides = [1, 1]} : vector<2x512xf32> to vector<2x128xf32>
    %505 = arith.negf %504 : vector<2x128xf32>
    %506 = math.exp %505 : vector<2x128xf32>
    %cst_155 = arith.constant 1.000000e+00 : f32
    %507 = vector.broadcast %cst_155 : f32 to vector<2x128xf32>
    %508 = arith.addf %507, %506 : vector<2x128xf32>
    %509 = arith.divf %507, %508 : vector<2x128xf32>
    %510 = vector.extract_strided_slice %503 {offsets = [0, 128], sizes = [2, 128], strides = [1, 1]} : vector<2x512xf32> to vector<2x128xf32>
    %511 = arith.negf %510 : vector<2x128xf32>
    %512 = math.exp %511 : vector<2x128xf32>
    %cst_156 = arith.constant 1.000000e+00 : f32
    %513 = vector.broadcast %cst_156 : f32 to vector<2x128xf32>
    %514 = arith.addf %513, %512 : vector<2x128xf32>
    %515 = arith.divf %513, %514 : vector<2x128xf32>
    %516 = vector.extract_strided_slice %503 {offsets = [0, 256], sizes = [2, 128], strides = [1, 1]} : vector<2x512xf32> to vector<2x128xf32>
    %517 = math.tanh %516 : vector<2x128xf32>
    %518 = vector.extract_strided_slice %503 {offsets = [0, 384], sizes = [2, 128], strides = [1, 1]} : vector<2x512xf32> to vector<2x128xf32>
    %519 = arith.negf %518 : vector<2x128xf32>
    %520 = math.exp %519 : vector<2x128xf32>
    %cst_157 = arith.constant 1.000000e+00 : f32
    %521 = vector.broadcast %cst_157 : f32 to vector<2x128xf32>
    %522 = arith.addf %521, %520 : vector<2x128xf32>
    %523 = arith.divf %521, %522 : vector<2x128xf32>
    %524 = arith.mulf %515, %497 : vector<2x128xf32>
    %525 = arith.mulf %509, %517 : vector<2x128xf32>
    %526 = arith.addf %524, %525 : vector<2x128xf32>
    %527 = math.tanh %526 : vector<2x128xf32>
    %528 = arith.mulf %523, %527 : vector<2x128xf32>
    %c0_158 = arith.constant 0 : index
    %c0_159 = arith.constant 0 : index
    %529 = vector.load %arg31[%c0_158, %c0_159] : memref<128x4xbf16, #tpu.memory_space<vmem>>, vector<128x4xbf16>
    %530 = arith.truncf %528 : vector<2x128xf32> to vector<2x128xbf16>
    %cst_160 = arith.constant dense<0.000000e+00> : vector<2x4xf32>
    %531 = tpu.matmul %530, %529, %cst_160 {dimension_numbers = #tpu.dot_dimension_numbers<[1], [0], [0], [1], [0, 0, 1, 1], [], []>} : vector<2x128xbf16>, vector<128x4xbf16>, vector<2x4xf32> -> vector<2x4xf32>
    %c0_161 = arith.constant 0 : index
    %c0_162 = arith.constant 0 : index
    %532 = vector.load %arg32[%c0_161, %c0_162] : memref<1x4xf32, #tpu.memory_space<vmem>>, vector<1x4xf32>
    %533 = vector.broadcast %532 : vector<1x4xf32> to vector<2x4xf32>
    %534 = arith.addf %531, %533 : vector<2x4xf32>
    %c0_163 = arith.constant 0 : index
    %c0_164 = arith.constant 0 : index
    %535 = vector.load %arg33[%c0_163, %c0_164] : memref<2x4xf32, #tpu.memory_space<vmem>>, vector<2x4xf32>
    tpu.vector_store %arg33[%c0_163, %c0_164], %534 {strides = array<i32>} : memref<2x4xf32, #tpu.memory_space<vmem>>, vector<2x4xf32>,
    return
  }
}

</mosaic_0001>

<bundles_post_ra>
// kernel: bert_lstm_forward.1
= control target key start
LH: loop header
LB: loop body
LE: loop exit
PB: predicated region body
PF: predicated region fallthrough
CT: control target
= control target key end

     0   :  { %s7415_s6 = smov 1   ;;  %s7416_s10 = smov 2   ;;  %s8586_s0 = inlined_call_operand.smem [shape: u32[34], index: -1, kind: input, shape index: {}] }
   0x1   :  { %s7486_s5 = sld [smem:[%s8586_s0]]   ;;  %s7417_s14 = smov 3  }
   0x2   :  { %s7491_s9 = sld [smem:[%s8586_s0 + %s7415_s6]]   ;;  %s7418_s18 = smov 4  }
   0x3   :  { %s7496_s13 = sld [smem:[%s8586_s0 + %s7416_s10]]   ;;  %s7419_s22 = smov 5  }
   0x4   :  { %s7501_s17 = sld [smem:[%s8586_s0 + %s7417_s14]]   ;;  %s7420_s26 = smov 6  }
   0x5   :  { %s7506_s21 = sld [smem:[%s8586_s0 + %s7418_s18]]   ;;  %s7421_s30 = smov 7  }
   0x6   :  { %s7511_s25 = sld [smem:[%s8586_s0 + %s7419_s22]]   ;;  %s7422_s4 = smov 8  }
   0x7   :  { %8595 = sst [smem:[#allocation47_spill]] %s7486_s5  ;;  %s7423_s10 = smov 9  }
   0x8   :  { %8596 = sst [smem:[#allocation48_spill]] %s7491_s9  ;;  %s7424_s15 = smov 10  }
   0x9   :  { %8597 = sst [smem:[#allocation49_spill]] %s7496_s13  ;;  %s7425_s20 = smov 11  }
   0xa   :  { %s7516_s29 = sld [smem:[%s8586_s0 + %s7420_s26]]   ;;  %s7426_s26 = smov 12  }
   0xb   :  { %8598 = sst [smem:[#allocation50_spill]] %s7506_s21  ;;  %s7427_s1 = smov 13  }
   0xc   :  { %8599 = sst [smem:[#allocation51_spill]] %s7511_s25  ;;  %s7428_s7 = smov 14  }
   0xd   :  { %s7521_s3 = sld [smem:[%s8586_s0 + %s7421_s30]]   ;;  %s7430_s22 = smov 16  }
   0xe   :  { %s7526_s8 = sld [smem:[%s8586_s0 + %s7422_s4]]   ;;  %s7431_s28 = smov 17  }
   0xf   :  { %s7531_s14 = sld [smem:[%s8586_s0 + %s7423_s10]]  }
  0x10   :  { %s7536_s19 = sld [smem:[%s8586_s0 + %s7424_s15]]   ;;  %s7429_s15 = smov 15  }
  0x11   :  { %s7541_s24 = sld [smem:[%s8586_s0 + %s7425_s20]]  }
  0x12   :  { %s7546_s30 = sld [smem:[%s8586_s0 + %s7426_s26]]  }
  0x13   :  { %s7551_s6 = sld [smem:[%s8586_s0 + %s7427_s1]]  }
  0x14   :  { %s7556_s12 = sld [smem:[%s8586_s0 + %s7428_s7]]   ;;  %s7432_s7 = smov 18  }
  0x15   :  { %s7561_s20 = sld [smem:[%s8586_s0 + %s7429_s15]]   ;;  %s7433_s15 = smov 19  }
  0x16   :  { %s7566_s27 = sld [smem:[%s8586_s0 + %s7430_s22]]   ;;  %s7434_s22 = smov 20  }
  0x17   :  { %s7571_s4 = sld [smem:[%s8586_s0 + %s7431_s28]]   ;;  %s7435_s28 = smov 21  }
  0x18   :  { %s7576_s9 = sld [smem:[%s8586_s0 + %s7432_s7]]   ;;  %s7436_s7 = smov 22  }
  0x19   :  { %s7581_s25 = sld [smem:[%s8586_s0 + %s7433_s15]]   ;;  %s7437_s15 = smov 23  }
  0x1a   :  { %s7586_s13 = sld [smem:[%s8586_s0 + %s7434_s22]]   ;;  %s7438_s22 = smov 24  }
  0x1b   :  { %8600 = sst [smem:[#allocation52_spill]] %s7561_s20 }
  0x1c   :  { %s7596_s21 = sld [smem:[%s8586_s0 + %s7436_s7]]   ;;  %s7440_s7 = smov 26  }
  0x1d   :  { %8601 = sst [smem:[#allocation53_spill]] %s7571_s4 }
  0x1e   :  { %8602 = sst [smem:[#allocation54_spill]] %s7576_s9 }
  0x1f   :  { %8603 = sst [smem:[#allocation55_spill]] %s7581_s25 }
  0x20   :  { %8604 = sst [smem:[#allocation56_spill]] %s7586_s13 }
  0x21   :  { %s7591_s4 = sld [smem:[%s8586_s0 + %s7435_s28]]   ;;  %s7439_s28 = smov 25  }
  0x22   :  { %s7601_s25 = sld [smem:[%s8586_s0 + %s7437_s15]]   ;;  %s7441_s15 = smov 27  }
  0x23   :  { %s7606_s13 = sld [smem:[%s8586_s0 + %s7438_s22]]   ;;  %s7442_s22 = smov 28  }
  0x24   :  { %s7616_s5 = sld [smem:[%s8586_s0 + %s7440_s7]]   ;;  %s7444_s7 = smov 30  }
  0x25   :  { %s7626_s9 = sld [smem:[%s8586_s0 + %s7442_s22]]   ;;  %s7446_s22 = smov 32  }
  0x26   :  { %s7646_s20 = sld [smem:[%s8586_s0 + %s7446_s22]]  }
  0x27   :  { %8605 = sst [smem:[#allocation57_spill]] %s7591_s4 }
  0x28   :  { %8606 = sst [smem:[#allocation58_spill]] %s7601_s25 }
  0x29   :  { %s7611_s4 = sld [smem:[%s8586_s0 + %s7439_s28]]   ;;  %s7443_s28 = smov 29  }
  0x2a   :  { %8608 = sst [smem:[#allocation60_spill]] %s7616_s5 }
  0x2b   :  { %s7621_s25 = sld [smem:[%s8586_s0 + %s7441_s15]]   ;;  %s7445_s15 = smov 31  }
  0x2c   :  { %s7636_s5 = sld [smem:[%s8586_s0 + %s7444_s7]]  }
  0x2f   :  { %8607 = sst [smem:[#allocation59_spill]] %s7611_s4 }
  0x30   :  { %s7631_s4 = sld [smem:[%s8586_s0 + %s7443_s28]]   ;;  %s7447_s28 = smov 33  }
  0x31   :  { %8609 = sst [smem:[#allocation61_spill]] %s7621_s25 }
  0x32   :  { %s7641_s25 = sld [smem:[%s8586_s0 + %s7445_s15]]  }
  0x36   :  { %8610 = sst [smem:[#allocation62_spill]] %s7631_s4 }
  0x37   :  { %s7651_s4 = sld [smem:[%s8586_s0 + %s7447_s28]]  }
  0x38   :  { %72 = vsyncpa [#allocation3], 0 }
  0x39   :  { %73 = vsyncpa [#allocation6], 0 }
  0x3a   :  { %74 = vsyncpa [#allocation9], 0 }
  0x3b   :  { %75 = vsyncpa [#allocation12], 0 }
  0x3c   :  { %76 = vsyncpa [#allocation15], 0 }
  0x3d   :  { %77 = vsyncpa [#allocation18], 0 }
  0x3e   :  { %78 = vsyncpa [#allocation21], 0 }
  0x3f   :  { %79 = vsyncpa [#allocation24], 0 }
  0x40   :  { %80 = vsyncpa [#allocation27], 0 }
  0x41   :  { %81 = vsyncpa [#allocation30], 0 }
  0x42   :  { %82 = vsyncpa [#allocation33], 0 }
  0x43   :  { %83 = vsyncpa [#allocation4], 0  ;;  %s7448_s7 = smov [#allocation5]   ;;  %s6929_s0 = scalar_lea.hbm %s7516_s29, 2048 }
  0x44   :  { %s109_s10 = sshll.u32 %s7448_s7, 4  ;;  %p6930_p0 = scmp.ne.s32.totalorder %s7516_s29, %s6929_s0  ;;  %s110_s10 = int_to_ptr.vmem [resolvable:$true] %s109_s10 }
  0x45   :  { %p6933_p1 = scmp.lt.u32.totalorder %s6929_s0, %s7516_s29 }
  0x47   :  { %p6935_p2 = pnand %p6933_p1, %p6930_p0 }
  0x49   :  { %6938 = shalt.err (!%p6935_p2)
}
  0x4a   :  { %s6939_s11 = scalar_lea.vmem %s110_s10, 2048  ;;  %p6944_p4 = scmp.lt.s32.totalorder %s110_s10, %s110_s10 }
  0x4b   :  { %p6940_p3 = scmp.ne.s32.totalorder %s110_s10, %s6939_s11  ;;  %p6945_p5 = scmp.lt.s32.totalorder %s6939_s11, %s6939_s11 }
  0x4d   :  { %p6946_p6 = por %p6945_p5, %p6944_p4 }
  0x4f   :  { %p6947_p7 = pnand %p6946_p6, %p6940_p3 }
  0x51   :  { %6950 = shalt.err (!%p6947_p7)
}
  0x52   :  { %s7449_s15 = smov 64   ;;  %s7450_s16 = smov 4  }
  0x53   :  { %115 = dma.hbm_to_vmem [thread:$0]  %s7516_s29, 2048, %s110_s10, [#allocation6], %s7449_s15, %s7449_s15, %s7450_s16  }
  0x54   :  { %s7451_s18 = smov [#allocation8]   ;;  %s7452_s23 = smov [#allocation11]  }
  0x55   :  { %s132_s22 = sshll.u32 %s7451_s18, 4  ;;  %s151_s26 = sshll.u32 %s7452_s23, 4  ;;  %s133_s22 = int_to_ptr.vmem [resolvable:$true] %s132_s22  ;;  %s152_s26 = int_to_ptr.vmem [resolvable:$true] %s151_s26 }
  0x56   :  { %s6951_s28 = scalar_lea.hbm %s7526_s8, 16 }
  0x57   :  { %p6952_p8 = scmp.ne.s32.totalorder %s7526_s8, %s6951_s28  ;;  %p6955_p9 = scmp.lt.u32.totalorder %s6951_s28, %s7526_s8 }
  0x59   :  { %p6957_p10 = pnand %p6955_p9, %p6952_p8 }
  0x5b   :  { %6960 = shalt.err (!%p6957_p10)
}
  0x5c   :  { %s6961_s1 = scalar_lea.vmem %s133_s22, 16  ;;  %s6965_s2 = scalar_lea.vmem %s133_s22, 32 }
  0x5d   :  { %p6962_p11 = scmp.ne.s32.totalorder %s133_s22, %s6961_s1  ;;  %p6966_p12 = scmp.lt.s32.totalorder %s133_s22, %s133_s22 }
  0x5e   :  { %p6967_p13 = scmp.lt.s32.totalorder %s6965_s2, %s6961_s1 }
  0x60   :  { %p6968_p0 = por %p6967_p13, %p6966_p12 }
  0x62   :  { %p6969_p1 = pnand %p6968_p0, %p6962_p11 }
  0x64   :  { %6972 = shalt.err (!%p6969_p1)
}
  0x65   :  { %135 = dma.hbm_to_vmem [thread:$0]  %s7526_s8, 16, %s133_s22, [#allocation9]  }
  0x66   :  { %s6973_s29 = scalar_lea.hbm %s7536_s19, 4096 }
  0x67   :  { %p6974_p2 = scmp.ne.s32.totalorder %s7536_s19, %s6973_s29  ;;  %p6977_p3 = scmp.lt.u32.totalorder %s6973_s29, %s7536_s19 }
  0x69   :  { %p6979_p4 = pnand %p6977_p3, %p6974_p2 }
  0x6b   :  { %6982 = shalt.err (!%p6979_p4)
}
  0x6c   :  { %s6983_s7 = scalar_lea.vmem %s152_s26, 4096  ;;  %p6988_p6 = scmp.lt.s32.totalorder %s152_s26, %s152_s26 }
  0x6d   :  { %p6984_p5 = scmp.ne.s32.totalorder %s152_s26, %s6983_s7  ;;  %p6989_p7 = scmp.lt.s32.totalorder %s6983_s7, %s6983_s7 }
  0x6f   :  { %p6990_p8 = por %p6989_p7, %p6988_p6 }
  0x71   :  { %p6991_p9 = pnand %p6990_p8, %p6984_p5 }
  0x73   :  { %6994 = shalt.err (!%p6991_p9)
}
  0x74   :  { %s7453_s10 = smov 256   ;;  %s7454_s0 = smov 16  }
  0x75   :  { %157 = dma.hbm_to_vmem [thread:$0]  %s7536_s19, 4096, %s152_s26, [#allocation12], %s7453_s10, %s7453_s10, %s7454_s0  }
  0x76   :  { %s7455_s8 = smov [#allocation14]   ;;  %s7456_s18 = smov [#allocation17]  }
  0x77   :  { %s173_s11 = sshll.u32 %s7455_s8, 4  ;;  %s196_s22 = sshll.u32 %s7456_s18, 4  ;;  %s174_s11 = int_to_ptr.vmem [resolvable:$true] %s173_s11  ;;  %s197_s22 = int_to_ptr.vmem [resolvable:$true] %s196_s22 }
  0x78   :  { %s6995_s23 = scalar_lea.hbm %s7546_s30, 4096 }
  0x79   :  { %p6996_p10 = scmp.ne.s32.totalorder %s7546_s30, %s6995_s23  ;;  %p6999_p11 = scmp.lt.u32.totalorder %s6995_s23, %s7546_s30 }
  0x7b   :  { %p7001_p12 = pnand %p6999_p11, %p6996_p10 }
  0x7d   :  { %7004 = shalt.err (!%p7001_p12)
}
  0x7e   :  { %s7005_s28 = scalar_lea.vmem %s174_s11, 4096  ;;  %p7010_p0 = scmp.lt.s32.totalorder %s174_s11, %s174_s11 }
  0x7f   :  { %p7006_p13 = scmp.ne.s32.totalorder %s174_s11, %s7005_s28  ;;  %p7011_p1 = scmp.lt.s32.totalorder %s7005_s28, %s7005_s28 }
  0x81   :  { %p7012_p2 = por %p7011_p1, %p7010_p0 }
  0x83   :  { %p7013_p3 = pnand %p7012_p2, %p7006_p13 }
  0x85   :  { %7016 = shalt.err (!%p7013_p3)
}
  0x86   :  { %179 = dma.hbm_to_vmem [thread:$0]  %s7546_s30, 4096, %s174_s11, [#allocation15], %s7449_s15, %s7449_s15, %s7450_s16  }
  0x87   :  { %s7017_s19 = scalar_lea.hbm %s7556_s12, 16 }
  0x88   :  { %p7018_p4 = scmp.ne.s32.totalorder %s7556_s12, %s7017_s19  ;;  %p7021_p5 = scmp.lt.u32.totalorder %s7017_s19, %s7556_s12 }
  0x8a   :  { %p7023_p6 = pnand %p7021_p5, %p7018_p4 }
  0x8c   :  { %7026 = shalt.err (!%p7023_p6)
}
  0x8d   :  { %s7027_s26 = scalar_lea.vmem %s197_s22, 16  ;;  %s7031_s1 = scalar_lea.vmem %s197_s22, 32 }
  0x8e   :  { %p7028_p7 = scmp.ne.s32.totalorder %s197_s22, %s7027_s26  ;;  %p7032_p8 = scmp.lt.s32.totalorder %s197_s22, %s197_s22 }
  0x8f   :  { %p7033_p9 = scmp.lt.s32.totalorder %s7031_s1, %s7027_s26 }
  0x91   :  { %p7034_p10 = por %p7033_p9, %p7032_p8 }
  0x93   :  { %p7035_p11 = pnand %p7034_p10, %p7028_p7 }
  0x95   :  { %7038 = shalt.err (!%p7035_p11)
}
  0x96   :  { %199 = dma.hbm_to_vmem [thread:$0]  %s7556_s12, 16, %s197_s22, [#allocation18]  }
  0x97   :  { %s7457_s30 = smov [#allocation20]   ;;  %s7039_s29 = scalar_lea.hbm %s7566_s27, 6144 }
  0x98   :  { %s215_s2 = sshll.u32 %s7457_s30, 4  ;;  %p7040_p12 = scmp.ne.s32.totalorder %s7566_s27, %s7039_s29  ;;  %s216_s2 = int_to_ptr.vmem [resolvable:$true] %s215_s2 }
  0x99   :  { %p7043_p13 = scmp.lt.u32.totalorder %s7039_s29, %s7566_s27 }
  0x9b   :  { %p7045_p0 = pnand %p7043_p13, %p7040_p12 }
  0x9d   :  { %7048 = shalt.err (!%p7045_p0)
}
  0x9e   :  { %s7049_s7 = scalar_lea.vmem %s216_s2, 6144  ;;  %p7054_p2 = scmp.lt.s32.totalorder %s216_s2, %s216_s2 }
  0x9f   :  { %p7050_p1 = scmp.ne.s32.totalorder %s216_s2, %s7049_s7  ;;  %p7055_p3 = scmp.lt.s32.totalorder %s7049_s7, %s7049_s7 }
  0xa1   :  { %p7056_p4 = por %p7055_p3, %p7054_p2 }
  0xa3   :  { %p7057_p5 = pnand %p7056_p4, %p7050_p1 }
  0xa5   :  { %7060 = shalt.err (!%p7057_p5)
}
  0xa6   :  { %s7458_s8 = smov 384   ;;  %s7459_s12 = smov 24  }
  0xa7   :  { %221 = dma.hbm_to_vmem [thread:$0]  %s7566_s27, 6144, %s216_s2, [#allocation21], %s7458_s8, %s7458_s8, %s7459_s12  }
  0xa8   :  { %s7460_s11 = smov [#allocation23]   ;;  %s7461_s22 = smov [#allocation26]  }
  0xa9   :  { %s247_s18 = sshll.u32 %s7460_s11, 4  ;;  %s269_s23 = sshll.u32 %s7461_s22, 4  ;;  %s248_s18 = int_to_ptr.vmem [resolvable:$true] %s247_s18  ;;  %s7686_s23 = int_to_ptr.vmem [resolvable:$true] %s269_s23 }
  0xaa   :  { %s7061_s28 = scalar_lea.hbm %s7596_s21, 4096 }
  0xab   :  { %p7062_p6 = scmp.ne.s32.totalorder %s7596_s21, %s7061_s28  ;;  %p7065_p7 = scmp.lt.u32.totalorder %s7061_s28, %s7596_s21 }
  0xad   :  { %p7067_p8 = pnand %p7065_p7, %p7062_p6 }
  0xaf   :  { %7070 = shalt.err (!%p7067_p8)
}
  0xb0   :  { %s7071_s19 = scalar_lea.vmem %s248_s18, 4096  ;;  %p7076_p10 = scmp.lt.s32.totalorder %s248_s18, %s248_s18 }
  0xb1   :  { %p7072_p9 = scmp.ne.s32.totalorder %s248_s18, %s7071_s19  ;;  %p7077_p11 = scmp.lt.s32.totalorder %s7071_s19, %s7071_s19 }
  0xb3   :  { %p7078_p12 = por %p7077_p11, %p7076_p10 }
  0xb5   :  { %p7079_p13 = pnand %p7078_p12, %p7072_p9 }
  0xb7   :  { %7082 = shalt.err (!%p7079_p13)
}
  0xb8   :  { %253 = dma.hbm_to_vmem [thread:$0]  %s7596_s21, 4096, %s248_s18, [#allocation24], %s7453_s10, %s7453_s10, %s7454_s0  }
  0xb9   :  { %s7083_s27 = scalar_lea.hbm %s7606_s13, 4096 }
  0xba   :  { %p7084_p0 = scmp.ne.s32.totalorder %s7606_s13, %s7083_s27  ;;  %p7087_p1 = scmp.lt.u32.totalorder %s7083_s27, %s7606_s13 }
  0xbc   :  { %p7089_p2 = pnand %p7087_p1, %p7084_p0 }
  0xbe   :  { %7092 = shalt.err (!%p7089_p2)
}
  0xbf   :  { %s7093_s26 = scalar_lea.vmem %s7686_s23, 4096  ;;  %p7098_p4 = scmp.lt.s32.totalorder %s7686_s23, %s7686_s23 }
  0xc0   :  { %p7094_p3 = scmp.ne.s32.totalorder %s7686_s23, %s7093_s26  ;;  %p7099_p5 = scmp.lt.s32.totalorder %s7093_s26, %s7093_s26 }
  0xc2   :  { %p7100_p6 = por %p7099_p5, %p7098_p4 }
  0xc4   :  { %p7101_p7 = pnand %p7100_p6, %p7094_p3 }
  0xc6   :  { %7104 = shalt.err (!%p7101_p7)
}
  0xc7   :  { %275 = dma.hbm_to_vmem [thread:$0]  %s7606_s13, 4096, %s7686_s23, [#allocation27], %s7449_s15, %s7449_s15, %s7450_s16  }
  0xc8   :  { %s7462_s21 = smov [#allocation29]   ;;  %s7463_s30 = smov [#allocation2]  }
  0xc9   :  { %s295_s1 = sshll.u32 %s7462_s21, 4  ;;  %s96_s2 = sshll.u32 %s7463_s30, 4  ;;  %s296_s1 = int_to_ptr.vmem [resolvable:$true] %s295_s1  ;;  %s97_s2 = int_to_ptr.vmem [resolvable:$true] %s96_s2 }
  0xca   :  { %s7105_s29 = scalar_lea.hbm %s7626_s9, 4096 }
  0xcb   :  { %p7106_p8 = scmp.ne.s32.totalorder %s7626_s9, %s7105_s29  ;;  %p7109_p9 = scmp.lt.u32.totalorder %s7105_s29, %s7626_s9 }
  0xcd   :  { %p7111_p10 = pnand %p7109_p9, %p7106_p8 }
  0xcf   :  { %7114 = shalt.err (!%p7111_p10)
}
  0xd0   :  { %s7115_s7 = scalar_lea.vmem %s296_s1, 4096  ;;  %p7120_p12 = scmp.lt.s32.totalorder %s296_s1, %s296_s1 }
  0xd1   :  { %p7116_p11 = scmp.ne.s32.totalorder %s296_s1, %s7115_s7  ;;  %p7121_p13 = scmp.lt.s32.totalorder %s7115_s7, %s7115_s7 }
  0xd3   :  { %p7122_p0 = por %p7121_p13, %p7120_p12 }
  0xd5   :  { %p7123_p1 = pnand %p7122_p0, %p7116_p11 }
  0xd7   :  { %7126 = shalt.err (!%p7123_p1)
}
  0xd8   :  { %301 = dma.hbm_to_vmem [thread:$0]  %s7626_s9, 4096, %s296_s1, [#allocation30], %s7453_s10, %s7453_s10, %s7454_s0  }
  0xd9   :  { %s7127_s13 = scalar_lea.hbm %s7501_s17, 16 }
  0xda   :  { %p7128_p2 = scmp.ne.s32.totalorder %s7501_s17, %s7127_s13  ;;  %p7131_p3 = scmp.lt.u32.totalorder %s7127_s13, %s7501_s17 }
  0xdc   :  { %p7133_p4 = pnand %p7131_p3, %p7128_p2 }
  0xde   :  { %7136 = shalt.err (!%p7133_p4)
}
  0xdf   :  { %s7137_s8 = scalar_lea.vmem %s97_s2, 16  ;;  %s7141_s12 = scalar_lea.vmem %s97_s2, 32 }
  0xe0   :  { %p7138_p5 = scmp.ne.s32.totalorder %s97_s2, %s7137_s8  ;;  %p7142_p6 = scmp.lt.s32.totalorder %s97_s2, %s97_s2 }
  0xe1   :  { %p7143_p7 = scmp.lt.s32.totalorder %s7141_s12, %s7137_s8 }
  0xe3   :  { %p7144_p8 = por %p7143_p7, %p7142_p6 }
  0xe5   :  { %p7145_p9 = pnand %p7144_p8, %p7138_p5 }
  0xe7   :  { %7148 = shalt.err (!%p7145_p9)
}
  0xe8   :  { %99 = dma.hbm_to_vmem [thread:$0]  %s7501_s17, 16, %s97_s2, [#allocation3]  }
  0xe9   :  { %s7464_s11 = smov [#allocation7]   ;;  %s7465_s18 = smov [#allocation10]  }
  0xea   :  { %s122_s9 = sshll.u32 %s7464_s11, 4  ;;  %s142_s22 = sshll.u32 %s7465_s18, 4  ;;  %s123_s9 = int_to_ptr.vmem [resolvable:$true] %s122_s9  ;;  %s143_s22 = int_to_ptr.vmem [resolvable:$true] %s142_s22 }
  0xeb   :  { %s7149_s23 = scalar_lea.hbm %s7521_s3, 16 }
  0xec   :  { %p7150_p10 = scmp.ne.s32.totalorder %s7521_s3, %s7149_s23  ;;  %p7153_p11 = scmp.lt.u32.totalorder %s7149_s23, %s7521_s3 }
  0xee   :  { %p7155_p12 = pnand %p7153_p11, %p7150_p10 }
  0xf0   :  { %7158 = shalt.err (!%p7155_p12)
}
  0xf1   :  { %s7159_s28 = scalar_lea.vmem %s123_s9, 16  ;;  %s7163_s19 = scalar_lea.vmem %s123_s9, 32 }
  0xf2   :  { %p7160_p13 = scmp.ne.s32.totalorder %s123_s9, %s7159_s28  ;;  %p7164_p0 = scmp.lt.s32.totalorder %s123_s9, %s123_s9 }
  0xf3   :  { %p7165_p1 = scmp.lt.s32.totalorder %s7163_s19, %s7159_s28 }
  0xf5   :  { %p7166_p2 = por %p7165_p1, %p7164_p0 }
  0xf7   :  { %p7167_p3 = pnand %p7166_p2, %p7160_p13 }
  0xf9   :  { %7170 = shalt.err (!%p7167_p3)
}
  0xfa   :  { %125 = dma.hbm_to_vmem [thread:$0]  %s7521_s3, 16, %s123_s9, [#allocation6]  }
  0xfb   :  { %s7171_s17 = scalar_lea.hbm %s7531_s14, 16 }
  0xfc   :  { %p7172_p4 = scmp.ne.s32.totalorder %s7531_s14, %s7171_s17  ;;  %p7175_p5 = scmp.lt.u32.totalorder %s7171_s17, %s7531_s14 }
  0xfe   :  { %p7177_p6 = pnand %p7175_p5, %p7172_p4 }
 0x100   :  { %7180 = shalt.err (!%p7177_p6)
}
 0x101   :  { %s7181_s27 = scalar_lea.vmem %s143_s22, 16  ;;  %s7185_s26 = scalar_lea.vmem %s143_s22, 32 }
 0x102   :  { %p7182_p7 = scmp.ne.s32.totalorder %s143_s22, %s7181_s27  ;;  %p7186_p8 = scmp.lt.s32.totalorder %s143_s22, %s143_s22 }
 0x103   :  { %p7187_p9 = scmp.lt.s32.totalorder %s7185_s26, %s7181_s27 }
 0x105   :  { %p7188_p10 = por %p7187_p9, %p7186_p8 }
 0x107   :  { %p7189_p11 = pnand %p7188_p10, %p7182_p7 }
 0x109   :  { %7192 = shalt.err (!%p7189_p11)
}
 0x10a   :  { %145 = dma.hbm_to_vmem [thread:$0]  %s7531_s14, 16, %s143_s22, [#allocation9]  }
 0x10b   :  { %s7466_s21 = smov [#allocation13]   ;;  %s7467_s1 = smov [#allocation16]  }
 0x10c   :  { %s164_s3 = sshll.u32 %s7466_s21, 4  ;;  %s186_s30 = sshll.u32 %s7467_s1, 4  ;;  %s165_s3 = int_to_ptr.vmem [resolvable:$true] %s164_s3  ;;  %s187_s30 = int_to_ptr.vmem [resolvable:$true] %s186_s30 }
 0x10d   :  { %s7193_s2 = scalar_lea.hbm %s7541_s24, 64 }
 0x10e   :  { %p7194_p12 = scmp.ne.s32.totalorder %s7541_s24, %s7193_s2  ;;  %p7197_p13 = scmp.lt.u32.totalorder %s7193_s2, %s7541_s24 }
 0x110   :  { %p7199_p0 = pnand %p7197_p13, %p7194_p12 }
 0x112   :  { %7202 = shalt.err (!%p7199_p0)
}
 0x113   :  { %s7203_s29 = scalar_lea.vmem %s165_s3, 64  ;;  %p7208_p2 = scmp.lt.s32.totalorder %s165_s3, %s165_s3 }
 0x114   :  { %p7204_p1 = scmp.ne.s32.totalorder %s165_s3, %s7203_s29  ;;  %p7209_p3 = scmp.lt.s32.totalorder %s7203_s29, %s7203_s29 }
 0x116   :  { %p7210_p4 = por %p7209_p3, %p7208_p2 }
 0x118   :  { %p7211_p5 = pnand %p7210_p4, %p7204_p1 }
 0x11a   :  { %7214 = shalt.err (!%p7211_p5)
}
 0x11b   :  { %167 = dma.hbm_to_vmem [thread:$0]  %s7541_s24, 64, %s165_s3, [#allocation12]  }
 0x11c   :  { %s7215_s14 = scalar_lea.hbm %s7551_s6, 16 }
 0x11d   :  { %p7216_p6 = scmp.ne.s32.totalorder %s7551_s6, %s7215_s14  ;;  %p7219_p7 = scmp.lt.u32.totalorder %s7215_s14, %s7551_s6 }
 0x11f   :  { %p7221_p8 = pnand %p7219_p7, %p7216_p6 }
 0x121   :  { %7224 = shalt.err (!%p7221_p8)
}
 0x122   :  { %s7225_s7 = scalar_lea.vmem %s187_s30, 16  ;;  %s7229_s13 = scalar_lea.vmem %s187_s30, 32 }
 0x123   :  { %p7226_p9 = scmp.ne.s32.totalorder %s187_s30, %s7225_s7  ;;  %p7230_p10 = scmp.lt.s32.totalorder %s187_s30, %s187_s30 }
 0x124   :  { %p7231_p11 = scmp.lt.s32.totalorder %s7229_s13, %s7225_s7 }
 0x126   :  { %p7232_p12 = por %p7231_p11, %p7230_p10 }
 0x128   :  { %p7233_p13 = pnand %p7232_p12, %p7226_p9 }
 0x12a   :  { %7236 = shalt.err (!%p7233_p13)
}
 0x12b   :  { %s8611_s8 = sld [smem:[#allocation52_spill]]  ;;  %s7468_s12 = smov [#allocation19]  }
 0x12c   :  { %189 = dma.hbm_to_vmem [thread:$0]  %s7551_s6, 16, %s187_s30, [#allocation15]  }
 0x12d   :  { %s206_s24 = sshll.u32 %s7468_s12, 4  ;;  %s7469_s11 = smov [#allocation22]   ;;  %s207_s24 = int_to_ptr.vmem [resolvable:$true] %s206_s24 }
 0x12e   :  { %s229_s9 = sshll.u32 %s7469_s11, 4  ;;  %s7734_s9 = int_to_ptr.vmem [resolvable:$true] %s229_s9 }
 0x131   :  { %s7237_s18 = scalar_lea.hbm %s8611_s8, 16 }
 0x132   :  { %p7238_p0 = scmp.ne.s32.totalorder %s8611_s8, %s7237_s18  ;;  %p7241_p1 = scmp.lt.u32.totalorder %s7237_s18, %s8611_s8 }
 0x134   :  { %p7243_p2 = pnand %p7241_p1, %p7238_p0 }
 0x136   :  { %7246 = shalt.err (!%p7243_p2)
}
 0x137   :  { %s7247_s22 = scalar_lea.vmem %s207_s24, 16  ;;  %s7251_s23 = scalar_lea.vmem %s207_s24, 32 }
 0x138   :  { %p7248_p3 = scmp.ne.s32.totalorder %s207_s24, %s7247_s22  ;;  %p7252_p4 = scmp.lt.s32.totalorder %s207_s24, %s207_s24 }
 0x139   :  { %p7253_p5 = scmp.lt.s32.totalorder %s7251_s23, %s7247_s22 }
 0x13b   :  { %p7254_p6 = por %p7253_p5, %p7252_p4 }
 0x13d   :  { %p7255_p7 = pnand %p7254_p6, %p7248_p3 }
 0x13f   :  { %7258 = shalt.err (!%p7255_p7)
}
 0x140   :  { %s8612_s6 = sld [smem:[#allocation54_spill]] }
 0x141   :  { %209 = dma.hbm_to_vmem [thread:$0]  %s8611_s8, 16, %s207_s24, [#allocation18]  }
 0x146   :  { %s7259_s28 = scalar_lea.hbm %s8612_s6, 2048 }
 0x147   :  { %p7260_p8 = scmp.ne.s32.totalorder %s8612_s6, %s7259_s28  ;;  %p7263_p9 = scmp.lt.u32.totalorder %s7259_s28, %s8612_s6 }
 0x149   :  { %p7265_p10 = pnand %p7263_p9, %p7260_p8 }
 0x14b   :  { %7268 = shalt.err (!%p7265_p10)
}
 0x14c   :  { %s7269_s19 = scalar_lea.vmem %s7734_s9, 2048  ;;  %p7274_p12 = scmp.lt.s32.totalorder %s7734_s9, %s7734_s9 }
 0x14d   :  { %p7270_p11 = scmp.ne.s32.totalorder %s7734_s9, %s7269_s19  ;;  %p7275_p13 = scmp.lt.s32.totalorder %s7269_s19, %s7269_s19 }
 0x14f   :  { %p7276_p0 = por %p7275_p13, %p7274_p12 }
 0x151   :  { %p7277_p1 = pnand %p7276_p0, %p7270_p11 }
 0x153   :  { %7280 = shalt.err (!%p7277_p1)
}
 0x154   :  { %s8613_s17 = sld [smem:[#allocation58_spill]]  ;;  %s7470_s27 = smov [#allocation25]  }
 0x155   :  { %235 = dma.hbm_to_vmem [thread:$0]  %s8612_s6, 2048, %s7734_s9, [#allocation21], %s7449_s15, %s7449_s15, %s7450_s16  }
 0x156   :  { %s260_s26 = sshll.u32 %s7470_s27, 4  ;;  %s7471_s21 = smov [#allocation28]   ;;  %s261_s26 = int_to_ptr.vmem [resolvable:$true] %s260_s26 }
 0x157   :  { %s282_s3 = sshll.u32 %s7471_s21, 4  ;;  %s283_s3 = int_to_ptr.vmem [resolvable:$true] %s282_s3 }
 0x15a   :  { %s7281_s1 = scalar_lea.hbm %s8613_s17, 64 }
 0x15b   :  { %p7282_p2 = scmp.ne.s32.totalorder %s8613_s17, %s7281_s1  ;;  %p7285_p3 = scmp.lt.u32.totalorder %s7281_s1, %s8613_s17 }
 0x15d   :  { %p7287_p4 = pnand %p7285_p3, %p7282_p2 }
 0x15f   :  { %7290 = shalt.err (!%p7287_p4)
}
 0x160   :  { %s7291_s30 = scalar_lea.vmem %s261_s26, 64  ;;  %p7296_p6 = scmp.lt.s32.totalorder %s261_s26, %s261_s26 }
 0x161   :  { %p7292_p5 = scmp.ne.s32.totalorder %s261_s26, %s7291_s30  ;;  %p7297_p7 = scmp.lt.s32.totalorder %s7291_s30, %s7291_s30 }
 0x163   :  { %p7298_p8 = por %p7297_p7, %p7296_p6 }
 0x165   :  { %p7299_p9 = pnand %p7298_p8, %p7292_p5 }
 0x167   :  { %7302 = shalt.err (!%p7299_p9)
}
 0x168   :  { %s8614_s15 = sld [smem:[#allocation59_spill]] }
 0x169   :  { %263 = dma.hbm_to_vmem [thread:$0]  %s8613_s17, 64, %s261_s26, [#allocation24]  }
 0x16e   :  { %s7303_s16 = scalar_lea.hbm %s8614_s15, 16 }
 0x16f   :  { %p7304_p10 = scmp.ne.s32.totalorder %s8614_s15, %s7303_s16  ;;  %p7307_p11 = scmp.lt.u32.totalorder %s7303_s16, %s8614_s15 }
 0x171   :  { %p7309_p12 = pnand %p7307_p11, %p7304_p10 }
 0x173   :  { %7312 = shalt.err (!%p7309_p12)
}
 0x174   :  { %s7313_s2 = scalar_lea.vmem %s283_s3, 16  ;;  %s7317_s29 = scalar_lea.vmem %s283_s3, 32 }
 0x175   :  { %p7314_p13 = scmp.ne.s32.totalorder %s283_s3, %s7313_s2  ;;  %p7318_p0 = scmp.lt.s32.totalorder %s283_s3, %s283_s3 }
 0x176   :  { %p7319_p1 = scmp.lt.s32.totalorder %s7317_s29, %s7313_s2 }
 0x178   :  { %p7320_p2 = por %p7319_p1, %p7318_p0 }
 0x17a   :  { %p7321_p3 = pnand %p7320_p2, %p7314_p13 }
 0x17c   :  { %7324 = shalt.err (!%p7321_p3)
}
 0x17d   :  { %s8615_s14 = sld [smem:[#allocation62_spill]]  ;;  %s7472_s7 = smov [#allocation31]  }
 0x17e   :  { %285 = dma.hbm_to_vmem [thread:$0]  %s8614_s15, 16, %s283_s3, [#allocation27]  }
 0x17f   :  { %s307_s13 = sshll.u32 %s7472_s7, 4  ;;  %s7473_s8 = smov [#allocation32]   ;;  %s308_s13 = int_to_ptr.vmem [resolvable:$true] %s307_s13 }
 0x180   :  { %s324_s12 = sshll.u32 %s7473_s8, 4  ;;  %s325_s12 = int_to_ptr.vmem [resolvable:$true] %s324_s12 }
 0x183   :  { %s7325_s24 = scalar_lea.hbm %s8615_s14, 4096 }
 0x184   :  { %p7326_p4 = scmp.ne.s32.totalorder %s8615_s14, %s7325_s24  ;;  %p7329_p5 = scmp.lt.u32.totalorder %s7325_s24, %s8615_s14 }
 0x186   :  { %p7331_p6 = pnand %p7329_p5, %p7326_p4 }
 0x188   :  { %7334 = shalt.err (!%p7331_p6)
}
 0x189   :  { %s7335_s11 = scalar_lea.vmem %s308_s13, 4096  ;;  %p7340_p8 = scmp.lt.s32.totalorder %s308_s13, %s308_s13 }
 0x18a   :  { %p7336_p7 = scmp.ne.s32.totalorder %s308_s13, %s7335_s11  ;;  %p7341_p9 = scmp.lt.s32.totalorder %s7335_s11, %s7335_s11 }
 0x18c   :  { %p7342_p10 = por %p7341_p9, %p7340_p8 }
 0x18e   :  { %p7343_p11 = pnand %p7342_p10, %p7336_p7 }
 0x190   :  { %7346 = shalt.err (!%p7343_p11)
}
 0x191   :  { %313 = dma.hbm_to_vmem [thread:$0]  %s8615_s14, 4096, %s308_s13, [#allocation30], %s7453_s10, %s7453_s10, %s7454_s0  }
 0x192   :  { %s7347_s9 = scalar_lea.hbm %s7646_s20, 16 }
 0x193   :  { %p7348_p12 = scmp.ne.s32.totalorder %s7646_s20, %s7347_s9  ;;  %p7351_p13 = scmp.lt.u32.totalorder %s7347_s9, %s7646_s20 }
 0x195   :  { %p7353_p0 = pnand %p7351_p13, %p7348_p12 }
 0x197   :  { %7356 = shalt.err (!%p7353_p0)
}
 0x198   :  { %s7357_s18 = scalar_lea.vmem %s325_s12, 16  ;;  %s7361_s22 = scalar_lea.vmem %s325_s12, 32 }
 0x199   :  { %p7358_p1 = scmp.ne.s32.totalorder %s325_s12, %s7357_s18  ;;  %p7362_p2 = scmp.lt.s32.totalorder %s325_s12, %s325_s12 }
 0x19a   :  { %p7363_p3 = scmp.lt.s32.totalorder %s7361_s22, %s7357_s18 }
 0x19c   :  { %p7364_p4 = por %p7363_p3, %p7362_p2 }
 0x19e   :  { %p7365_p5 = pnand %p7364_p4, %p7358_p1 }
 0x1a0   :  { %7368 = shalt.err (!%p7365_p5)
}
 0x1a1   :  { %327 = dma.hbm_to_vmem [thread:$0]  %s7646_s20, 16, %s325_s12, [#allocation33]  }
 0x1a2   :  { %7391 = dma.done.wait [#allocation3], 16  }
 0x1a3   :  { %7392 = vsyncadd [#allocation3], 4294967280 }
 0x1a4   :  { %7393 = dma.done.wait [#allocation6], 2064  }
 0x1a5   :  { %7394 = vsyncadd [#allocation6], 4294965232 }
 0x1a6   :  { %7395 = dma.done.wait [#allocation9], 32  }
 0x1a7   :  { %7396 = vsyncadd [#allocation9], 4294967264 }
 0x1a8   :  { %7397 = dma.done.wait [#allocation12], 4160  }
 0x1a9   :  { %7398 = vsyncadd [#allocation12], 4294963136 }
 0x1aa   :  { %7399 = dma.done.wait [#allocation15], 4112  }
 0x1ab   :  { %7400 = vsyncadd [#allocation15], 4294963184 }
 0x1ac   :  { %7401 = dma.done.wait [#allocation18], 32  }
 0x1ad   :  { %7402 = vsyncadd [#allocation18], 4294967264 }
 0x1ae   :  { %7403 = dma.done.wait [#allocation21], 8192  }
 0x1af   :  { %7404 = vsyncadd [#allocation21], 4294959104 }
 0x1b0   :  { %7405 = dma.done.wait [#allocation24], 4160  }
 0x1b1   :  { %7406 = vsyncadd [#allocation24], 4294963136 }
 0x1b2   :  { %7407 = dma.done.wait [#allocation27], 4112  }
 0x1b3   :  { %7408 = vsyncadd [#allocation27], 4294963184 }
 0x1b4   :  { %7409 = dma.done.wait [#allocation30], 8192  }
 0x1b5   :  { %7410 = vsyncadd [#allocation30], 4294959104 }
 0x1b6   :  { %7411 = dma.done.wait [#allocation33], 16  }
 0x1b7   :  { %7412 = vsyncadd [#allocation33], 4294967280  ;;  %s8616_s20 = sld [smem:[#allocation47_spill]]  ;;  %s8617_s10 = sld [smem:[#allocation50_spill]]  ;;  %v7474_v36 = vmov 0   ;;  %vm7476_vm0 = vmmov 0  }
 0x1b8   :  { %787 = vmatprep.mubr.bf16.mxu0 %v7474_v36  ;;  %830 = vmatprep.mubr.bf16.mxu1 %v7474_v36  ;;  %s8618_s0 = sld [smem:[#allocation49_spill]]  ;;  %v5513_v56 = vld [vmem:[#allocation2] ss:$0 sm:$0xff]  ;;  %s8619_s23 = sld [smem:[#allocation51_spill]]  ;;  %vm963_vm1 = vcmask 130048   ;;  %vm5452_vm2 = vcmask 25600  }
 0x1b9   :  { %s8620_s6 = sld [smem:[#allocation48_spill]]  ;;  %s8621_s28 = sld [smem:[#allocation53_spill]] }
 0x1ba   :  { %s8622_s19 = sld [smem:[#allocation55_spill]]  ;;  %s8623_s17 = sld [smem:[#allocation56_spill]] }
 0x1bb   :  { %s8624_s27 = sld [smem:[#allocation57_spill]]  ;;  %s8625_s26 = sld [smem:[#allocation60_spill]] }
 0x1bc   :  { %s8626_s21 = sld [smem:[#allocation61_spill]] }
 0x1bd   :  { %v391_v0 = vld [vmem:[%s8616_s20] sm:$0xff]  ;;  %v392_v1 = vld [vmem:[%s8616_s20 + $0x8] sm:$0xff]  ;;  %v6252_v8 = vld [vmem:[%s8617_s10 + $0x3c] ss:$24 sps:$4 sm:$0xff]  }
 0x1be   :  { %395 = vadd.xlane.f32.xlu0 %v391_v0  ;;  %v6243_v2 = vld [vmem:[%s8617_s10 + $0x4] ss:$24 sps:$4 sm:$0xff]   ;;  %v6245_v3 = vld [vmem:[%s8617_s10] ss:$24 sps:$4 sm:$0xff]   ;;  %v6249_v6 = vld [vmem:[%s8617_s10 + $0x34] ss:$24 sps:$4 sm:$0xff]  }
 0x1bf   :  { %v6246_v4 = vld [vmem:[%s8617_s10 + $0xc] ss:$24 sps:$4 sm:$0xff]   ;;  %v6248_v5 = vld [vmem:[%s8617_s10 + $0x8] ss:$24 sps:$4 sm:$0xff]   ;;  %755 = vmatprep.subr.bf16.mxu0 %v6243_v2  ;;  %v6254_v17 = vld [vmem:[%s8617_s10 + $0x38] ss:$24 sps:$4 sm:$0xff]  }
 0x1c0   :  { %v6251_v7 = vld [vmem:[%s8617_s10 + $0x30] ss:$24 sps:$4 sm:$0xff]   ;;  %798 = vmatprep.subr.bf16.mxu1 %v6246_v4  ;;  %756 = vmatpush1.bf16.msra.mxu0 %v6245_v3  ;;  %v6255_v18 = vld [vmem:[%s8617_s10 + $0x64] ss:$24 sps:$4 sm:$0xff]   ;;  %v6257_v19 = vld [vmem:[%s8617_s10 + $0x60] ss:$24 sps:$4 sm:$0xff]  }
 0x1c1   :  { %799 = vmatpush1.bf16.msra.mxu1 %v6248_v5  ;;  %757 = vmatprep.subr.bf16.mxu0 %v6249_v6  ;;  %v6258_v20 = vld [vmem:[%s8617_s10 + $0x6c] ss:$24 sps:$4 sm:$0xff]   ;;  %v6260_v21 = vld [vmem:[%s8617_s10 + $0x68] ss:$24 sps:$4 sm:$0xff]   ;;  %v6264_v24 = vld [vmem:[%s8617_s10 + $0x9c] ss:$24 sps:$4 sm:$0xff]  }
 0x1c2   :  { %397 = vadd.xlane.f32.xlu0 %v392_v1  ;;  %800 = vmatprep.subr.bf16.mxu1 %v6252_v8  ;;  %v6261_v22 = vld [vmem:[%s8617_s10 + $0x94] ss:$24 sps:$4 sm:$0xff]   ;;  %v6263_v23 = vld [vmem:[%s8617_s10 + $0x90] ss:$24 sps:$4 sm:$0xff]   ;;  %v6267_v26 = vld [vmem:[%s8617_s10 + $0xc4] ss:$24 sps:$4 sm:$0xff]  }
 0x1c3   :  { %v6266_v25 = vld [vmem:[%s8617_s10 + $0x98] ss:$24 sps:$4 sm:$0xff]   ;;  %v6270_v28 = vld [vmem:[%s8617_s10 + $0xcc] ss:$24 sps:$4 sm:$0xff]   ;;  %v6272_v29 = vld [vmem:[%s8617_s10 + $0xc8] ss:$24 sps:$4 sm:$0xff]  }
 0x1c4   :  { %758 = vmatpush1.bf16.msra.mxu0 %v6251_v7  ;;  %v6269_v27 = vld [vmem:[%s8617_s10 + $0xc0] ss:$24 sps:$4 sm:$0xff]   ;;  %v6273_v30 = vld [vmem:[%s8617_s10 + $0xf4] ss:$24 sps:$4 sm:$0xff]   ;;  %v6275_v32 = vld [vmem:[%s8617_s10 + $0xf0] ss:$24 sps:$4 sm:$0xff]  }
 0x1c5   :  { %801 = vmatpush1.bf16.msra.mxu1 %v6254_v17  ;;  %759 = vmatprep.subr.bf16.mxu0 %v6255_v18  ;;  %v6276_v31 = vld [vmem:[%s8617_s10 + $0xfc] ss:$24 sps:$4 sm:$0xff]   ;;  %v6278_v33 = vld [vmem:[%s8617_s10 + $0xf8] ss:$24 sps:$4 sm:$0xff]   ;;  %v6282_v35 = vld [vmem:[%s8617_s10 + $0x12c] ss:$24 sps:$4 sm:$0xff]  }
 0x1c6   :  { %802 = vmatprep.subr.bf16.mxu1 %v6258_v20  ;;  %v6279_v34 = vld [vmem:[%s8617_s10 + $0x124] ss:$24 sps:$4 sm:$0xff]   ;;  %v6281_v37 = vld [vmem:[%s8617_s10 + $0x120] ss:$24 sps:$4 sm:$0xff]   ;;  %v6285_v39 = vld [vmem:[%s8617_s10 + $0x154] ss:$24 sps:$4 sm:$0xff]  }
 0x1c7   :  { %v6284_v38 = vld [vmem:[%s8617_s10 + $0x128] ss:$24 sps:$4 sm:$0xff]   ;;  %v6288_v40 = vld [vmem:[%s8617_s10 + $0x15c] ss:$24 sps:$4 sm:$0xff]   ;;  %v6290_v42 = vld [vmem:[%s8617_s10 + $0x158] ss:$24 sps:$4 sm:$0xff]  }
 0x1c8   :  { %760 = vmatpush1.bf16.msra.mxu0 %v6257_v19  ;;  %v6287_v41 = vld [vmem:[%s8617_s10 + $0x150] ss:$24 sps:$4 sm:$0xff]   ;;  %v6293_v43 = vld [vmem:[%s8617_s10 + $0x14] ss:$24 sps:$4 sm:$0xff]   ;;  %v5512_v52 = vld [vmem:[%s8618_s0] ss:$0 sm:$0xff] }
 0x1c9   :  { %803 = vmatpush1.bf16.msra.mxu1 %v6260_v21  ;;  %761 = vmatprep.subr.bf16.mxu0 %v6261_v22  ;;  %v6291_v60 = vld [vmem:[%s8617_s10 + $0x10] ss:$24 sps:$4 sm:$0xff]   ;;  %v6296_v62 = vld [vmem:[%s8617_s10 + $0x44] ss:$24 sps:$4 sm:$0xff]   ;;  %v6294_v63 = vld [vmem:[%s8617_s10 + $0x40] ss:$24 sps:$4 sm:$0xff]  }
 0x1ca   :  { %804 = vmatprep.subr.bf16.mxu1 %v6264_v24  ;;  %v6302_v2 = vld [vmem:[%s8617_s10 + $0xa4] ss:$24 sps:$4 sm:$0xff]   ;;  %v6300_v3 = vld [vmem:[%s8617_s10 + $0xa0] ss:$24 sps:$4 sm:$0xff]   ;;  %v6305_v4 = vld [vmem:[%s8617_s10 + $0xd4] ss:$24 sps:$4 sm:$0xff]  }
 0x1cb   :  { %v6303_v5 = vld [vmem:[%s8617_s10 + $0xd0] ss:$24 sps:$4 sm:$0xff]   ;;  %v6308_v6 = vld [vmem:[%s8617_s10 + $0x104] ss:$24 sps:$4 sm:$0xff]   ;;  %v6306_v7 = vld [vmem:[%s8617_s10 + $0x100] ss:$24 sps:$4 sm:$0xff]  }
 0x1cc   :  { %762 = vmatpush1.bf16.msra.mxu0 %v6263_v23  ;;  %v6311_v8 = vld [vmem:[%s8617_s10 + $0x134] ss:$24 sps:$4 sm:$0xff]   ;;  %v483_v17 = vld [vmem:[%s8619_s23] sm:$0x3f] }
 0x1cd   :  { %805 = vmatpush1.bf16.msra.mxu1 %v6266_v25  ;;  %763 = vmatprep.subr.bf16.mxu0 %v6267_v26 }
 0x1ce   :  { %806 = vmatprep.subr.bf16.mxu1 %v6270_v28 }
 0x1d0   :  { %764 = vmatpush1.bf16.msra.mxu0 %v6269_v27 }
 0x1d1   :  { %807 = vmatpush1.bf16.msra.mxu1 %v6272_v29  ;;  %765 = vmatprep.subr.bf16.mxu0 %v6273_v30 }
 0x1d2   :  { %808 = vmatprep.subr.bf16.mxu1 %v6276_v31 }
 0x1d4   :  { %766 = vmatpush1.bf16.msra.mxu0 %v6275_v32 }
 0x1d5   :  { %809 = vmatpush1.bf16.msra.mxu1 %v6278_v33  ;;  %767 = vmatprep.subr.bf16.mxu0 %v6279_v34 }
 0x1d6   :  { %810 = vmatprep.subr.bf16.mxu1 %v6282_v35 }
 0x1d8   :  { %768 = vmatpush1.bf16.msra.mxu0 %v6281_v37 }
 0x1d9   :  { %811 = vmatpush1.bf16.msra.mxu1 %v6284_v38  ;;  %769 = vmatprep.subr.bf16.mxu0 %v6285_v39 }
 0x1da   :  { %812 = vmatprep.subr.bf16.mxu1 %v6288_v40 }
 0x1dc   :  { %770 = vmatpush1.bf16.msra.mxu0 %v6287_v41 }
 0x1dd   :  { %813 = vmatpush1.bf16.msra.mxu1 %v6290_v42  ;;  %841 = vmatprep.subr.bf16.mxu0 %v6293_v43 }
 0x24b   :  { %v396_v9 = vpop.xlane.xlu0 %395 }
 0x24c   :  { %v400_v10 = vmul.f32 0.0078125, %v396_v9  ;;  %v6309_v9 = vld [vmem:[%s8617_s10 + $0x130] ss:$24 sps:$4 sm:$0xff]  }
 0x24e   :  { %v7780_v11 = vsub.f32 %v391_v0, %v400_v10  ;;  %v6299_v0 = vld [vmem:[%s8617_s10 + $0x74] ss:$24 sps:$4 sm:$0xff]   ;;  %v6314_v10 = vld [vmem:[%s8617_s10 + $0x164] ss:$24 sps:$4 sm:$0xff]  }
 0x24f   :  { %v398_v12 = vpop.xlane.xlu0 %397 }
 0x250   :  { %v401_v13 = vmul.f32 0.0078125, %v398_v12  ;;  %v404_v14 = vmul.f32 %v7780_v11, %v7780_v11  ;;  %v7475_v12 = vmov 0.0  }
 0x251   :  { %6032 = vmatprep.subr.bf16.mxu1 %v7475_v12 }
 0x252   :  { %v7784_v15 = vsub.f32 %v392_v1, %v401_v13  ;;  %406 = vadd.xlane.f32.xlu1 %v404_v14  ;;  %v6297_v1 = vld [vmem:[%s8617_s10 + $0x70] ss:$24 sps:$4 sm:$0xff]   ;;  %v485_v13 = vlaneseq }
 0x254   :  { %v405_v16 = vmul.f32 %v7784_v15, %v7784_v15  ;;  %v7847_v14 = vshrl.u32 %v485_v13, 7 }
 0x256   :  { %408 = vadd.xlane.f32.xlu1 %v405_v16  ;;  %v7853_v16 = vsub.s32 2, %v7847_v14  ;;  %v7857_v18 = vsub.s32 1, %v7847_v14  ;;  %v7860_v19 = vsub.s32 3, %v7847_v14 }
 0x258   :  { %v496_v21 = vrot.slane %v483_v17, %v7853_v16  ;;  %v492_v24 = vrot.slane %v483_v17, %v7857_v18  ;;  %v500_v25 = vrot.slane %v483_v17, %v7860_v19 }
 0x2df   :  { %v407_v44 = vpop.xlane.xlu1 %406 }
 0x2e0   :  { %v410_v45 = vmul.f32 0.0078125, %v407_v44 }
 0x2e2   :  { %v412_v46 = vadd.f32 1e-12, %v410_v45  ;;  %v503_v45 = vsub.s32 4, %v7847_v14 }
 0x2e3   :  { %v409_v47 = vpop.xlane.xlu1 %408 }
 0x2e4   :  { %6683 = vrsqrt.f32 %v412_v46  ;;  %v411_v48 = vmul.f32 0.0078125, %v409_v47  ;;  %v507_v46 = vsub.s32 5, %v7847_v14  ;;  %v504_v47 = vrot.slane %v483_v17, %v503_v45 }
 0x2e6   :  { %v413_v49 = vadd.f32 1e-12, %v411_v48 }
 0x2e8   :  { %6685 = vrsqrt.f32 %v413_v49  ;;  %v508_v49 = vrot.slane %v483_v17, %v507_v46 }
 0x2ee   :  { %v6684_v50 = vpop.eup %6683 }
 0x2ef   :  { %v416_v51 = vmul.f32 %v6684_v50, %v7780_v11  ;;  %v6312_v11 = vld [vmem:[%s8617_s10 + $0x160] ss:$24 sps:$4 sm:$0xff]  }
 0x2f1   :  { %v424_v55 = vmul.f32 %v5512_v52, %v416_v51 }
 0x2f2   :  { %v6686_v53 = vpop.eup %6685 }
 0x2f3   :  { %v417_v54 = vmul.f32 %v6686_v53, %v7784_v15  ;;  %v7819_v58 = vadd.f32 %v5513_v56, %v424_v55  ;;  %v7850_v15 = vsub.s32 0, %v7847_v14 }
 0x2f5   :  { %v425_v57 = vmul.f32 %v5512_v52, %v417_v54  ;;  %v488_v20 = vrot.slane %v483_v17, %v7850_v15 }
 0x2f7   :  { %v7821_v59 = vadd.f32 %v5513_v56, %v425_v57 }
 0x2f9   :  { %v482_v61 = vpack.c.bf16 %v7821_v59, %v7819_v58 }
 0x2fb   :  { %788 = vmatmul.mubr.bf16.vlgmr.msra.gmra.mrb[0].mxu0 %v482_v61  ;;  %831 = vmatmul.mubr.bf16.vlgmr.msra.gmra.mrb[0].mxu1 %v482_v61 }
 0x2fc   :  { %842 = vmatpush1.bf16.msra.mxu0 %v6291_v60  ;;  %873 = vmatprep.mubr.bf16.mxu0 %v7474_v36 }
 0x2fd   :  { %843 = vmatprep.subr.bf16.mxu0 %v6296_v62  ;;  %6034 = vmatprep.mubr.msk.bf16.mxu1 %vm7476_vm0, %v7475_v12  ;;  %v389_v62 = vld [vmem:[%s8620_s6] sm:$0xff] }
 0x300   :  { %844 = vmatpush1.bf16.msra.mxu0 %v6294_v63 }
 0x301   :  { %845 = vmatprep.subr.bf16.mxu0 %v6299_v0 }
 0x304   :  { %846 = vmatpush1.bf16.msra.mxu0 %v6297_v1 }
 0x305   :  { %847 = vmatprep.subr.bf16.mxu0 %v6302_v2  ;;  %v390_v2 = vld [vmem:[%s8620_s6 + $0x8] sm:$0xff] }
 0x308   :  { %848 = vmatpush1.bf16.msra.mxu0 %v6300_v3 }
 0x309   :  { %849 = vmatprep.subr.bf16.mxu0 %v6305_v4 }
 0x30c   :  { %850 = vmatpush1.bf16.msra.mxu0 %v6303_v5 }
 0x30d   :  { %851 = vmatprep.subr.bf16.mxu0 %v6308_v6 }
 0x310   :  { %852 = vmatpush1.bf16.msra.mxu0 %v6306_v7 }
 0x311   :  { %853 = vmatprep.subr.bf16.mxu0 %v6311_v8 }
 0x314   :  { %854 = vmatpush1.bf16.msra.mxu0 %v6309_v9 }
 0x315   :  { %855 = vmatprep.subr.bf16.mxu0 %v6314_v10 }
 0x318   :  { %856 = vmatpush1.bf16.msra.mxu0 %v6312_v11 }
 0x319   :  { %6056 = vmatprep.subr.bf16.mxu0 %v7475_v12 }
 0x31b   :  { %874 = vmatmul.mubr.bf16.vlgmr.msra.gmra.mrb[4].mxu0 %v482_v61 }
 0x31c   :  { %6072 = vmatprep.mubr.msk.bf16.mxu0 %vm7476_vm0, %v7475_v12 }
 0x3ce   :  { %v789_v22 = vpop.f32.mrb[0].mxu0  ;;  %v832_v23 = vpop.f32.mrb[0].mxu1 }
 0x3cf   :  { %v791_v26 = vpop.f32.mrb[1].mxu0  ;;  %v834_v27 = vpop.f32.mrb[1].mxu1  ;;  %v790_v30 = vadd.f32 %v789_v22, %v488_v20  ;;  %v833_v31 = vadd.f32 %v832_v23, %v496_v21 }
 0x3d0   :  { %v793_v28 = vpop.f32.mrb[2].mxu0  ;;  %v836_v29 = vpop.f32.mrb[2].mxu1  ;;  %v7866_v37 = vadd.f32 %v791_v26, %v492_v24  ;;  %v7868_v38 = vadd.f32 %v834_v27, %v500_v25 }
 0x3d1   :  { %v794_v32 = vadd.f32 %v793_v28, %v488_v20  ;;  %v837_v33 = vadd.f32 %v836_v29, %v496_v21  ;;  %v795_v34 = vpop.f32.mrb[3].mxu0  ;;  %v838_v35 = vpop.f32.mrb[3].mxu1 }
 0x3d2   :  { %v7870_v39 = vadd.f32 %v795_v34, %v492_v24  ;;  %v7872_v40 = vadd.f32 %v838_v35, %v500_v25 }
 0x3d3   :  { %v916_v41 = vpack.c.bf16 %v794_v32, %v790_v30  ;;  %v917_v42 = vpack.c.bf16 %v837_v33, %v833_v31 }
 0x3d4   :  { %v1033_v43 = vpack.c.bf16 %v7870_v39, %v7866_v37  ;;  %v1034_v44 = vpack.c.bf16 %v7872_v40, %v7868_v38 }
 0x3d5   :  { %6033 = vmatpush3.bf16.xpose.msra.mxu1 %v917_v42 }
 0x3d6   :  { %6038 = vmatprep.subr.bf16.mxu1 %v7475_v12 }
 0x3dc   :  { %6035 = vmatmul.mubr.bf16.vlgmr.msra.gmra.mrb[4].mxu1 %v916_v41 }
 0x3dd   :  { %6040 = vmatprep.mubr.msk.bf16.mxu1 %vm7476_vm0, %v7475_v12 }
 0x3ee   :  { %v875_v48 = vpop.f32.mrb[4].mxu0 }
 0x3ef   :  { %v877_v50 = vpop.f32.mrb[5].mxu0  ;;  %v876_v52 = vadd.f32 %v875_v48, %v504_v47 }
 0x3f0   :  { %v879_v51 = vpop.f32.mrb[6].mxu0  ;;  %v878_v55 = vadd.f32 %v877_v50, %v508_v49 }
 0x3f1   :  { %v880_v53 = vadd.f32 %v879_v51, %v504_v47  ;;  %v881_v54 = vpop.f32.mrb[7].mxu0 }
 0x3f2   :  { %v882_v56 = vadd.f32 %v881_v54, %v508_v49 }
 0x3f3   :  { %v986_v57 = vpack.c.bf16 %v880_v53, %v876_v52 }
 0x3f4   :  { %v1102_v60 = vpack.c.bf16 %v882_v56, %v878_v55 }
 0x3f5   :  { %6039 = vmatpush3.bf16.msra.mxu1 %v986_v57 }
 0x3f6   :  { %6044 = vmatprep.subr.bf16.mxu1 %v7475_v12 }
 0x4af   :  { %v952_v61 = vpop.f32.mrb[4].mxu1 }
 0x4b0   :  { %v959_v63 = vmul.f32 0.125, %v952_v61  ;;  %v6036_v0 = vpop.f32.mrb[5].mxu1 }
 0x4b1   :  { %v955_v1 = vpop.f32.mrb[6].mxu1  ;;  %v6325_v0 = vld [vmem:[#allocation5 + $0x50] sm:$0xff]  }
 0x4b2   :  { %v960_v3 = vmul.f32 0.125, %v955_v1  ;;  %v6037_v4 = vpop.f32.mrb[7].mxu1  ;;  %v961_v5 = vadd.f32 %v959_v63, %v389_v62  ;;  %v6324_v63 = vld [vmem:[#allocation5 + $0x48] sm:$0xff]   ;;  %v6326_v1 = vld [vmem:[#allocation5 + $0x58] sm:$0xff]  }
 0x4b3   :  { %v6329_v4 = vld [vmem:[#allocation5 + $0x70] sm:$0xff]  }
 0x4b4   :  { %v964_v6 = vsel %vm963_vm1, %v961_v5, -inf  ;;  %v962_v7 = vadd.f32 %v960_v3, %v390_v2  ;;  %v6328_v3 = vld [vmem:[#allocation5 + $0x68] sm:$0xff]  }
 0x4b5   :  { %965 = vmax.xlane.f32.xlu0 %v964_v6 }
 0x4b6   :  { %v967_v8 = vsel %vm963_vm1, %v962_v7, -inf }
 0x4b7   :  { %968 = vmax.xlane.f32.xlu1 %v967_v8 }
 0x542   :  { %v966_v9 = vpop.xlane.xlu0 %965 }
 0x543   :  { %v970_v10 = vsub.f32 %v961_v5, %v966_v9 }
 0x544   :  { %v969_v11 = vpop.xlane.xlu1 %968 }
 0x545   :  { %v972_v13 = vmul.f32 1.442695, %v970_v10  ;;  %v971_v17 = vsub.f32 %v962_v7, %v969_v11  ;;  %v6315_v11 = vld [vmem:[#allocation5] sm:$0xff]  }
 0x547   :  { %6687 = vpow2.f32 %v972_v13  ;;  %v974_v20 = vmul.f32 1.442695, %v971_v17  ;;  %v6316_v17 = vld [vmem:[#allocation5 + $0x8] sm:$0xff]  }
 0x549   :  { %6689 = vpow2.f32 %v974_v20  ;;  %v6317_v20 = vld [vmem:[#allocation5 + $0x10] sm:$0xff]  }
 0x551   :  { %v6688_v21 = vpop.eup %6687 }
 0x552   :  { %v976_v22 = vsel %vm963_vm1, %v6688_v21, 0.0 }
 0x553   :  { %v6690_v23 = vpop.eup %6689  ;;  %977 = vadd.xlane.f32.xlu0 %v976_v22  ;;  %v6319_v22 = vld [vmem:[#allocation5 + $0x20] sm:$0xff]  }
 0x554   :  { %v979_v24 = vsel %vm963_vm1, %v6690_v23, 0.0 }
 0x555   :  { %980 = vadd.xlane.f32.xlu1 %v979_v24  ;;  %v6321_v24 = vld [vmem:[#allocation5 + $0x30] sm:$0xff]  }
 0x5e0   :  { %v978_v25 = vpop.xlane.xlu0 %977 }
 0x5e1   :  { %6691 = vrcp.f32 %v978_v25  ;;  %v6322_v25 = vld [vmem:[#allocation5 + $0x38] sm:$0xff]  }
 0x5e2   :  { %v981_v26 = vpop.xlane.xlu1 %980 }
 0x5e3   :  { %6693 = vrcp.f32 %v981_v26  ;;  %v6330_v26 = vld [vmem:[#allocation5 + $0x78] sm:$0xff]  }
 0x5eb   :  { %v6692_v27 = vpop.eup %6691 }
 0x5ec   :  { %v984_v29 = vmul.f32 %v6692_v27, %v6688_v21  ;;  %v6318_v21 = vld [vmem:[#allocation5 + $0x18] sm:$0xff]  }
 0x5ed   :  { %v6694_v28 = vpop.eup %6693 }
 0x5ee   :  { %v985_v30 = vmul.f32 %v6694_v28, %v6690_v23  ;;  %v6320_v23 = vld [vmem:[#allocation5 + $0x28] sm:$0xff]  }
 0x5f0   :  { %v987_v31 = vpack.c.bf16 %v985_v30, %v984_v29 }
 0x5f2   :  { %6041 = vmatmul.mubr.msk.bf16.vlgmr.msra.gmra.mrb[8].mxu1 %vm963_vm1, %v987_v31 }
 0x5f3   :  { %6045 = vmatpush3.bf16.xpose.msra.mxu1 %v1034_v44  ;;  %6046 = vmatprep.mubr.msk.bf16.mxu1 %vm7476_vm0, %v7475_v12 }
 0x5f4   :  { %6050 = vmatprep.subr.bf16.mxu1 %v7475_v12 }
 0x5fa   :  { %6047 = vmatmul.mubr.bf16.vlgmr.msra.gmra.mrb[12].mxu1 %v1033_v43 }
 0x5fb   :  { %6051 = vmatpush3.bf16.msra.mxu1 %v1102_v60  ;;  %6052 = vmatprep.mubr.msk.bf16.mxu1 %vm7476_vm0, %v7475_v12 }
 0x5fc   :  { %6076 = vmatprep.subr.bf16.mxu1 %v7475_v12 }
 0x6c5   :  { %v7904_v32 = vpop.f32.mrb[8].mxu1 }
 0x6c6   :  { %v6042_v33 = vpop.f32.mrb[9].mxu1 }
 0x6c7   :  { %v7906_v34 = vpop.f32.mrb[10].mxu1 }
 0x6c8   :  { %v1032_v35 = vpack.c.bf16 %v7906_v34, %v7904_v32  ;;  %v6043_v38 = vpop.f32.mrb[11].mxu1 }
 0x6cd   :  { %v1069_v40 = vpop.f32.mrb[12].mxu1 }
 0x6ce   :  { %v1076_v41 = vmul.f32 0.125, %v1069_v40  ;;  %v6048_v42 = vpop.f32.mrb[13].mxu1 }
 0x6cf   :  { %v1072_v37 = vpop.f32.mrb[14].mxu1 }
 0x6d0   :  { %v1077_v39 = vmul.f32 0.125, %v1072_v37  ;;  %v6049_v43 = vpop.f32.mrb[15].mxu1  ;;  %v1078_v44 = vadd.f32 %v1076_v41, %v389_v62  ;;  %v6323_v62 = vld [vmem:[#allocation5 + $0x40] sm:$0xff]  }
 0x6d1   :  { %6057 = vmatpush3.bf16.msra.mxu0 %v6323_v62  ;;  %v5580_v37 = vld [vmem:[#allocation7] ss:$0 sm:$0xff] }
 0x6d2   :  { %v1080_v47 = vsel %vm963_vm1, %v1078_v44, -inf  ;;  %v1079_v48 = vadd.f32 %v1077_v39, %v390_v2  ;;  %6058 = vmatprep.subr.bf16.mxu0 %v7475_v12  ;;  %v6327_v2 = vld [vmem:[#allocation5 + $0x60] sm:$0xff]  }
 0x6d3   :  { %1081 = vmax.xlane.f32.xlu0 %v1080_v47 }
 0x6d4   :  { %v1083_v49 = vsel %vm963_vm1, %v1079_v48, -inf }
 0x6d5   :  { %1084 = vmax.xlane.f32.xlu1 %v1083_v49  ;;  %6059 = vmatpush3.bf16.msra.mxu0 %v6324_v63 }
 0x6d6   :  { %6060 = vmatprep.subr.bf16.mxu0 %v7475_v12 }
 0x6d9   :  { %6061 = vmatpush3.bf16.msra.mxu0 %v6325_v0 }
 0x6da   :  { %6062 = vmatprep.subr.bf16.mxu0 %v7475_v12 }
 0x6dd   :  { %6063 = vmatpush3.bf16.msra.mxu0 %v6326_v1 }
 0x6de   :  { %6064 = vmatprep.subr.bf16.mxu0 %v7475_v12 }
 0x6e1   :  { %6065 = vmatpush3.bf16.msra.mxu0 %v6327_v2  ;;  %v6345_v2 = vld [vmem:[#allocation11 + $0x44] ss:$16 sps:$4 sm:$0xff]  }
 0x6e2   :  { %6066 = vmatprep.subr.bf16.mxu0 %v7475_v12 }
 0x6e5   :  { %6067 = vmatpush3.bf16.msra.mxu0 %v6328_v3  ;;  %v6348_v3 = vld [vmem:[#allocation11 + $0x4c] ss:$16 sps:$4 sm:$0xff]  }
 0x6e6   :  { %6068 = vmatprep.subr.bf16.mxu0 %v7475_v12 }
 0x6e9   :  { %6069 = vmatpush3.bf16.msra.mxu0 %v6329_v4  ;;  %v6343_v4 = vld [vmem:[#allocation11 + $0x40] ss:$16 sps:$4 sm:$0xff]  }
 0x6ea   :  { %6070 = vmatprep.subr.bf16.mxu0 %v7475_v12 }
 0x6ed   :  { %6071 = vmatpush3.bf16.msra.mxu0 %v6330_v26  ;;  %v6367_v26 = vld [vmem:[#allocation11 + $0xc0] ss:$16 sps:$4 sm:$0xff]  }
 0x760   :  { %v1082_v50 = vpop.xlane.xlu0 %1081 }
 0x761   :  { %v1086_v51 = vsub.f32 %v1078_v44, %v1082_v50  ;;  %v6331_v50 = vld [vmem:[#allocation11] ss:$16 sps:$4 sm:$0xff]  }
 0x762   :  { %v1085_v52 = vpop.xlane.xlu1 %1084 }
 0x763   :  { %v1088_v53 = vmul.f32 1.442695, %v1086_v51  ;;  %v1087_v54 = vsub.f32 %v1079_v48, %v1085_v52  ;;  %v6333_v51 = vld [vmem:[#allocation11 + $0x4] ss:$16 sps:$4 sm:$0xff]   ;;  %v6334_v52 = vld [vmem:[#allocation11 + $0x8] ss:$16 sps:$4 sm:$0xff]  }
 0x764   :  { %1593 = vmatprep.subr.bf16.mxu0 %v6333_v51 }
 0x765   :  { %6695 = vpow2.f32 %v1088_v53  ;;  %v1090_v55 = vmul.f32 1.442695, %v1087_v54  ;;  %v6336_v53 = vld [vmem:[#allocation11 + $0xc] ss:$16 sps:$4 sm:$0xff]   ;;  %v6339_v54 = vld [vmem:[#allocation11 + $0x24] ss:$16 sps:$4 sm:$0xff]  }
 0x767   :  { %6697 = vpow2.f32 %v1090_v55  ;;  %v6342_v55 = vld [vmem:[#allocation11 + $0x2c] ss:$16 sps:$4 sm:$0xff]  }
 0x76f   :  { %v6696_v56 = vpop.eup %6695 }
 0x770   :  { %v1092_v57 = vsel %vm963_vm1, %v6696_v56, 0.0 }
 0x771   :  { %v6698_v60 = vpop.eup %6697  ;;  %1093 = vadd.xlane.f32.xlu0 %v1092_v57  ;;  %v6340_v57 = vld [vmem:[#allocation11 + $0x28] ss:$16 sps:$4 sm:$0xff]  }
 0x772   :  { %v1095_v61 = vsel %vm963_vm1, %v6698_v60, 0.0 }
 0x773   :  { %1096 = vadd.xlane.f32.xlu1 %v1095_v61 }
 0x7fe   :  { %v1094_v5 = vpop.xlane.xlu0 %1093 }
 0x7ff   :  { %6699 = vrcp.f32 %v1094_v5  ;;  %v6346_v5 = vld [vmem:[#allocation11 + $0x48] ss:$16 sps:$4 sm:$0xff]  }
 0x800   :  { %v1097_v6 = vpop.xlane.xlu1 %1096 }
 0x801   :  { %6701 = vrcp.f32 %v1097_v6  ;;  %v6351_v6 = vld [vmem:[#allocation11 + $0x64] ss:$16 sps:$4 sm:$0xff]  }
 0x809   :  { %v6700_v7 = vpop.eup %6699 }
 0x80a   :  { %v1100_v9 = vmul.f32 %v6700_v7, %v6696_v56  ;;  %v6337_v56 = vld [vmem:[#allocation11 + $0x20] ss:$16 sps:$4 sm:$0xff]   ;;  %v6354_v7 = vld [vmem:[#allocation11 + $0x6c] ss:$16 sps:$4 sm:$0xff]  }
 0x80b   :  { %v6702_v8 = vpop.eup %6701 }
 0x80c   :  { %v1101_v10 = vmul.f32 %v6702_v8, %v6698_v60  ;;  %v6349_v8 = vld [vmem:[#allocation11 + $0x60] ss:$16 sps:$4 sm:$0xff]  }
 0x80e   :  { %v1103_v13 = vpack.c.bf16 %v1101_v10, %v1100_v9  ;;  %v6352_v9 = vld [vmem:[#allocation11 + $0x68] ss:$16 sps:$4 sm:$0xff]   ;;  %v6357_v10 = vld [vmem:[#allocation11 + $0x84] ss:$16 sps:$4 sm:$0xff]  }
 0x810   :  { %6053 = vmatmul.mubr.msk.bf16.vlgmr.msra.gmra.mrb[16].mxu1 %vm963_vm1, %v1103_v13  ;;  %v6355_v13 = vld [vmem:[#allocation11 + $0x80] ss:$16 sps:$4 sm:$0xff]  }
 0x811   :  { %6077 = vmatpush3.bf16.msra.mxu1 %v6315_v11  ;;  %6092 = vmatprep.mubr.msk.bf16.mxu1 %vm7476_vm0, %v7475_v12  ;;  %v6360_v11 = vld [vmem:[#allocation11 + $0x8c] ss:$16 sps:$4 sm:$0xff]  }
 0x812   :  { %6078 = vmatprep.subr.bf16.mxu1 %v7475_v12 }
 0x815   :  { %6079 = vmatpush3.bf16.msra.mxu1 %v6316_v17  ;;  %v6358_v17 = vld [vmem:[#allocation11 + $0x88] ss:$16 sps:$4 sm:$0xff]  }
 0x816   :  { %6080 = vmatprep.subr.bf16.mxu1 %v7475_v12 }
 0x819   :  { %6081 = vmatpush3.bf16.msra.mxu1 %v6317_v20  ;;  %v6363_v20 = vld [vmem:[#allocation11 + $0xa4] ss:$16 sps:$4 sm:$0xff]  }
 0x81a   :  { %6082 = vmatprep.subr.bf16.mxu1 %v7475_v12 }
 0x81d   :  { %6083 = vmatpush3.bf16.msra.mxu1 %v6318_v21  ;;  %v6366_v21 = vld [vmem:[#allocation11 + $0xac] ss:$16 sps:$4 sm:$0xff]  }
 0x81e   :  { %6084 = vmatprep.subr.bf16.mxu1 %v7475_v12 }
 0x821   :  { %6085 = vmatpush3.bf16.msra.mxu1 %v6319_v22  ;;  %v6361_v22 = vld [vmem:[#allocation11 + $0xa0] ss:$16 sps:$4 sm:$0xff]  }
 0x822   :  { %6086 = vmatprep.subr.bf16.mxu1 %v7475_v12 }
 0x825   :  { %6087 = vmatpush3.bf16.msra.mxu1 %v6320_v23  ;;  %v6364_v23 = vld [vmem:[#allocation11 + $0xa8] ss:$16 sps:$4 sm:$0xff]  }
 0x826   :  { %6088 = vmatprep.subr.bf16.mxu1 %v7475_v12 }
 0x829   :  { %6089 = vmatpush3.bf16.msra.mxu1 %v6321_v24  ;;  %v6369_v24 = vld [vmem:[#allocation11 + $0xc4] ss:$16 sps:$4 sm:$0xff]  }
 0x82a   :  { %6090 = vmatprep.subr.bf16.mxu1 %v7475_v12 }
 0x82d   :  { %6091 = vmatpush3.bf16.msra.mxu1 %v6322_v25  ;;  %v6372_v25 = vld [vmem:[#allocation11 + $0xcc] ss:$16 sps:$4 sm:$0xff]  }
 0x82e   :  { %1636 = vmatprep.subr.bf16.mxu1 %v6336_v53  ;;  %v6380_v53 = vld [vmem:[#allocation14 + $0xc0] sm:$0xff]  }
 0x830   :  { %6093 = vmatmul.mubr.bf16.vlgmr.msra.gmra.mrb[20].mxu1 %v1032_v35 }
 0x831   :  { %1668 = vmatprep.mubr.bf16.mxu1 %v7474_v36  ;;  %1637 = vmatpush1.bf16.msra.mxu1 %v6334_v52  ;;  %v6379_v52 = vld [vmem:[#allocation14 + $0x40] sm:$0xff]  }
 0x832   :  { %1638 = vmatprep.subr.bf16.mxu1 %v6342_v55  ;;  %v6382_v55 = vld [vmem:[#allocation14 + $0x80] sm:$0xff]  }
 0x835   :  { %1639 = vmatpush1.bf16.msra.mxu1 %v6340_v57  ;;  %v6384_v57 = vld [vmem:[#allocation14 + $0xc8] sm:$0xff]  }
 0x836   :  { %1640 = vmatprep.subr.bf16.mxu1 %v6348_v3  ;;  %v6394_v3 = vld [vmem:[#allocation14 + $0x98] sm:$0xff]  }
 0x839   :  { %1641 = vmatpush1.bf16.msra.mxu1 %v6346_v5  ;;  %v6396_v5 = vld [vmem:[#allocation14 + $0xe0] sm:$0xff]  }
 0x83a   :  { %1642 = vmatprep.subr.bf16.mxu1 %v6354_v7  ;;  %v6398_v7 = vld [vmem:[#allocation14 + $0xa0] sm:$0xff]  }
 0x83d   :  { %1643 = vmatpush1.bf16.msra.mxu1 %v6352_v9  ;;  %v6400_v9 = vld [vmem:[#allocation14 + $0xe8] sm:$0xff]  }
 0x83e   :  { %1644 = vmatprep.subr.bf16.mxu1 %v6360_v11  ;;  %v6402_v11 = vld [vmem:[#allocation14 + $0xa8] sm:$0xff]  }
 0x841   :  { %1645 = vmatpush1.bf16.msra.mxu1 %v6358_v17  ;;  %v6404_v17 = vld [vmem:[#allocation14 + $0xf0] sm:$0xff]  }
 0x842   :  { %1646 = vmatprep.subr.bf16.mxu1 %v6366_v21  ;;  %v6406_v21 = vld [vmem:[#allocation14 + $0xb0] sm:$0xff]  }
 0x845   :  { %1647 = vmatpush1.bf16.msra.mxu1 %v6364_v23  ;;  %v6408_v23 = vld [vmem:[#allocation14 + $0xf8] sm:$0xff]  }
 0x846   :  { %1648 = vmatprep.subr.bf16.mxu1 %v6372_v25  ;;  %v6410_v25 = vld [vmem:[#allocation14 + $0xb8] sm:$0xff]  }
 0x8e3   :  { %v1141_v27 = vpop.f32.mrb[16].mxu1 }
 0x8e4   :  { %v6054_v28 = vpop.f32.mrb[17].mxu1 }
 0x8e5   :  { %v1144_v29 = vpop.f32.mrb[18].mxu1  ;;  %v6375_v28 = vld [vmem:[#allocation11 + $0xe4] ss:$16 sps:$4 sm:$0xff]  }
 0x8e6   :  { %v1148_v30 = vpack.c.bf16 %v1144_v29, %v1141_v27  ;;  %v6055_v31 = vpop.f32.mrb[19].mxu1  ;;  %v6370_v27 = vld [vmem:[#allocation11 + $0xc8] ss:$16 sps:$4 sm:$0xff]   ;;  %v6378_v29 = vld [vmem:[#allocation11 + $0xec] ss:$16 sps:$4 sm:$0xff]  }
 0x8e7   :  { %1649 = vmatpush1.bf16.msra.mxu1 %v6370_v27  ;;  %v6376_v31 = vld [vmem:[#allocation11 + $0xe8] ss:$16 sps:$4 sm:$0xff]  }
 0x8e8   :  { %6073 = vmatmul.mubr.bf16.vlgmr.msra.gmra.mrb[8].mxu0 %v1148_v30  ;;  %v6373_v30 = vld [vmem:[#allocation11 + $0xe0] ss:$16 sps:$4 sm:$0xff]   ;;  %1650 = vmatprep.subr.bf16.mxu1 %v6378_v29 }
 0x8e9   :  { %1625 = vmatprep.mubr.bf16.mxu0 %v7474_v36  ;;  %1594 = vmatpush1.bf16.msra.mxu0 %v6331_v50 }
 0x8ea   :  { %1595 = vmatprep.subr.bf16.mxu0 %v6339_v54  ;;  %v6381_v54 = vld [vmem:[#allocation14] sm:$0xff]  }
 0x8eb   :  { %1651 = vmatpush1.bf16.msra.mxu1 %v6376_v31 }
 0x8ec   :  { %5931 = vmatprep.subr.bf16.mxu1 %v6380_v53 }
 0x8ed   :  { %1596 = vmatpush1.bf16.msra.mxu0 %v6337_v56  ;;  %v6383_v56 = vld [vmem:[#allocation14 + $0x48] sm:$0xff]  }
 0x8ee   :  { %1597 = vmatprep.subr.bf16.mxu0 %v6345_v2  ;;  %v6393_v2 = vld [vmem:[#allocation14 + $0x18] sm:$0xff]  }
 0x8f1   :  { %1598 = vmatpush1.bf16.msra.mxu0 %v6343_v4  ;;  %v6395_v4 = vld [vmem:[#allocation14 + $0x60] sm:$0xff]  }
 0x8f2   :  { %1599 = vmatprep.subr.bf16.mxu0 %v6351_v6  ;;  %v6397_v6 = vld [vmem:[#allocation14 + $0x20] sm:$0xff]  }
 0x8f5   :  { %1600 = vmatpush1.bf16.msra.mxu0 %v6349_v8  ;;  %v6399_v8 = vld [vmem:[#allocation14 + $0x68] sm:$0xff]  }
 0x8f6   :  { %1601 = vmatprep.subr.bf16.mxu0 %v6357_v10  ;;  %v6401_v10 = vld [vmem:[#allocation14 + $0x28] sm:$0xff]  }
 0x8f9   :  { %1602 = vmatpush1.bf16.msra.mxu0 %v6355_v13  ;;  %v6403_v13 = vld [vmem:[#allocation14 + $0x70] sm:$0xff]  }
 0x8fa   :  { %1603 = vmatprep.subr.bf16.mxu0 %v6363_v20  ;;  %v6405_v20 = vld [vmem:[#allocation14 + $0x30] sm:$0xff]  }
 0x8fd   :  { %1604 = vmatpush1.bf16.msra.mxu0 %v6361_v22  ;;  %v6407_v22 = vld [vmem:[#allocation14 + $0x78] sm:$0xff]  }
 0x8fe   :  { %1605 = vmatprep.subr.bf16.mxu0 %v6369_v24  ;;  %v6409_v24 = vld [vmem:[#allocation14 + $0x38] sm:$0xff]  }
 0x901   :  { %1606 = vmatpush1.bf16.msra.mxu0 %v6367_v26  ;;  %v1411_v26 = vld [vmem:[#allocation13] sm:$0xf] }
 0x902   :  { %1607 = vmatprep.subr.bf16.mxu0 %v6375_v28  ;;  %v1416_v27 = vrot.slane %v1411_v26, %v7850_v15  ;;  %v1424_v28 = vrot.slane %v1411_v26, %v7853_v16  ;;  %v1420_v29 = vrot.slane %v1411_v26, %v7857_v18 }
 0x903   :  { %v1320_v33 = vpop.f32.mrb[20].mxu1 }
 0x904   :  { %v6094_v38 = vpop.f32.mrb[21].mxu1 }
 0x905   :  { %v1323_v40 = vpop.f32.mrb[22].mxu1  ;;  %1608 = vmatpush1.bf16.msra.mxu0 %v6373_v30  ;;  %v1428_v30 = vrot.slane %v1411_v26, %v7860_v19 }
 0x906   :  { %v6095_v41 = vpop.f32.mrb[23].mxu1  ;;  %5909 = vmatprep.subr.bf16.mxu0 %v6379_v52 }
 0x9bb   :  { %v1231_v42 = vpop.f32.mrb[8].mxu0 }
 0x9bc   :  { %v1321_v32 = vadd.f32 %v1320_v33, %v1231_v42  ;;  %v6074_v34 = vpop.f32.mrb[9].mxu0 }
 0x9bd   :  { %v1234_v35 = vpop.f32.mrb[10].mxu0  ;;  %v5581_v34 = vld [vmem:[#allocation8] ss:$0 sm:$0xff] }
 0x9be   :  { %v1334_v39 = vadd.f32 %v5580_v37, %v1321_v32  ;;  %v1324_v43 = vadd.f32 %v1323_v40, %v1234_v35  ;;  %v6075_v44 = vpop.f32.mrb[11].mxu0 }
 0x9c0   :  { %v1335_v47 = vadd.f32 %v5580_v37, %v1324_v43  ;;  %v1336_v48 = vadd.f32 %v1334_v39, %v7819_v58 }
 0x9c2   :  { %1340 = vadd.xlane.f32.xlu0 %v1336_v48  ;;  %v1337_v49 = vadd.f32 %v1335_v47, %v7821_v59  ;;  %v5582_v47 = vld [vmem:[#allocation10] ss:$0 sm:$0xff] }
 0x9c4   :  { %1342 = vadd.xlane.f32.xlu1 %v1337_v49 }
 0xa4f   :  { %v1341_v58 = vpop.xlane.xlu0 %1340 }
 0xa50   :  { %v1344_v60 = vmul.f32 0.0078125, %v1341_v58  ;;  %v6385_v58 = vld [vmem:[#allocation14 + $0x8] sm:$0xff]  }
 0xa51   :  { %v1343_v59 = vpop.xlane.xlu1 %1342 }
 0xa52   :  { %v7938_v61 = vsub.f32 %v1336_v48, %v1344_v60  ;;  %v1345_v62 = vmul.f32 0.0078125, %v1343_v59  ;;  %v6386_v60 = vld [vmem:[#allocation14 + $0x88] sm:$0xff]   ;;  %v6387_v59 = vld [vmem:[#allocation14 + $0x50] sm:$0xff]  }
 0xa54   :  { %v7940_v63 = vsub.f32 %v1337_v49, %v1345_v62  ;;  %v1348_v0 = vmul.f32 %v7938_v61, %v7938_v61  ;;  %v6389_v62 = vld [vmem:[#allocation14 + $0x10] sm:$0xff]  }
 0xa56   :  { %1350 = vadd.xlane.f32.xlu0 %v1348_v0  ;;  %v1349_v1 = vmul.f32 %v7940_v63, %v7940_v63  ;;  %v6391_v0 = vld [vmem:[#allocation14 + $0x58] sm:$0xff]  }
 0xa58   :  { %1352 = vadd.xlane.f32.xlu1 %v1349_v1  ;;  %v6392_v1 = vld [vmem:[#allocation14 + $0xd8] sm:$0xff]  }
 0xae3   :  { %v1351_v33 = vpop.xlane.xlu0 %1350 }
 0xae4   :  { %v1354_v38 = vmul.f32 0.0078125, %v1351_v33 }
 0xae5   :  { %v1353_v40 = vpop.xlane.xlu1 %1352 }
 0xae6   :  { %v1356_v41 = vadd.f32 1e-12, %v1354_v38  ;;  %v1355_v42 = vmul.f32 0.0078125, %v1353_v40 }
 0xae8   :  { %6703 = vrsqrt.f32 %v1356_v41  ;;  %v1357_v37 = vadd.f32 1e-12, %v1355_v42 }
 0xaea   :  { %6705 = vrsqrt.f32 %v1357_v37 }
 0xaf2   :  { %v6704_v32 = vpop.eup %6703 }
 0xaf3   :  { %v1360_v35 = vmul.f32 %v6704_v32, %v7938_v61  ;;  %v6388_v61 = vld [vmem:[#allocation14 + $0xd0] sm:$0xff]  }
 0xaf4   :  { %v6706_v39 = vpop.eup %6705 }
 0xaf5   :  { %v1361_v43 = vmul.f32 %v6706_v39, %v7940_v63  ;;  %v1368_v44 = vmul.f32 %v5581_v34, %v1360_v35  ;;  %v6390_v63 = vld [vmem:[#allocation14 + $0x90] sm:$0xff]  }
 0xaf7   :  { %v1369_v48 = vmul.f32 %v5581_v34, %v1361_v43  ;;  %v7948_v49 = vadd.f32 %v5582_v47, %v1368_v44 }
 0xaf9   :  { %v7950_v50 = vadd.f32 %v5582_v47, %v1369_v48 }
 0xafb   :  { %v1410_v51 = vpack.c.bf16 %v7950_v50, %v7948_v49 }
 0xafd   :  { %1626 = vmatmul.mubr.bf16.vlgmr.msra.gmra.mrb[12].mxu0 %v1410_v51  ;;  %1669 = vmatmul.mubr.bf16.vlgmr.msra.gmra.mrb[24].mxu1 %v1410_v51 }
 0xafe   :  { %5910 = vmatpush3.bf16.msra.mxu0 %v6381_v54  ;;  %5932 = vmatpush3.bf16.msra.mxu1 %v6382_v55 }
 0xaff   :  { %5911 = vmatprep.subr.bf16.mxu0 %v6383_v56  ;;  %5933 = vmatprep.subr.bf16.mxu1 %v6384_v57 }
 0xb02   :  { %5912 = vmatpush3.bf16.msra.mxu0 %v6385_v58  ;;  %5934 = vmatpush3.bf16.msra.mxu1 %v6386_v60 }
 0xb03   :  { %5913 = vmatprep.subr.bf16.mxu0 %v6387_v59  ;;  %5935 = vmatprep.subr.bf16.mxu1 %v6388_v61 }
 0xb06   :  { %5914 = vmatpush3.bf16.msra.mxu0 %v6389_v62  ;;  %5936 = vmatpush3.bf16.msra.mxu1 %v6390_v63 }
 0xb07   :  { %5915 = vmatprep.subr.bf16.mxu0 %v6391_v0  ;;  %5937 = vmatprep.subr.bf16.mxu1 %v6392_v1 }
 0xb0a   :  { %5916 = vmatpush3.bf16.msra.mxu0 %v6393_v2  ;;  %5938 = vmatpush3.bf16.msra.mxu1 %v6394_v3 }
 0xb0b   :  { %5917 = vmatprep.subr.bf16.mxu0 %v6395_v4  ;;  %5939 = vmatprep.subr.bf16.mxu1 %v6396_v5 }
 0xb0e   :  { %5918 = vmatpush3.bf16.msra.mxu0 %v6397_v6  ;;  %5940 = vmatpush3.bf16.msra.mxu1 %v6398_v7 }
 0xb0f   :  { %5919 = vmatprep.subr.bf16.mxu0 %v6399_v8  ;;  %5941 = vmatprep.subr.bf16.mxu1 %v6400_v9 }
 0xb12   :  { %5920 = vmatpush3.bf16.msra.mxu0 %v6401_v10  ;;  %5942 = vmatpush3.bf16.msra.mxu1 %v6402_v11 }
 0xb13   :  { %5921 = vmatprep.subr.bf16.mxu0 %v6403_v13  ;;  %5943 = vmatprep.subr.bf16.mxu1 %v6404_v17 }
 0xb16   :  { %5922 = vmatpush3.bf16.msra.mxu0 %v6405_v20  ;;  %5944 = vmatpush3.bf16.msra.mxu1 %v6406_v21 }
 0xb17   :  { %5923 = vmatprep.subr.bf16.mxu0 %v6407_v22  ;;  %5945 = vmatprep.subr.bf16.mxu1 %v6408_v23 }
 0xb1a   :  { %5924 = vmatpush3.bf16.msra.mxu0 %v6409_v24  ;;  %5946 = vmatpush3.bf16.msra.mxu1 %v6410_v25 }
 0xbd0   :  { %v1627_v31 = vpop.f32.mrb[12].mxu0  ;;  %v1670_v33 = vpop.f32.mrb[24].mxu1 }
 0xbd1   :  { %v7958_v38 = vadd.f32 %v1627_v31, %v1416_v27  ;;  %v7960_v40 = vadd.f32 %v1670_v33, %v1424_v28  ;;  %v1629_v41 = vpop.f32.mrb[13].mxu0  ;;  %v1672_v42 = vpop.f32.mrb[25].mxu1 }
 0xbd2   :  { %v7962_v37 = vadd.f32 %v1629_v41, %v1420_v29  ;;  %v7964_v32 = vadd.f32 %v1672_v42, %v1428_v30  ;;  %v1631_v34 = vpop.f32.mrb[14].mxu0  ;;  %v1674_v35 = vpop.f32.mrb[26].mxu1 }
 0xbd3   :  { %v1687_v39 = vmul.f32 0.044715, %v7958_v38  ;;  %v1689_v43 = vmul.f32 0.044715, %v7960_v40  ;;  %v1632_v44 = vadd.f32 %v1631_v34, %v1416_v27  ;;  %v1675_v47 = vadd.f32 %v1674_v35, %v1424_v28  ;;  %v1633_v48 = vpop.f32.mrb[15].mxu0  ;;  %v1676_v51 = vpop.f32.mrb[27].mxu1 }
 0xbd4   :  { %v1688_v52 = vmul.f32 0.044715, %v7962_v37  ;;  %v1690_v53 = vmul.f32 0.044715, %v7964_v32  ;;  %v7970_v54 = vadd.f32 %v1633_v48, %v1420_v29  ;;  %v7972_v55 = vadd.f32 %v1676_v51, %v1428_v30 }
 0xbd5   :  { %v1695_v56 = vmul.f32 %v1687_v39, %v7958_v38  ;;  %v1697_v57 = vmul.f32 %v1689_v43, %v7960_v40  ;;  %v1691_v58 = vmul.f32 0.044715, %v1632_v44  ;;  %v1693_v60 = vmul.f32 0.044715, %v1675_v47 }
 0xbd6   :  { %v1696_v59 = vmul.f32 %v1688_v52, %v7962_v37  ;;  %v1698_v61 = vmul.f32 %v1690_v53, %v7964_v32  ;;  %v1692_v62 = vmul.f32 0.044715, %v7970_v54  ;;  %v1694_v63 = vmul.f32 0.044715, %v7972_v55 }
 0xbd7   :  { %v1703_v0 = vmul.f32 %v1695_v56, %v7958_v38  ;;  %v1705_v1 = vmul.f32 %v1697_v57, %v7960_v40  ;;  %v1699_v2 = vmul.f32 %v1691_v58, %v1632_v44  ;;  %v1701_v3 = vmul.f32 %v1693_v60, %v1675_v47 }
 0xbd8   :  { %v1704_v4 = vmul.f32 %v1696_v59, %v7962_v37  ;;  %v1706_v5 = vmul.f32 %v1698_v61, %v7964_v32  ;;  %v1700_v6 = vmul.f32 %v1692_v62, %v7970_v54  ;;  %v1702_v7 = vmul.f32 %v1694_v63, %v7972_v55 }
 0xbd9   :  { %v1711_v8 = vadd.f32 %v1703_v0, %v7958_v38  ;;  %v1713_v9 = vadd.f32 %v1705_v1, %v7960_v40  ;;  %v1707_v10 = vmul.f32 %v1699_v2, %v1632_v44  ;;  %v1709_v11 = vmul.f32 %v1701_v3, %v1675_v47 }
 0xbda   :  { %v1708_v13 = vmul.f32 %v1700_v6, %v7970_v54  ;;  %v1710_v17 = vmul.f32 %v1702_v7, %v7972_v55  ;;  %v1712_v24 = vadd.f32 %v1704_v4, %v7962_v37  ;;  %v1714_v28 = vadd.f32 %v1706_v5, %v7964_v32 }
 0xbdb   :  { %v1719_v20 = vmul.f32 0.7978846, %v1711_v8  ;;  %v1721_v21 = vmul.f32 0.7978846, %v1713_v9  ;;  %v1715_v22 = vadd.f32 %v1707_v10, %v1632_v44  ;;  %v1717_v23 = vadd.f32 %v1709_v11, %v1675_v47 }
 0xbdc   :  { %v1716_v25 = vadd.f32 %v1708_v13, %v7970_v54  ;;  %v1720_v29 = vmul.f32 0.7978846, %v1712_v24  ;;  %v1718_v31 = vadd.f32 %v1710_v17, %v7972_v55  ;;  %v1722_v33 = vmul.f32 0.7978846, %v1714_v28 }
 0xbdd   :  { %6707 = vtanh.f32 %v1719_v20  ;;  %v1723_v26 = vmul.f32 0.7978846, %v1715_v22  ;;  %v1725_v27 = vmul.f32 0.7978846, %v1717_v23  ;;  %v1679_v51 = vmul.f32 0.5, %v7958_v38 }
 0xbde   :  { %6709 = vtanh.f32 %v1721_v21  ;;  %v1724_v30 = vmul.f32 0.7978846, %v1716_v25  ;;  %v1726_v41 = vmul.f32 0.7978846, %v1718_v31  ;;  %v1683_v52 = vmul.f32 0.5, %v1632_v44 }
 0xbdf   :  { %6711 = vtanh.f32 %v1723_v26  ;;  %v1681_v57 = vmul.f32 0.5, %v7960_v40  ;;  %v1685_v58 = vmul.f32 0.5, %v1675_v47  ;;  %v1680_v61 = vmul.f32 0.5, %v7962_v37 }
 0xbe0   :  { %6713 = vtanh.f32 %v1725_v27  ;;  %v1684_v2 = vmul.f32 0.5, %v7970_v54  ;;  %v1682_v44 = vmul.f32 0.5, %v7964_v32  ;;  %v1686_v6 = vmul.f32 0.5, %v7972_v55  ;;  %v5615_v54 = vld [vmem:[#allocation16] ss:$0 sm:$0xff] }
 0xbe1   :  { %6715 = vtanh.f32 %v1720_v29 }
 0xbe2   :  { %6717 = vtanh.f32 %v1724_v30 }
 0xbe3   :  { %6719 = vtanh.f32 %v1722_v33 }
 0xbe4   :  { %6721 = vtanh.f32 %v1726_v41 }
 0xbe7   :  { %v6708_v42 = vpop.eup %6707 }
 0xbe8   :  { %v6710_v34 = vpop.eup %6709  ;;  %v1735_v35 = vadd.f32 1.0, %v6708_v42 }
 0xbe9   :  { %v6712_v39 = vpop.eup %6711  ;;  %v1737_v43 = vadd.f32 1.0, %v6710_v34 }
 0xbea   :  { %v6714_v48 = vpop.eup %6713  ;;  %v1739_v53 = vadd.f32 1.0, %v6712_v39  ;;  %v1743_v63 = vmul.f32 %v1735_v35, %v1679_v51  ;;  %v6411_v35 = vld [vmem:[#allocation20] ss:$24 sps:$4 sm:$0xff]   ;;  %v6413_v39 = vld [vmem:[#allocation20 + $0x4] ss:$24 sps:$4 sm:$0xff]  }
 0xbeb   :  { %v6716_v56 = vpop.eup %6715  ;;  %v1741_v60 = vadd.f32 1.0, %v6714_v48  ;;  %v1745_v4 = vmul.f32 %v1737_v43, %v1681_v57  ;;  %v6414_v43 = vld [vmem:[#allocation20 + $0x8] ss:$24 sps:$4 sm:$0xff]   ;;  %v6416_v48 = vld [vmem:[#allocation20 + $0xc] ss:$24 sps:$4 sm:$0xff]   ;;  %2463 = vmatprep.subr.bf16.mxu0 %v6413_v39 }
 0xbec   :  { %v6718_v59 = vpop.eup %6717  ;;  %v1736_v62 = vadd.f32 1.0, %v6716_v56  ;;  %v1747_v0 = vmul.f32 %v1739_v53, %v1683_v52  ;;  %v6419_v51 = vld [vmem:[#allocation20 + $0x34] ss:$24 sps:$4 sm:$0xff]   ;;  %2506 = vmatprep.subr.bf16.mxu1 %v6416_v48  ;;  %v6417_v53 = vld [vmem:[#allocation20 + $0x30] ss:$24 sps:$4 sm:$0xff]  }
 0xbed   :  { %v6720_v1 = vpop.eup %6719  ;;  %v1740_v3 = vadd.f32 1.0, %v6718_v59  ;;  %v1749_v5 = vmul.f32 %v1741_v60, %v1685_v58  ;;  %v6422_v52 = vld [vmem:[#allocation20 + $0x3c] ss:$24 sps:$4 sm:$0xff]   ;;  %v6420_v56 = vld [vmem:[#allocation20 + $0x38] ss:$24 sps:$4 sm:$0xff]  }
 0xbee   :  { %v6722_v38 = vpop.eup %6721  ;;  %v1738_v40 = vadd.f32 1.0, %v6720_v1  ;;  %v1815_v47 = vpack.c.bf16 %v1747_v0, %v1743_v63  ;;  %v1744_v7 = vmul.f32 %v1736_v62, %v1680_v61  ;;  %v6425_v63 = vld [vmem:[#allocation20 + $0x64] ss:$24 sps:$4 sm:$0xff]   ;;  %v6423_v0 = vld [vmem:[#allocation20 + $0x60] ss:$24 sps:$4 sm:$0xff]  }
 0xbef   :  { %v1748_v8 = vmul.f32 %v1740_v3, %v1684_v2  ;;  %v1742_v9 = vadd.f32 1.0, %v6722_v38  ;;  %v1817_v37 = vpack.c.bf16 %v1749_v5, %v1745_v4  ;;  %v6428_v1 = vld [vmem:[#allocation20 + $0x6c] ss:$24 sps:$4 sm:$0xff]   ;;  %v6426_v2 = vld [vmem:[#allocation20 + $0x68] ss:$24 sps:$4 sm:$0xff]  }
 0xbf0   :  { %v1746_v11 = vmul.f32 %v1738_v40, %v1682_v44  ;;  %v6431_v3 = vld [vmem:[#allocation20 + $0x94] ss:$24 sps:$4 sm:$0xff]   ;;  %v6429_v4 = vld [vmem:[#allocation20 + $0x90] ss:$24 sps:$4 sm:$0xff]   ;;  %v6435_v44 = vld [vmem:[#allocation20 + $0xc0] ss:$24 sps:$4 sm:$0xff]  }
 0xbf1   :  { %v1816_v10 = vpack.c.bf16 %v1748_v8, %v1744_v7  ;;  %v1750_v13 = vmul.f32 %v1742_v9, %v1686_v6  ;;  %v6434_v5 = vld [vmem:[#allocation20 + $0x9c] ss:$24 sps:$4 sm:$0xff]   ;;  %v6432_v38 = vld [vmem:[#allocation20 + $0x98] ss:$24 sps:$4 sm:$0xff]   ;;  %v6438_v40 = vld [vmem:[#allocation20 + $0xc8] ss:$24 sps:$4 sm:$0xff]  }
 0xbf2   :  { %v6437_v6 = vld [vmem:[#allocation20 + $0xc4] ss:$24 sps:$4 sm:$0xff]   ;;  %v6443_v7 = vld [vmem:[#allocation20 + $0xf4] ss:$24 sps:$4 sm:$0xff]   ;;  %v6441_v9 = vld [vmem:[#allocation20 + $0xf0] ss:$24 sps:$4 sm:$0xff]  }
 0xbf3   :  { %2050 = vmatprep.mubr.bf16.mxu0 %v1816_v10  ;;  %v1818_v17 = vpack.c.bf16 %v1750_v13, %v1746_v11  ;;  %v6446_v8 = vld [vmem:[#allocation20 + $0xfc] ss:$24 sps:$4 sm:$0xff]   ;;  %v6452_v11 = vld [vmem:[#allocation20 + $0x12c] ss:$24 sps:$4 sm:$0xff]   ;;  %v6447_v13 = vld [vmem:[#allocation20 + $0x120] ss:$24 sps:$4 sm:$0xff]  }
 0xbf4   :  { %2051 = vmatmul.mubr.bf16.vlgmr.msra.gmra.mrb[16].mxu0 %v1815_v47  ;;  %v6440_v47 = vld [vmem:[#allocation20 + $0xcc] ss:$24 sps:$4 sm:$0xff]  }
 0xbf5   :  { %2091 = vmatprep.mubr.bf16.mxu1 %v1818_v17  ;;  %2495 = vmatprep.mubr.bf16.mxu0 %v7474_v36  ;;  %v6449_v10 = vld [vmem:[#allocation20 + $0x124] ss:$24 sps:$4 sm:$0xff]   ;;  %v6450_v17 = vld [vmem:[#allocation20 + $0x128] ss:$24 sps:$4 sm:$0xff]  }
 0xbf6   :  { %2092 = vmatmul.mubr.bf16.vlgmr.msra.gmra.mrb[28].mxu1 %v1817_v37  ;;  %2464 = vmatpush1.bf16.msra.mxu0 %v6411_v35  ;;  %v6444_v37 = vld [vmem:[#allocation20 + $0xf8] ss:$24 sps:$4 sm:$0xff]  }
 0xbf7   :  { %2538 = vmatprep.mubr.bf16.mxu1 %v7474_v36  ;;  %2507 = vmatpush1.bf16.msra.mxu1 %v6414_v43  ;;  %v6459_v43 = vld [vmem:[#allocation20 + $0x10] ss:$24 sps:$4 sm:$0xff]  }
 0xbf8   :  { %2465 = vmatprep.subr.bf16.mxu0 %v6419_v51  ;;  %2508 = vmatprep.subr.bf16.mxu1 %v6422_v52  ;;  %v6464_v51 = vld [vmem:[#allocation20 + $0x44] ss:$24 sps:$4 sm:$0xff]   ;;  %v6462_v52 = vld [vmem:[#allocation20 + $0x40] ss:$24 sps:$4 sm:$0xff]  }
 0xbfa   :  { %2466 = vmatpush1.bf16.msra.mxu0 %v6417_v53  ;;  %v6467_v53 = vld [vmem:[#allocation20 + $0x74] ss:$24 sps:$4 sm:$0xff]  }
 0xbfb   :  { %2509 = vmatpush1.bf16.msra.mxu1 %v6420_v56  ;;  %2467 = vmatprep.subr.bf16.mxu0 %v6425_v63  ;;  %v6465_v56 = vld [vmem:[#allocation20 + $0x70] ss:$24 sps:$4 sm:$0xff]   ;;  %v6482_v63 = vld [vmem:[#allocation20 + $0x164] ss:$24 sps:$4 sm:$0xff]  }
 0xbfc   :  { %2510 = vmatprep.subr.bf16.mxu1 %v6428_v1  ;;  %v2191_v1 = vld [vmem:[%s8621_s28] sm:$0x3f] }
 0xbfe   :  { %2468 = vmatpush1.bf16.msra.mxu0 %v6423_v0  ;;  %v6480_v0 = vld [vmem:[#allocation20 + $0x160] ss:$24 sps:$4 sm:$0xff]  }
 0xbff   :  { %2511 = vmatpush1.bf16.msra.mxu1 %v6426_v2  ;;  %2469 = vmatprep.subr.bf16.mxu0 %v6431_v3  ;;  %v2196_v2 = vrot.slane %v2191_v1, %v7850_v15  ;;  %v2204_v3 = vrot.slane %v2191_v1, %v7853_v16 }
 0xc00   :  { %2512 = vmatprep.subr.bf16.mxu1 %v6434_v5 }
 0xc02   :  { %2470 = vmatpush1.bf16.msra.mxu0 %v6429_v4 }
 0xc03   :  { %2513 = vmatpush1.bf16.msra.mxu1 %v6432_v38  ;;  %2471 = vmatprep.subr.bf16.mxu0 %v6437_v6  ;;  %v2200_v38 = vrot.slane %v2191_v1, %v7857_v18 }
 0xc04   :  { %2514 = vmatprep.subr.bf16.mxu1 %v6440_v47 }
 0xc06   :  { %2472 = vmatpush1.bf16.msra.mxu0 %v6435_v44  ;;  %v2208_v44 = vrot.slane %v2191_v1, %v7860_v19 }
 0xc07   :  { %2515 = vmatpush1.bf16.msra.mxu1 %v6438_v40  ;;  %2473 = vmatprep.subr.bf16.mxu0 %v6443_v7 }
 0xc08   :  { %2516 = vmatprep.subr.bf16.mxu1 %v6446_v8 }
 0xc0a   :  { %2474 = vmatpush1.bf16.msra.mxu0 %v6441_v9 }
 0xc0b   :  { %2517 = vmatpush1.bf16.msra.mxu1 %v6444_v37  ;;  %2475 = vmatprep.subr.bf16.mxu0 %v6449_v10 }
 0xc0c   :  { %2518 = vmatprep.subr.bf16.mxu1 %v6452_v11 }
 0xc0e   :  { %2476 = vmatpush1.bf16.msra.mxu0 %v6447_v13 }
 0xc0f   :  { %2519 = vmatpush1.bf16.msra.mxu1 %v6450_v17 }
 0xcc7   :  { %v5925_v32 = vpop.f32.mrb[16].mxu0 }
 0xcc8   :  { %v5926_v55 = vpop.f32.mrb[17].mxu0 }
 0xcc9   :  { %v5947_v20 = vpop.f32.mrb[28].mxu1  ;;  %v5927_v21 = vadd.f32 %v5926_v55, %v5925_v32  ;;  %v5928_v22 = vpop.f32.mrb[18].mxu0  ;;  %v6455_v32 = vld [vmem:[#allocation20 + $0x154] ss:$24 sps:$4 sm:$0xff]   ;;  %v6453_v55 = vld [vmem:[#allocation20 + $0x150] ss:$24 sps:$4 sm:$0xff]  }
 0xcca   :  { %v5948_v23 = vpop.f32.mrb[29].mxu1  ;;  %v5929_v24 = vpop.f32.mrb[19].mxu0  ;;  %2477 = vmatprep.subr.bf16.mxu0 %v6455_v32 }
 0xccb   :  { %v2053_v25 = vadd.f32 %v5927_v21, %v5615_v54  ;;  %v5949_v26 = vadd.f32 %v5948_v23, %v5947_v20  ;;  %v5950_v27 = vpop.f32.mrb[30].mxu1  ;;  %v5930_v28 = vadd.f32 %v5929_v24, %v5928_v22  ;;  %v6456_v20 = vld [vmem:[#allocation20 + $0x158] ss:$24 sps:$4 sm:$0xff]   ;;  %v6461_v21 = vld [vmem:[#allocation20 + $0x14] ss:$24 sps:$4 sm:$0xff]   ;;  %2478 = vmatpush1.bf16.msra.mxu0 %v6453_v55 }
 0xccc   :  { %v5951_v29 = vpop.f32.mrb[31].mxu1  ;;  %2549 = vmatprep.subr.bf16.mxu0 %v6461_v21 }
 0xccd   :  { %v2094_v30 = vadd.f32 %v5949_v26, %v2053_v25  ;;  %v2056_v31 = vadd.f32 %v5930_v28, %v5615_v54  ;;  %v5952_v33 = vadd.f32 %v5951_v29, %v5950_v27  ;;  %v6458_v54 = vld [vmem:[#allocation20 + $0x15c] ss:$24 sps:$4 sm:$0xff]  }
 0xcce   :  { %2520 = vmatprep.subr.bf16.mxu1 %v6458_v54  ;;  %v5648_v29 = vld [vmem:[#allocation17] ss:$0 sm:$0xff] }
 0xccf   :  { %v2097_v41 = vadd.f32 %v5952_v33, %v2056_v31  ;;  %v2100_v42 = vadd.f32 %v2094_v30, %v7948_v49  ;;  %2521 = vmatpush1.bf16.msra.mxu1 %v6456_v20 }
 0xcd0   :  { %6096 = vmatprep.subr.bf16.mxu1 %v7475_v12 }
 0xcd1   :  { %2104 = vadd.xlane.f32.xlu0 %v2100_v42  ;;  %v2101_v34 = vadd.f32 %v2097_v41, %v7950_v50 }
 0xcd3   :  { %2106 = vadd.xlane.f32.xlu1 %v2101_v34 }
 0xd5e   :  { %v2105_v49 = vpop.xlane.xlu0 %2104 }
 0xd5f   :  { %v2108_v57 = vmul.f32 0.0078125, %v2105_v49  ;;  %v6470_v49 = vld [vmem:[#allocation20 + $0xa4] ss:$24 sps:$4 sm:$0xff]  }
 0xd60   :  { %v2107_v50 = vpop.xlane.xlu1 %2106 }
 0xd61   :  { %v8004_v58 = vsub.f32 %v2100_v42, %v2108_v57  ;;  %v2109_v60 = vmul.f32 0.0078125, %v2107_v50  ;;  %v5649_v42 = vld [vmem:[#allocation19] ss:$0 sm:$0xff]  ;;  %v6468_v57 = vld [vmem:[#allocation20 + $0xa0] ss:$24 sps:$4 sm:$0xff]  }
 0xd62   :  { %v6473_v50 = vld [vmem:[#allocation20 + $0xd4] ss:$24 sps:$4 sm:$0xff]  }
 0xd63   :  { %v8006_v59 = vsub.f32 %v2101_v34, %v2109_v60  ;;  %v2112_v61 = vmul.f32 %v8004_v58, %v8004_v58  ;;  %v6476_v60 = vld [vmem:[#allocation20 + $0x104] ss:$24 sps:$4 sm:$0xff]  }
 0xd65   :  { %2114 = vadd.xlane.f32.xlu0 %v2112_v61  ;;  %v2113_v62 = vmul.f32 %v8006_v59, %v8006_v59  ;;  %v6479_v61 = vld [vmem:[#allocation20 + $0x134] ss:$24 sps:$4 sm:$0xff]  }
 0xd67   :  { %2116 = vadd.xlane.f32.xlu1 %v2113_v62  ;;  %v6477_v62 = vld [vmem:[#allocation20 + $0x130] ss:$24 sps:$4 sm:$0xff]  }
 0xdf2   :  { %v2115_v22 = vpop.xlane.xlu0 %2114 }
 0xdf3   :  { %v2118_v23 = vmul.f32 0.0078125, %v2115_v22 }
 0xdf4   :  { %v2117_v24 = vpop.xlane.xlu1 %2116 }
 0xdf5   :  { %v2120_v25 = vadd.f32 1e-12, %v2118_v23  ;;  %v2119_v26 = vmul.f32 0.0078125, %v2117_v24  ;;  %v2212_v24 = vrot.slane %v2191_v1, %v503_v45 }
 0xdf7   :  { %6723 = vrsqrt.f32 %v2120_v25  ;;  %v2121_v27 = vadd.f32 1e-12, %v2119_v26  ;;  %v2216_v26 = vrot.slane %v2191_v1, %v507_v46 }
 0xdf9   :  { %6725 = vrsqrt.f32 %v2121_v27 }
 0xe01   :  { %v6724_v28 = vpop.eup %6723 }
 0xe02   :  { %v2124_v30 = vmul.f32 %v6724_v28, %v8004_v58  ;;  %v6471_v58 = vld [vmem:[#allocation20 + $0xd0] ss:$24 sps:$4 sm:$0xff]  }
 0xe03   :  { %v6726_v31 = vpop.eup %6725 }
 0xe04   :  { %v2125_v33 = vmul.f32 %v6726_v31, %v8006_v59  ;;  %v2132_v41 = vmul.f32 %v5648_v29, %v2124_v30  ;;  %v6474_v59 = vld [vmem:[#allocation20 + $0x100] ss:$24 sps:$4 sm:$0xff]  }
 0xe06   :  { %v2133_v34 = vmul.f32 %v5648_v29, %v2125_v33  ;;  %v8015_v35 = vadd.f32 %v5649_v42, %v2132_v41 }
 0xe08   :  { %v8017_v39 = vadd.f32 %v5649_v42, %v2133_v34 }
 0xe0a   :  { %v2190_v48 = vpack.c.bf16 %v8017_v39, %v8015_v35 }
 0xe0c   :  { %2496 = vmatmul.mubr.bf16.vlgmr.msra.gmra.mrb[20].mxu0 %v2190_v48  ;;  %2539 = vmatmul.mubr.bf16.vlgmr.msra.gmra.mrb[32].mxu1 %v2190_v48 }
 0xe0d   :  { %2550 = vmatpush1.bf16.msra.mxu0 %v6459_v43  ;;  %2581 = vmatprep.mubr.bf16.mxu0 %v7474_v36 }
 0xe0e   :  { %2551 = vmatprep.subr.bf16.mxu0 %v6464_v51  ;;  %6098 = vmatprep.mubr.msk.bf16.mxu1 %vm7476_vm0, %v7475_v12 }
 0xe11   :  { %2552 = vmatpush1.bf16.msra.mxu0 %v6462_v52  ;;  %v6895_v52 = vld [vmem:[%s8620_s6] sm:$0xff] }
 0xe12   :  { %2553 = vmatprep.subr.bf16.mxu0 %v6467_v53 }
 0xe15   :  { %2554 = vmatpush1.bf16.msra.mxu0 %v6465_v56 }
 0xe16   :  { %2555 = vmatprep.subr.bf16.mxu0 %v6470_v49  ;;  %v6896_v49 = vld [vmem:[%s8620_s6 + $0x8] sm:$0xff] }
 0xe19   :  { %2556 = vmatpush1.bf16.msra.mxu0 %v6468_v57 }
 0xe1a   :  { %2557 = vmatprep.subr.bf16.mxu0 %v6473_v50 }
 0xe1d   :  { %2558 = vmatpush1.bf16.msra.mxu0 %v6471_v58 }
 0xe1e   :  { %2559 = vmatprep.subr.bf16.mxu0 %v6476_v60 }
 0xe21   :  { %2560 = vmatpush1.bf16.msra.mxu0 %v6474_v59 }
 0xe22   :  { %2561 = vmatprep.subr.bf16.mxu0 %v6479_v61 }
 0xe25   :  { %2562 = vmatpush1.bf16.msra.mxu0 %v6477_v62 }
 0xe26   :  { %2563 = vmatprep.subr.bf16.mxu0 %v6482_v63 }
 0xe29   :  { %2564 = vmatpush1.bf16.msra.mxu0 %v6480_v0 }
 0xe2a   :  { %6120 = vmatprep.subr.bf16.mxu0 %v7475_v12 }
 0xe2c   :  { %2582 = vmatmul.mubr.bf16.vlgmr.msra.gmra.mrb[24].mxu0 %v2190_v48 }
 0xe2d   :  { %6136 = vmatprep.mubr.msk.bf16.mxu0 %vm7476_vm0, %v7475_v12 }
 0xedf   :  { %v2497_v4 = vpop.f32.mrb[20].mxu0  ;;  %v2540_v5 = vpop.f32.mrb[32].mxu1 }
 0xee0   :  { %v2499_v6 = vpop.f32.mrb[21].mxu0  ;;  %v2542_v40 = vpop.f32.mrb[33].mxu1  ;;  %v2498_v8 = vadd.f32 %v2497_v4, %v2196_v2  ;;  %v2541_v9 = vadd.f32 %v2540_v5, %v2204_v3 }
 0xee1   :  { %v2501_v47 = vpop.f32.mrb[22].mxu0  ;;  %v2544_v7 = vpop.f32.mrb[34].mxu1  ;;  %v8032_v17 = vadd.f32 %v2499_v6, %v2200_v38  ;;  %v8034_v32 = vadd.f32 %v2542_v40, %v2208_v44 }
 0xee2   :  { %v2502_v37 = vadd.f32 %v2501_v47, %v2196_v2  ;;  %v2545_v10 = vadd.f32 %v2544_v7, %v2204_v3  ;;  %v2503_v11 = vpop.f32.mrb[23].mxu0  ;;  %v2546_v13 = vpop.f32.mrb[35].mxu1 }
 0xee3   :  { %v8036_v54 = vadd.f32 %v2503_v11, %v2200_v38  ;;  %v2547_v55 = vadd.f32 %v2546_v13, %v2208_v44 }
 0xee4   :  { %v2624_v20 = vpack.c.bf16 %v2502_v37, %v2498_v8  ;;  %v2625_v21 = vpack.c.bf16 %v2545_v10, %v2541_v9 }
 0xee5   :  { %v2740_v22 = vpack.c.bf16 %v8036_v54, %v8032_v17  ;;  %v2741_v23 = vpack.c.bf16 %v2547_v55, %v8034_v32 }
 0xee6   :  { %6097 = vmatpush3.bf16.xpose.msra.mxu1 %v2625_v21 }
 0xee7   :  { %6102 = vmatprep.subr.bf16.mxu1 %v7475_v12 }
 0xeed   :  { %6099 = vmatmul.mubr.bf16.vlgmr.msra.gmra.mrb[36].mxu1 %v2624_v20 }
 0xeee   :  { %6104 = vmatprep.mubr.msk.bf16.mxu1 %vm7476_vm0, %v7475_v12 }
 0xeff   :  { %v2583_v25 = vpop.f32.mrb[24].mxu0 }
 0xf00   :  { %v2585_v27 = vpop.f32.mrb[25].mxu0  ;;  %v2584_v29 = vadd.f32 %v2583_v25, %v2212_v24 }
 0xf01   :  { %v2587_v28 = vpop.f32.mrb[26].mxu0  ;;  %v2586_v33 = vadd.f32 %v2585_v27, %v2216_v26 }
 0xf02   :  { %v2588_v30 = vadd.f32 %v2587_v28, %v2212_v24  ;;  %v2589_v31 = vpop.f32.mrb[27].mxu0 }
 0xf03   :  { %v2590_v41 = vadd.f32 %v2589_v31, %v2216_v26 }
 0xf04   :  { %v2693_v42 = vpack.c.bf16 %v2588_v30, %v2584_v29 }
 0xf05   :  { %v2809_v34 = vpack.c.bf16 %v2590_v41, %v2586_v33 }
 0xf06   :  { %6103 = vmatpush3.bf16.msra.mxu1 %v2693_v42  ;;  %v6491_v42 = vld [vmem:[#allocation22 + $0x40] sm:$0xff]  }
 0xf07   :  { %6108 = vmatprep.subr.bf16.mxu1 %v7475_v12  ;;  %6121 = vmatpush3.bf16.msra.mxu0 %v6491_v42 }
 0xf08   :  { %6122 = vmatprep.subr.bf16.mxu0 %v7475_v12 }
 0xfc0   :  { %v2660_v43 = vpop.f32.mrb[36].mxu1 }
 0xfc1   :  { %v2667_v45 = vmul.f32 0.125, %v2660_v43  ;;  %v6100_v48 = vpop.f32.mrb[37].mxu1  ;;  %v6493_v43 = vld [vmem:[#allocation22 + $0x50] sm:$0xff]  }
 0xfc2   :  { %v2663_v51 = vpop.f32.mrb[38].mxu1  ;;  %v6495_v48 = vld [vmem:[#allocation22 + $0x60] sm:$0xff]  }
 0xfc3   :  { %v2668_v14 = vmul.f32 0.125, %v2663_v51  ;;  %v6101_v46 = vpop.f32.mrb[39].mxu1  ;;  %v2669_v53 = vadd.f32 %v6895_v52, %v2667_v45  ;;  %v6494_v45 = vld [vmem:[#allocation22 + $0x58] sm:$0xff]   ;;  %v6496_v51 = vld [vmem:[#allocation22 + $0x68] sm:$0xff]  }
 0xfc5   :  { %v2671_v56 = vsel %vm963_vm1, %v2669_v53, -inf  ;;  %v2670_v57 = vadd.f32 %v6896_v49, %v2668_v14  ;;  %v6497_v14 = vld [vmem:[#allocation22 + $0x70] sm:$0xff]  }
 0xfc6   :  { %2672 = vmax.xlane.f32.xlu0 %v2671_v56 }
 0xfc7   :  { %v2674_v50 = vsel %vm963_vm1, %v2670_v57, -inf }
 0xfc8   :  { %2675 = vmax.xlane.f32.xlu1 %v2674_v50  ;;  %v6483_v50 = vld [vmem:[#allocation22] sm:$0xff]  }
0x1053   :  { %v2673_v58 = vpop.xlane.xlu0 %2672 }
0x1054   :  { %v2677_v60 = vsub.f32 %v2669_v53, %v2673_v58 }
0x1055   :  { %v2676_v59 = vpop.xlane.xlu1 %2675 }
0x1056   :  { %v2679_v61 = vmul.f32 1.442695, %v2677_v60  ;;  %v2678_v62 = vsub.f32 %v2670_v57, %v2676_v59  ;;  %v6484_v60 = vld [vmem:[#allocation22 + $0x8] sm:$0xff]   ;;  %v6485_v59 = vld [vmem:[#allocation22 + $0x10] sm:$0xff]  }
0x1058   :  { %6727 = vpow2.f32 %v2679_v61  ;;  %v2681_v63 = vmul.f32 1.442695, %v2678_v62  ;;  %v6486_v61 = vld [vmem:[#allocation22 + $0x18] sm:$0xff]   ;;  %v6487_v62 = vld [vmem:[#allocation22 + $0x20] sm:$0xff]  }
0x105a   :  { %6729 = vpow2.f32 %v2681_v63  ;;  %v6488_v63 = vld [vmem:[#allocation22 + $0x28] sm:$0xff]  }
0x1062   :  { %v6728_v0 = vpop.eup %6727 }
0x1063   :  { %v2683_v1 = vsel %vm963_vm1, %v6728_v0, 0.0 }
0x1064   :  { %v6730_v2 = vpop.eup %6729  ;;  %2684 = vadd.xlane.f32.xlu0 %v2683_v1  ;;  %v6490_v1 = vld [vmem:[#allocation22 + $0x38] sm:$0xff]  }
0x1065   :  { %v2686_v3 = vsel %vm963_vm1, %v6730_v2, 0.0 }
0x1066   :  { %2687 = vadd.xlane.f32.xlu1 %v2686_v3 }
0x10f1   :  { %v2685_v4 = vpop.xlane.xlu0 %2684 }
0x10f2   :  { %6731 = vrcp.f32 %v2685_v4 }
0x10f3   :  { %v2688_v5 = vpop.xlane.xlu1 %2687 }
0x10f4   :  { %6733 = vrcp.f32 %v2688_v5 }
0x10fc   :  { %v6732_v38 = vpop.eup %6731 }
0x10fd   :  { %v2691_v6 = vmul.f32 %v6732_v38, %v6728_v0  ;;  %v6489_v0 = vld [vmem:[#allocation22 + $0x30] sm:$0xff]  }
0x10fe   :  { %v6734_v44 = vpop.eup %6733 }
0x10ff   :  { %v2692_v40 = vmul.f32 %v6734_v44, %v6730_v2  ;;  %v6498_v2 = vld [vmem:[#allocation22 + $0x78] sm:$0xff]  }
0x1101   :  { %v2694_v47 = vpack.c.bf16 %v2692_v40, %v2691_v6 }
0x1103   :  { %6105 = vmatmul.mubr.msk.bf16.vlgmr.msra.gmra.mrb[40].mxu1 %vm963_vm1, %v2694_v47 }
0x1104   :  { %6109 = vmatpush3.bf16.xpose.msra.mxu1 %v2741_v23  ;;  %6110 = vmatprep.mubr.msk.bf16.mxu1 %vm7476_vm0, %v7475_v12 }
0x1105   :  { %6114 = vmatprep.subr.bf16.mxu1 %v7475_v12 }
0x110b   :  { %6111 = vmatmul.mubr.bf16.vlgmr.msra.gmra.mrb[44].mxu1 %v2740_v22 }
0x110c   :  { %6115 = vmatpush3.bf16.msra.mxu1 %v2809_v34  ;;  %6116 = vmatprep.mubr.msk.bf16.mxu1 %vm7476_vm0, %v7475_v12  ;;  %v6492_v34 = vld [vmem:[#allocation22 + $0x48] sm:$0xff]  }
0x110d   :  { %6140 = vmatprep.subr.bf16.mxu1 %v7475_v12  ;;  %6123 = vmatpush3.bf16.msra.mxu0 %v6492_v34  ;;  %v6513_v34 = vld [vmem:[#allocation23 + $0x44] ss:$16 sps:$4 sm:$0xff]  }
0x110e   :  { %6124 = vmatprep.subr.bf16.mxu0 %v7475_v12 }
0x1111   :  { %6125 = vmatpush3.bf16.msra.mxu0 %v6493_v43  ;;  %v6516_v43 = vld [vmem:[#allocation23 + $0x4c] ss:$16 sps:$4 sm:$0xff]  }
0x1112   :  { %6126 = vmatprep.subr.bf16.mxu0 %v7475_v12 }
0x1115   :  { %6127 = vmatpush3.bf16.msra.mxu0 %v6494_v45  ;;  %v6511_v45 = vld [vmem:[#allocation23 + $0x40] ss:$16 sps:$4 sm:$0xff]  }
0x1116   :  { %6128 = vmatprep.subr.bf16.mxu0 %v7475_v12 }
0x1119   :  { %6129 = vmatpush3.bf16.msra.mxu0 %v6495_v48  ;;  %v6514_v48 = vld [vmem:[#allocation23 + $0x48] ss:$16 sps:$4 sm:$0xff]  }
0x111a   :  { %6130 = vmatprep.subr.bf16.mxu0 %v7475_v12 }
0x111d   :  { %6131 = vmatpush3.bf16.msra.mxu0 %v6496_v51  ;;  %v6519_v51 = vld [vmem:[#allocation23 + $0x64] ss:$16 sps:$4 sm:$0xff]  }
0x111e   :  { %6132 = vmatprep.subr.bf16.mxu0 %v7475_v12 }
0x1121   :  { %6133 = vmatpush3.bf16.msra.mxu0 %v6497_v14  ;;  %v6522_v14 = vld [vmem:[#allocation23 + $0x6c] ss:$16 sps:$4 sm:$0xff]  }
0x1122   :  { %6134 = vmatprep.subr.bf16.mxu0 %v7475_v12 }
0x1125   :  { %6135 = vmatpush3.bf16.msra.mxu0 %v6498_v2  ;;  %v6546_v2 = vld [vmem:[#allocation23 + $0xec] ss:$16 sps:$4 sm:$0xff]  }
0x11d6   :  { %v8062_v7 = vpop.f32.mrb[40].mxu1 }
0x11d7   :  { %v6106_v8 = vpop.f32.mrb[41].mxu1 }
0x11d8   :  { %v8064_v9 = vpop.f32.mrb[42].mxu1 }
0x11d9   :  { %v2739_v37 = vpack.c.bf16 %v8064_v9, %v8062_v7  ;;  %v6107_v10 = vpop.f32.mrb[43].mxu1  ;;  %v5716_v7 = vld [vmem:[%s8622_s19] ss:$0 sm:$0xff] }
0x11de   :  { %v2776_v11 = vpop.f32.mrb[44].mxu1 }
0x11df   :  { %v2783_v13 = vmul.f32 0.125, %v2776_v11  ;;  %v6112_v17 = vpop.f32.mrb[45].mxu1 }
0x11e0   :  { %v2779_v32 = vpop.f32.mrb[46].mxu1 }
0x11e1   :  { %v2784_v54 = vmul.f32 0.125, %v2779_v32  ;;  %v6113_v55 = vpop.f32.mrb[47].mxu1  ;;  %v2785_v20 = vadd.f32 %v6895_v52, %v2783_v13 }
0x11e3   :  { %v2787_v21 = vsel %vm963_vm1, %v2785_v20, -inf  ;;  %v2786_v22 = vadd.f32 %v6896_v49, %v2784_v54 }
0x11e4   :  { %2788 = vmax.xlane.f32.xlu0 %v2787_v21  ;;  %v6499_v21 = vld [vmem:[#allocation23] ss:$16 sps:$4 sm:$0xff]  }
0x11e5   :  { %v2790_v23 = vsel %vm963_vm1, %v2786_v22, -inf }
0x11e6   :  { %2791 = vmax.xlane.f32.xlu1 %v2790_v23  ;;  %v6502_v23 = vld [vmem:[#allocation23 + $0x8] ss:$16 sps:$4 sm:$0xff]  }
0x1271   :  { %v2789_v24 = vpop.xlane.xlu0 %2788 }
0x1272   :  { %v2793_v25 = vsub.f32 %v2785_v20, %v2789_v24  ;;  %v6504_v24 = vld [vmem:[#allocation23 + $0xc] ss:$16 sps:$4 sm:$0xff]  }
0x1273   :  { %v2792_v26 = vpop.xlane.xlu1 %2791 }
0x1274   :  { %v2795_v27 = vmul.f32 1.442695, %v2793_v25  ;;  %v2794_v28 = vsub.f32 %v2786_v22, %v2792_v26  ;;  %v6501_v22 = vld [vmem:[#allocation23 + $0x4] ss:$16 sps:$4 sm:$0xff]   ;;  %v6510_v26 = vld [vmem:[#allocation23 + $0x2c] ss:$16 sps:$4 sm:$0xff]  }
0x1275   :  { %v6507_v25 = vld [vmem:[#allocation23 + $0x24] ss:$16 sps:$4 sm:$0xff]   ;;  %3300 = vmatprep.subr.bf16.mxu0 %v6501_v22 }
0x1276   :  { %6735 = vpow2.f32 %v2795_v27  ;;  %v2797_v29 = vmul.f32 1.442695, %v2794_v28  ;;  %v6505_v27 = vld [vmem:[#allocation23 + $0x20] ss:$16 sps:$4 sm:$0xff]   ;;  %v6508_v28 = vld [vmem:[#allocation23 + $0x28] ss:$16 sps:$4 sm:$0xff]  }
0x1277   :  { %v6549_v22 = vld [vmem:[#allocation26] sm:$0xff]  }
0x1278   :  { %6737 = vpow2.f32 %v2797_v29 }
0x1280   :  { %v6736_v30 = vpop.eup %6735 }
0x1281   :  { %v2799_v31 = vsel %vm963_vm1, %v6736_v30, 0.0 }
0x1282   :  { %v6738_v33 = vpop.eup %6737  ;;  %2800 = vadd.xlane.f32.xlu0 %v2799_v31 }
0x1283   :  { %v2802_v41 = vsel %vm963_vm1, %v6738_v33, 0.0 }
0x1284   :  { %2803 = vadd.xlane.f32.xlu1 %v2802_v41 }
0x130f   :  { %v2801_v46 = vpop.xlane.xlu0 %2800 }
0x1310   :  { %6739 = vrcp.f32 %v2801_v46  ;;  %v6517_v46 = vld [vmem:[#allocation23 + $0x60] ss:$16 sps:$4 sm:$0xff]  }
0x1311   :  { %v2804_v52 = vpop.xlane.xlu1 %2803 }
0x1312   :  { %6741 = vrcp.f32 %v2804_v52  ;;  %v6520_v52 = vld [vmem:[#allocation23 + $0x68] ss:$16 sps:$4 sm:$0xff]  }
0x131a   :  { %v6740_v53 = vpop.eup %6739 }
0x131b   :  { %v2807_v49 = vmul.f32 %v6740_v53, %v6736_v30  ;;  %v6523_v53 = vld [vmem:[#allocation23 + $0x80] ss:$16 sps:$4 sm:$0xff]  }
0x131c   :  { %v6742_v56 = vpop.eup %6741 }
0x131d   :  { %v2808_v57 = vmul.f32 %v6742_v56, %v6738_v33  ;;  %v6525_v56 = vld [vmem:[#allocation23 + $0x84] ss:$16 sps:$4 sm:$0xff]  }
0x131f   :  { %v2810_v58 = vpack.c.bf16 %v2808_v57, %v2807_v49  ;;  %v6526_v49 = vld [vmem:[#allocation23 + $0x88] ss:$16 sps:$4 sm:$0xff]   ;;  %v6528_v57 = vld [vmem:[#allocation23 + $0x8c] ss:$16 sps:$4 sm:$0xff]  }
0x1321   :  { %6117 = vmatmul.mubr.msk.bf16.vlgmr.msra.gmra.mrb[48].mxu1 %vm963_vm1, %v2810_v58  ;;  %v6534_v58 = vld [vmem:[#allocation23 + $0xac] ss:$16 sps:$4 sm:$0xff]  }
0x1322   :  { %6141 = vmatpush3.bf16.msra.mxu1 %v6483_v50  ;;  %6156 = vmatprep.mubr.msk.bf16.mxu1 %vm7476_vm0, %v7475_v12  ;;  %v6531_v50 = vld [vmem:[#allocation23 + $0xa4] ss:$16 sps:$4 sm:$0xff]  }
0x1323   :  { %6142 = vmatprep.subr.bf16.mxu1 %v7475_v12 }
0x1326   :  { %6143 = vmatpush3.bf16.msra.mxu1 %v6484_v60  ;;  %v6529_v60 = vld [vmem:[#allocation23 + $0xa0] ss:$16 sps:$4 sm:$0xff]  }
0x1327   :  { %6144 = vmatprep.subr.bf16.mxu1 %v7475_v12 }
0x132a   :  { %6145 = vmatpush3.bf16.msra.mxu1 %v6485_v59  ;;  %v6532_v59 = vld [vmem:[#allocation23 + $0xa8] ss:$16 sps:$4 sm:$0xff]  }
0x132b   :  { %6146 = vmatprep.subr.bf16.mxu1 %v7475_v12 }
0x132e   :  { %6147 = vmatpush3.bf16.msra.mxu1 %v6486_v61  ;;  %v6537_v61 = vld [vmem:[#allocation23 + $0xc4] ss:$16 sps:$4 sm:$0xff]  }
0x132f   :  { %6148 = vmatprep.subr.bf16.mxu1 %v7475_v12 }
0x1332   :  { %6149 = vmatpush3.bf16.msra.mxu1 %v6487_v62  ;;  %v6540_v62 = vld [vmem:[#allocation23 + $0xcc] ss:$16 sps:$4 sm:$0xff]  }
0x1333   :  { %6150 = vmatprep.subr.bf16.mxu1 %v7475_v12 }
0x1336   :  { %6151 = vmatpush3.bf16.msra.mxu1 %v6488_v63  ;;  %v6535_v63 = vld [vmem:[#allocation23 + $0xc0] ss:$16 sps:$4 sm:$0xff]  }
0x1337   :  { %6152 = vmatprep.subr.bf16.mxu1 %v7475_v12 }
0x133a   :  { %6153 = vmatpush3.bf16.msra.mxu1 %v6489_v0  ;;  %v6538_v0 = vld [vmem:[#allocation23 + $0xc8] ss:$16 sps:$4 sm:$0xff]  }
0x133b   :  { %6154 = vmatprep.subr.bf16.mxu1 %v7475_v12 }
0x133e   :  { %6155 = vmatpush3.bf16.msra.mxu1 %v6490_v1  ;;  %v6543_v1 = vld [vmem:[#allocation23 + $0xe4] ss:$16 sps:$4 sm:$0xff]  }
0x133f   :  { %3343 = vmatprep.subr.bf16.mxu1 %v6504_v24  ;;  %v6551_v24 = vld [vmem:[#allocation26 + $0x48] sm:$0xff]  }
0x1341   :  { %6157 = vmatmul.mubr.bf16.vlgmr.msra.gmra.mrb[52].mxu1 %v2739_v37 }
0x1342   :  { %3375 = vmatprep.mubr.bf16.mxu1 %v7474_v36  ;;  %3344 = vmatpush1.bf16.msra.mxu1 %v6502_v23  ;;  %v6550_v23 = vld [vmem:[#allocation26 + $0x80] sm:$0xff]  }
0x1343   :  { %3345 = vmatprep.subr.bf16.mxu1 %v6510_v26  ;;  %v6553_v26 = vld [vmem:[#allocation26 + $0x8] sm:$0xff]  }
0x1346   :  { %3346 = vmatpush1.bf16.msra.mxu1 %v6508_v28  ;;  %v6555_v28 = vld [vmem:[#allocation26 + $0x50] sm:$0xff]  }
0x1347   :  { %3347 = vmatprep.subr.bf16.mxu1 %v6516_v43  ;;  %v6565_v43 = vld [vmem:[#allocation26 + $0x20] sm:$0xff]  }
0x134a   :  { %3348 = vmatpush1.bf16.msra.mxu1 %v6514_v48  ;;  %v6567_v48 = vld [vmem:[#allocation26 + $0x68] sm:$0xff]  }
0x134b   :  { %3349 = vmatprep.subr.bf16.mxu1 %v6522_v14  ;;  %v6569_v14 = vld [vmem:[#allocation26 + $0x28] sm:$0xff]  }
0x134e   :  { %3350 = vmatpush1.bf16.msra.mxu1 %v6520_v52  ;;  %v6571_v52 = vld [vmem:[#allocation26 + $0x70] sm:$0xff]  }
0x134f   :  { %3351 = vmatprep.subr.bf16.mxu1 %v6528_v57  ;;  %v6575_v57 = vld [vmem:[#allocation26 + $0x78] sm:$0xff]  }
0x1352   :  { %3352 = vmatpush1.bf16.msra.mxu1 %v6526_v49  ;;  %v6574_v49 = vld [vmem:[#allocation26 + $0xb0] sm:$0xff]  }
0x1353   :  { %3353 = vmatprep.subr.bf16.mxu1 %v6534_v58  ;;  %v6577_v58 = vld [vmem:[#allocation26 + $0x38] sm:$0xff]  }
0x1356   :  { %3354 = vmatpush1.bf16.msra.mxu1 %v6532_v59  ;;  %v3118_v59 = vld [vmem:[#allocation25] sm:$0xf] }
0x1357   :  { %3355 = vmatprep.subr.bf16.mxu1 %v6540_v62  ;;  %v3131_v62 = vrot.slane %v3118_v59, %v7853_v16 }
0x135a   :  { %3356 = vmatpush1.bf16.msra.mxu1 %v6538_v0  ;;  %v3135_v0 = vrot.slane %v3118_v59, %v7860_v19 }
0x135b   :  { %3357 = vmatprep.subr.bf16.mxu1 %v6546_v2 }
0x13f4   :  { %v2848_v3 = vpop.f32.mrb[48].mxu1 }
0x13f5   :  { %v6118_v4 = vpop.f32.mrb[49].mxu1 }
0x13f6   :  { %v2851_v5 = vpop.f32.mrb[50].mxu1  ;;  %v6544_v4 = vld [vmem:[#allocation23 + $0xe8] ss:$16 sps:$4 sm:$0xff]  }
0x13f7   :  { %v2855_v38 = vpack.c.bf16 %v2851_v5, %v2848_v3  ;;  %v6119_v44 = vpop.f32.mrb[51].mxu1  ;;  %v6541_v3 = vld [vmem:[#allocation23 + $0xe0] ss:$16 sps:$4 sm:$0xff]   ;;  %3358 = vmatpush1.bf16.msra.mxu1 %v6544_v4 }
0x13f9   :  { %6137 = vmatmul.mubr.bf16.vlgmr.msra.gmra.mrb[28].mxu0 %v2855_v38 }
0x13fa   :  { %3332 = vmatprep.mubr.bf16.mxu0 %v7474_v36  ;;  %3301 = vmatpush1.bf16.msra.mxu0 %v6499_v21  ;;  %v6548_v21 = vld [vmem:[#allocation26 + $0xc0] sm:$0xff]  }
0x13fb   :  { %3302 = vmatprep.subr.bf16.mxu0 %v6507_v25  ;;  %6001 = vmatprep.subr.bf16.mxu1 %v6548_v21  ;;  %v6552_v25 = vld [vmem:[#allocation26 + $0xc8] sm:$0xff]  }
0x13fe   :  { %3303 = vmatpush1.bf16.msra.mxu0 %v6505_v27  ;;  %v6554_v27 = vld [vmem:[#allocation26 + $0x88] sm:$0xff]  }
0x13ff   :  { %3304 = vmatprep.subr.bf16.mxu0 %v6513_v34  ;;  %v6564_v34 = vld [vmem:[#allocation26 + $0xe0] sm:$0xff]  }
0x1402   :  { %3305 = vmatpush1.bf16.msra.mxu0 %v6511_v45  ;;  %v6566_v45 = vld [vmem:[#allocation26 + $0xa0] sm:$0xff]  }
0x1403   :  { %3306 = vmatprep.subr.bf16.mxu0 %v6519_v51  ;;  %v6568_v51 = vld [vmem:[#allocation26 + $0xe8] sm:$0xff]  }
0x1406   :  { %3307 = vmatpush1.bf16.msra.mxu0 %v6517_v46  ;;  %v6570_v46 = vld [vmem:[#allocation26 + $0xa8] sm:$0xff]  }
0x1407   :  { %3308 = vmatprep.subr.bf16.mxu0 %v6525_v56  ;;  %v6573_v56 = vld [vmem:[#allocation26 + $0x30] sm:$0xff]  }
0x140a   :  { %3309 = vmatpush1.bf16.msra.mxu0 %v6523_v53  ;;  %v6572_v53 = vld [vmem:[#allocation26 + $0xf0] sm:$0xff]  }
0x140b   :  { %3310 = vmatprep.subr.bf16.mxu0 %v6531_v50  ;;  %v6576_v50 = vld [vmem:[#allocation26 + $0xf8] sm:$0xff]  }
0x140e   :  { %3311 = vmatpush1.bf16.msra.mxu0 %v6529_v60  ;;  %v6578_v60 = vld [vmem:[#allocation26 + $0xb8] sm:$0xff]  }
0x140f   :  { %3312 = vmatprep.subr.bf16.mxu0 %v6537_v61  ;;  %v3123_v61 = vrot.slane %v3118_v59, %v7850_v15 }
0x1412   :  { %3313 = vmatpush1.bf16.msra.mxu0 %v6535_v63  ;;  %v3127_v63 = vrot.slane %v3118_v59, %v7857_v18 }
0x1413   :  { %3314 = vmatprep.subr.bf16.mxu0 %v6543_v1 }
0x1414   :  { %v3027_v6 = vpop.f32.mrb[52].mxu1 }
0x1415   :  { %v6158_v40 = vpop.f32.mrb[53].mxu1 }
0x1416   :  { %v3030_v47 = vpop.f32.mrb[54].mxu1  ;;  %3315 = vmatpush1.bf16.msra.mxu0 %v6541_v3 }
0x1417   :  { %v6159_v8 = vpop.f32.mrb[55].mxu1 }
0x14cc   :  { %v2938_v10 = vpop.f32.mrb[28].mxu0 }
0x14cd   :  { %v3028_v9 = vadd.f32 %v3027_v6, %v2938_v10  ;;  %v6138_v37 = vpop.f32.mrb[29].mxu0  ;;  %v5717_v10 = vld [vmem:[%s8623_s17] ss:$0 sm:$0xff] }
0x14ce   :  { %v2941_v11 = vpop.f32.mrb[30].mxu0 }
0x14cf   :  { %v3041_v13 = vadd.f32 %v5716_v7, %v3028_v9  ;;  %v3031_v17 = vadd.f32 %v3030_v47, %v2941_v11  ;;  %v6139_v32 = vpop.f32.mrb[31].mxu0 }
0x14d1   :  { %v3042_v54 = vadd.f32 %v5716_v7, %v3031_v17  ;;  %v3043_v55 = vadd.f32 %v3041_v13, %v8015_v35  ;;  %v5718_v13 = vld [vmem:[%s8624_s27] ss:$0 sm:$0xff] }
0x14d3   :  { %3047 = vadd.xlane.f32.xlu0 %v3043_v55  ;;  %v3044_v20 = vadd.f32 %v3042_v54, %v8017_v39 }
0x14d5   :  { %3049 = vadd.xlane.f32.xlu1 %v3044_v20 }
0x1560   :  { %v3048_v35 = vpop.xlane.xlu0 %3047 }
0x1561   :  { %v3051_v29 = vmul.f32 0.0078125, %v3048_v35  ;;  %v6556_v35 = vld [vmem:[#allocation26 + $0xd0] sm:$0xff]  }
0x1562   :  { %v3050_v39 = vpop.xlane.xlu1 %3049 }
0x1563   :  { %v8097_v30 = vsub.f32 %v3043_v55, %v3051_v29  ;;  %v3052_v31 = vmul.f32 0.0078125, %v3050_v39  ;;  %v6557_v29 = vld [vmem:[#allocation26 + $0x10] sm:$0xff]  }
0x1564   :  { %v6558_v39 = vld [vmem:[#allocation26 + $0x90] sm:$0xff]  }
0x1565   :  { %v8099_v33 = vsub.f32 %v3044_v20, %v3052_v31  ;;  %v3055_v41 = vmul.f32 %v8097_v30, %v8097_v30  ;;  %v6547_v20 = vld [vmem:[#allocation26 + $0x40] sm:$0xff]   ;;  %v6560_v31 = vld [vmem:[#allocation26 + $0xd8] sm:$0xff]  }
0x1566   :  { %5979 = vmatprep.subr.bf16.mxu0 %v6547_v20 }
0x1567   :  { %3057 = vadd.xlane.f32.xlu0 %v3055_v41  ;;  %v3056_v42 = vmul.f32 %v8099_v33, %v8099_v33  ;;  %v6562_v41 = vld [vmem:[#allocation26 + $0x98] sm:$0xff]  }
0x1569   :  { %3059 = vadd.xlane.f32.xlu1 %v3056_v42  ;;  %v6563_v42 = vld [vmem:[#allocation26 + $0x60] sm:$0xff]  }
0x15f4   :  { %v3058_v5 = vpop.xlane.xlu0 %3057 }
0x15f5   :  { %v3061_v38 = vmul.f32 0.0078125, %v3058_v5 }
0x15f6   :  { %v3060_v44 = vpop.xlane.xlu1 %3059 }
0x15f7   :  { %v3063_v6 = vadd.f32 1e-12, %v3061_v38  ;;  %v3062_v40 = vmul.f32 0.0078125, %v3060_v44 }
0x15f9   :  { %6743 = vrsqrt.f32 %v3063_v6  ;;  %v3064_v47 = vadd.f32 1e-12, %v3062_v40 }
0x15fb   :  { %6745 = vrsqrt.f32 %v3064_v47 }
0x1603   :  { %v6744_v8 = vpop.eup %6743 }
0x1604   :  { %v3067_v7 = vmul.f32 %v6744_v8, %v8097_v30  ;;  %v6559_v30 = vld [vmem:[#allocation26 + $0x58] sm:$0xff]  }
0x1605   :  { %v6746_v9 = vpop.eup %6745 }
0x1606   :  { %v3068_v37 = vmul.f32 %v6746_v9, %v8099_v33  ;;  %v3075_v11 = vmul.f32 %v5717_v10, %v3067_v7  ;;  %v6561_v33 = vld [vmem:[#allocation26 + $0x18] sm:$0xff]  }
0x1608   :  { %v3076_v17 = vmul.f32 %v5717_v10, %v3068_v37  ;;  %v8109_v32 = vadd.f32 %v5718_v13, %v3075_v11 }
0x160a   :  { %v8111_v54 = vadd.f32 %v5718_v13, %v3076_v17 }
0x160c   :  { %v3117_v55 = vpack.c.bf16 %v8111_v54, %v8109_v32 }
0x160e   :  { %3333 = vmatmul.mubr.bf16.vlgmr.msra.gmra.mrb[32].mxu0 %v3117_v55  ;;  %3376 = vmatmul.mubr.bf16.vlgmr.msra.gmra.mrb[56].mxu1 %v3117_v55 }
0x160f   :  { %5980 = vmatpush3.bf16.msra.mxu0 %v6549_v22  ;;  %6002 = vmatpush3.bf16.msra.mxu1 %v6550_v23 }
0x1610   :  { %5981 = vmatprep.subr.bf16.mxu0 %v6551_v24  ;;  %6003 = vmatprep.subr.bf16.mxu1 %v6552_v25 }
0x1613   :  { %5982 = vmatpush3.bf16.msra.mxu0 %v6553_v26  ;;  %6004 = vmatpush3.bf16.msra.mxu1 %v6554_v27 }
0x1614   :  { %5983 = vmatprep.subr.bf16.mxu0 %v6555_v28  ;;  %6005 = vmatprep.subr.bf16.mxu1 %v6556_v35 }
0x1617   :  { %5984 = vmatpush3.bf16.msra.mxu0 %v6557_v29  ;;  %6006 = vmatpush3.bf16.msra.mxu1 %v6558_v39 }
0x1618   :  { %5985 = vmatprep.subr.bf16.mxu0 %v6559_v30  ;;  %6007 = vmatprep.subr.bf16.mxu1 %v6560_v31 }
0x161b   :  { %5986 = vmatpush3.bf16.msra.mxu0 %v6561_v33  ;;  %6008 = vmatpush3.bf16.msra.mxu1 %v6562_v41 }
0x161c   :  { %5987 = vmatprep.subr.bf16.mxu0 %v6563_v42  ;;  %6009 = vmatprep.subr.bf16.mxu1 %v6564_v34 }
0x161f   :  { %5988 = vmatpush3.bf16.msra.mxu0 %v6565_v43  ;;  %6010 = vmatpush3.bf16.msra.mxu1 %v6566_v45 }
0x1620   :  { %5989 = vmatprep.subr.bf16.mxu0 %v6567_v48  ;;  %6011 = vmatprep.subr.bf16.mxu1 %v6568_v51 }
0x1623   :  { %5990 = vmatpush3.bf16.msra.mxu0 %v6569_v14  ;;  %6012 = vmatpush3.bf16.msra.mxu1 %v6570_v46 }
0x1624   :  { %5991 = vmatprep.subr.bf16.mxu0 %v6571_v52  ;;  %6013 = vmatprep.subr.bf16.mxu1 %v6572_v53 }
0x1627   :  { %5992 = vmatpush3.bf16.msra.mxu0 %v6573_v56  ;;  %6014 = vmatpush3.bf16.msra.mxu1 %v6574_v49 }
0x1628   :  { %5993 = vmatprep.subr.bf16.mxu0 %v6575_v57  ;;  %6015 = vmatprep.subr.bf16.mxu1 %v6576_v50 }
0x162b   :  { %5994 = vmatpush3.bf16.msra.mxu0 %v6577_v58  ;;  %6016 = vmatpush3.bf16.msra.mxu1 %v6578_v60 }
0x16e1   :  { %v3334_v1 = vpop.f32.mrb[32].mxu0  ;;  %v3377_v2 = vpop.f32.mrb[56].mxu1 }
0x16e2   :  { %v8119_v3 = vadd.f32 %v3334_v1, %v3123_v61  ;;  %v8121_v4 = vadd.f32 %v3377_v2, %v3131_v62  ;;  %v3336_v5 = vpop.f32.mrb[33].mxu0  ;;  %v3379_v38 = vpop.f32.mrb[57].mxu1 }
0x16e3   :  { %v8123_v44 = vadd.f32 %v3336_v5, %v3127_v63  ;;  %v8125_v6 = vadd.f32 %v3379_v38, %v3135_v0  ;;  %v3338_v40 = vpop.f32.mrb[34].mxu0  ;;  %v3381_v47 = vpop.f32.mrb[58].mxu1 }
0x16e4   :  { %v3394_v8 = vmul.f32 0.044715, %v8119_v3  ;;  %v3396_v10 = vmul.f32 0.044715, %v8121_v4  ;;  %v3339_v7 = vadd.f32 %v3338_v40, %v3123_v61  ;;  %v3382_v9 = vadd.f32 %v3381_v47, %v3131_v62  ;;  %v3340_v37 = vpop.f32.mrb[35].mxu0  ;;  %v3383_v11 = vpop.f32.mrb[59].mxu1 }
0x16e5   :  { %v3395_v13 = vmul.f32 0.044715, %v8123_v44  ;;  %v3397_v17 = vmul.f32 0.044715, %v8125_v6  ;;  %v8131_v55 = vadd.f32 %v3340_v37, %v3127_v63  ;;  %v8133_v20 = vadd.f32 %v3383_v11, %v3135_v0 }
0x16e6   :  { %v3402_v21 = vmul.f32 %v3394_v8, %v8119_v3  ;;  %v3404_v22 = vmul.f32 %v3396_v10, %v8121_v4  ;;  %v3398_v23 = vmul.f32 0.044715, %v3339_v7  ;;  %v3400_v24 = vmul.f32 0.044715, %v3382_v9 }
0x16e7   :  { %v3403_v25 = vmul.f32 %v3395_v13, %v8123_v44  ;;  %v3405_v26 = vmul.f32 %v3397_v17, %v8125_v6  ;;  %v3399_v27 = vmul.f32 0.044715, %v8131_v55  ;;  %v3401_v28 = vmul.f32 0.044715, %v8133_v20 }
0x16e8   :  { %v3410_v35 = vmul.f32 %v3402_v21, %v8119_v3  ;;  %v3412_v29 = vmul.f32 %v3404_v22, %v8121_v4  ;;  %v3406_v39 = vmul.f32 %v3398_v23, %v3339_v7  ;;  %v3408_v30 = vmul.f32 %v3400_v24, %v3382_v9 }
0x16e9   :  { %v3411_v31 = vmul.f32 %v3403_v25, %v8123_v44  ;;  %v3413_v33 = vmul.f32 %v3405_v26, %v8125_v6  ;;  %v3407_v41 = vmul.f32 %v3399_v27, %v8131_v55  ;;  %v3409_v42 = vmul.f32 %v3401_v28, %v8133_v20 }
0x16ea   :  { %v3418_v34 = vadd.f32 %v3410_v35, %v8119_v3  ;;  %v3420_v43 = vadd.f32 %v3412_v29, %v8121_v4  ;;  %v3414_v45 = vmul.f32 %v3406_v39, %v3339_v7  ;;  %v3416_v48 = vmul.f32 %v3408_v30, %v3382_v9 }
0x16eb   :  { %v3415_v51 = vmul.f32 %v3407_v41, %v8131_v55  ;;  %v3417_v14 = vmul.f32 %v3409_v42, %v8133_v20  ;;  %v3419_v49 = vadd.f32 %v3411_v31, %v8123_v44  ;;  %v3421_v60 = vadd.f32 %v3413_v33, %v8125_v6 }
0x16ec   :  { %v3426_v46 = vmul.f32 0.7978846, %v3418_v34  ;;  %v3428_v52 = vmul.f32 0.7978846, %v3420_v43  ;;  %v3422_v53 = vadd.f32 %v3414_v45, %v3339_v7  ;;  %v3424_v56 = vadd.f32 %v3416_v48, %v3382_v9 }
0x16ed   :  { %v3423_v57 = vadd.f32 %v3415_v51, %v8131_v55  ;;  %v3427_v59 = vmul.f32 0.7978846, %v3419_v49  ;;  %v3425_v62 = vadd.f32 %v3417_v14, %v8133_v20  ;;  %v3429_v63 = vmul.f32 0.7978846, %v3421_v60 }
0x16ee   :  { %6747 = vtanh.f32 %v3426_v46  ;;  %v3430_v50 = vmul.f32 0.7978846, %v3422_v53  ;;  %v3432_v58 = vmul.f32 0.7978846, %v3424_v56  ;;  %v3386_v8 = vmul.f32 0.5, %v8119_v3 }
0x16ef   :  { %6749 = vtanh.f32 %v3428_v52  ;;  %v3431_v61 = vmul.f32 0.7978846, %v3423_v57  ;;  %v3433_v0 = vmul.f32 0.7978846, %v3425_v62  ;;  %v3390_v10 = vmul.f32 0.5, %v3339_v7 }
0x16f0   :  { %6751 = vtanh.f32 %v3430_v50  ;;  %v3388_v13 = vmul.f32 0.5, %v8121_v4  ;;  %v3392_v17 = vmul.f32 0.5, %v3382_v9  ;;  %v3387_v23 = vmul.f32 0.5, %v8123_v44 }
0x16f1   :  { %6753 = vtanh.f32 %v3432_v58  ;;  %v3391_v28 = vmul.f32 0.5, %v8131_v55  ;;  %v3389_v7 = vmul.f32 0.5, %v8125_v6  ;;  %v3393_v30 = vmul.f32 0.5, %v8133_v20  ;;  %v5751_v55 = vld [vmem:[#allocation28] ss:$0 sm:$0xff] }
0x16f2   :  { %6755 = vtanh.f32 %v3427_v59 }
0x16f3   :  { %6757 = vtanh.f32 %v3431_v61 }
0x16f4   :  { %6759 = vtanh.f32 %v3429_v63 }
0x16f5   :  { %6761 = vtanh.f32 %v3433_v0  ;;  %v6579_v0 = vld [vmem:[#allocation29] ss:$16 sps:$4 sm:$0xff]  }
0x16f8   :  { %v6748_v1 = vpop.eup %6747 }
0x16f9   :  { %v6750_v2 = vpop.eup %6749  ;;  %v3442_v5 = vadd.f32 1.0, %v6748_v1  ;;  %v6581_v1 = vld [vmem:[#allocation29 + $0x4] ss:$16 sps:$4 sm:$0xff]  }
0x16fa   :  { %v6752_v38 = vpop.eup %6751  ;;  %v3444_v40 = vadd.f32 1.0, %v6750_v2  ;;  %v6582_v2 = vld [vmem:[#allocation29 + $0x8] ss:$16 sps:$4 sm:$0xff]   ;;  %4064 = vmatprep.subr.bf16.mxu0 %v6581_v1 }
0x16fb   :  { %v6754_v47 = vpop.eup %6753  ;;  %v3446_v37 = vadd.f32 1.0, %v6752_v38  ;;  %v3450_v25 = vmul.f32 %v3442_v5, %v3386_v8  ;;  %v6584_v5 = vld [vmem:[#allocation29 + $0xc] ss:$16 sps:$4 sm:$0xff]   ;;  %v6587_v38 = vld [vmem:[#allocation29 + $0x24] ss:$16 sps:$4 sm:$0xff]  }
0x16fc   :  { %v6756_v11 = vpop.eup %6755  ;;  %v3448_v21 = vadd.f32 1.0, %v6754_v47  ;;  %v3452_v29 = vmul.f32 %v3444_v40, %v3388_v13  ;;  %v6590_v40 = vld [vmem:[#allocation29 + $0x2c] ss:$16 sps:$4 sm:$0xff]   ;;  %4107 = vmatprep.subr.bf16.mxu1 %v6584_v5  ;;  %v6585_v47 = vld [vmem:[#allocation29 + $0x20] ss:$16 sps:$4 sm:$0xff]  }
0x16fd   :  { %v6758_v22 = vpop.eup %6757  ;;  %v3443_v24 = vadd.f32 1.0, %v6756_v11  ;;  %v3454_v26 = vmul.f32 %v3446_v37, %v3390_v10  ;;  %v6588_v8 = vld [vmem:[#allocation29 + $0x28] ss:$16 sps:$4 sm:$0xff]   ;;  %v8187_v5 = vld [vmem:[#allocation31 + $0x24] ss:$16 sps:$4 sm:$0xff]  }
0x16fe   :  { %v6760_v27 = vpop.eup %6759  ;;  %v3447_v35 = vadd.f32 1.0, %v6758_v22  ;;  %v3456_v39 = vmul.f32 %v3448_v21, %v3392_v17  ;;  %v6593_v22 = vld [vmem:[#allocation29 + $0x44] ss:$16 sps:$4 sm:$0xff]   ;;  %v8185_v1 = vld [vmem:[#allocation31 + $0x8] ss:$16 sps:$4 sm:$0xff]  }
0x16ff   :  { %v6762_v3 = vpop.eup %6761  ;;  %v3445_v4 = vadd.f32 1.0, %v6760_v27  ;;  %v3522_v9 = vpack.c.bf16 %v3454_v26, %v3450_v25  ;;  %v3451_v31 = vmul.f32 %v3443_v24, %v3387_v23  ;;  %v6596_v23 = vld [vmem:[#allocation29 + $0x4c] ss:$16 sps:$4 sm:$0xff]   ;;  %v6591_v24 = vld [vmem:[#allocation29 + $0x40] ss:$16 sps:$4 sm:$0xff]  }
0x1700   :  { %v3455_v33 = vmul.f32 %v3447_v35, %v3391_v28  ;;  %v3449_v41 = vadd.f32 1.0, %v6762_v3  ;;  %v3524_v44 = vpack.c.bf16 %v3456_v39, %v3452_v29  ;;  %v6594_v25 = vld [vmem:[#allocation29 + $0x48] ss:$16 sps:$4 sm:$0xff]   ;;  %v6599_v26 = vld [vmem:[#allocation29 + $0x64] ss:$16 sps:$4 sm:$0xff]  }
0x1701   :  { %v3453_v34 = vmul.f32 %v3445_v4, %v3389_v7  ;;  %v6602_v27 = vld [vmem:[#allocation29 + $0x6c] ss:$16 sps:$4 sm:$0xff]   ;;  %v6597_v28 = vld [vmem:[#allocation29 + $0x60] ss:$16 sps:$4 sm:$0xff]   ;;  %v6600_v35 = vld [vmem:[#allocation29 + $0x68] ss:$16 sps:$4 sm:$0xff]  }
0x1702   :  { %v3523_v42 = vpack.c.bf16 %v3455_v33, %v3451_v31  ;;  %v3457_v43 = vmul.f32 %v3449_v41, %v3393_v30  ;;  %v6603_v29 = vld [vmem:[#allocation29 + $0x80] ss:$16 sps:$4 sm:$0xff]   ;;  %v6605_v39 = vld [vmem:[#allocation29 + $0x84] ss:$16 sps:$4 sm:$0xff]   ;;  %v6606_v3 = vld [vmem:[#allocation29 + $0x88] ss:$16 sps:$4 sm:$0xff]  }
0x1703   :  { %v6608_v7 = vld [vmem:[#allocation29 + $0x8c] ss:$16 sps:$4 sm:$0xff]   ;;  %v6611_v30 = vld [vmem:[#allocation29 + $0xa4] ss:$16 sps:$4 sm:$0xff]   ;;  %v6612_v31 = vld [vmem:[#allocation29 + $0xa8] ss:$16 sps:$4 sm:$0xff]  }
0x1704   :  { %3757 = vmatprep.mubr.bf16.mxu0 %v3523_v42  ;;  %v3525_v45 = vpack.c.bf16 %v3457_v43, %v3453_v34  ;;  %v6614_v4 = vld [vmem:[#allocation29 + $0xac] ss:$16 sps:$4 sm:$0xff]   ;;  %v6617_v33 = vld [vmem:[#allocation29 + $0xc4] ss:$16 sps:$4 sm:$0xff]   ;;  %v6618_v42 = vld [vmem:[#allocation29 + $0xc8] ss:$16 sps:$4 sm:$0xff]  }
0x1705   :  { %3758 = vmatmul.mubr.bf16.vlgmr.msra.gmra.mrb[36].mxu0 %v3522_v9  ;;  %v6609_v9 = vld [vmem:[#allocation29 + $0xa0] ss:$16 sps:$4 sm:$0xff]   ;;  %v6620_v41 = vld [vmem:[#allocation29 + $0xcc] ss:$16 sps:$4 sm:$0xff]   ;;  %v6623_v34 = vld [vmem:[#allocation29 + $0xe4] ss:$16 sps:$4 sm:$0xff]  }
0x1706   :  { %3798 = vmatprep.mubr.bf16.mxu1 %v3525_v45  ;;  %4096 = vmatprep.mubr.bf16.mxu0 %v7474_v36  ;;  %v6626_v43 = vld [vmem:[#allocation29 + $0xec] ss:$16 sps:$4 sm:$0xff]   ;;  %v6621_v45 = vld [vmem:[#allocation29 + $0xe0] ss:$16 sps:$4 sm:$0xff]  }
0x1707   :  { %3799 = vmatmul.mubr.bf16.vlgmr.msra.gmra.mrb[60].mxu1 %v3524_v44  ;;  %4065 = vmatpush1.bf16.msra.mxu0 %v6579_v0  ;;  %v6615_v44 = vld [vmem:[#allocation29 + $0xc0] ss:$16 sps:$4 sm:$0xff]  }
0x1708   :  { %4139 = vmatprep.mubr.bf16.mxu1 %v7474_v36  ;;  %4108 = vmatpush1.bf16.msra.mxu1 %v6582_v2  ;;  %v8183_v0 = vld [vmem:[#allocation31] ss:$16 sps:$4 sm:$0xff]  }
0x1709   :  { %4066 = vmatprep.subr.bf16.mxu0 %v6587_v38  ;;  %4109 = vmatprep.subr.bf16.mxu1 %v6590_v40  ;;  %v8189_v38 = vld [vmem:[#allocation31 + $0x2c] ss:$16 sps:$4 sm:$0xff]   ;;  %v8193_v40 = vld [vmem:[#allocation31 + $0x20] ss:$16 sps:$4 sm:$0xff]  }
0x170b   :  { %4067 = vmatpush1.bf16.msra.mxu0 %v6585_v47  ;;  %v8195_v47 = vld [vmem:[#allocation31 + $0x28] ss:$16 sps:$4 sm:$0xff]  }
0x170c   :  { %4110 = vmatpush1.bf16.msra.mxu1 %v6588_v8  ;;  %4068 = vmatprep.subr.bf16.mxu0 %v6593_v22  ;;  %v8199_v8 = vld [vmem:[#allocation31 + $0x44] ss:$16 sps:$4 sm:$0xff]   ;;  %v8227_v22 = vld [vmem:[#allocation31 + $0x8c] ss:$16 sps:$4 sm:$0xff]  }
0x170d   :  { %4111 = vmatprep.subr.bf16.mxu1 %v6596_v23  ;;  %v8231_v23 = vld [vmem:[#allocation31 + $0x80] ss:$16 sps:$4 sm:$0xff]  }
0x170f   :  { %4069 = vmatpush1.bf16.msra.mxu0 %v6591_v24  ;;  %v8233_v24 = vld [vmem:[#allocation31 + $0x88] ss:$16 sps:$4 sm:$0xff]  }
0x1710   :  { %4112 = vmatpush1.bf16.msra.mxu1 %v6594_v25  ;;  %4070 = vmatprep.subr.bf16.mxu0 %v6599_v26  ;;  %v8237_v25 = vld [vmem:[#allocation31 + $0xa4] ss:$16 sps:$4 sm:$0xff]   ;;  %v8239_v26 = vld [vmem:[#allocation31 + $0xac] ss:$16 sps:$4 sm:$0xff]  }
0x1711   :  { %4113 = vmatprep.subr.bf16.mxu1 %v6602_v27  ;;  %v8243_v27 = vld [vmem:[#allocation31 + $0xa0] ss:$16 sps:$4 sm:$0xff]  }
0x1713   :  { %4071 = vmatpush1.bf16.msra.mxu0 %v6597_v28  ;;  %v8245_v28 = vld [vmem:[#allocation31 + $0xa8] ss:$16 sps:$4 sm:$0xff]  }
0x1714   :  { %4114 = vmatpush1.bf16.msra.mxu1 %v6600_v35  ;;  %4072 = vmatprep.subr.bf16.mxu0 %v6605_v39  ;;  %v8249_v35 = vld [vmem:[#allocation31 + $0xc4] ss:$16 sps:$4 sm:$0xff]   ;;  %v8255_v39 = vld [vmem:[#allocation31 + $0xc0] ss:$16 sps:$4 sm:$0xff]  }
0x1715   :  { %4115 = vmatprep.subr.bf16.mxu1 %v6608_v7  ;;  %v8261_v7 = vld [vmem:[#allocation31 + $0xe4] ss:$16 sps:$4 sm:$0xff]  }
0x1717   :  { %4073 = vmatpush1.bf16.msra.mxu0 %v6603_v29  ;;  %v8251_v29 = vld [vmem:[#allocation31 + $0xcc] ss:$16 sps:$4 sm:$0xff]  }
0x1718   :  { %4116 = vmatpush1.bf16.msra.mxu1 %v6606_v3  ;;  %4074 = vmatprep.subr.bf16.mxu0 %v6611_v30  ;;  %v8257_v3 = vld [vmem:[#allocation31 + $0xc8] ss:$16 sps:$4 sm:$0xff]   ;;  %v8263_v30 = vld [vmem:[#allocation31 + $0xec] ss:$16 sps:$4 sm:$0xff]  }
0x1719   :  { %4117 = vmatprep.subr.bf16.mxu1 %v6614_v4  ;;  %v8267_v4 = vld [vmem:[#allocation31 + $0xe0] ss:$16 sps:$4 sm:$0xff]  }
0x171b   :  { %4075 = vmatpush1.bf16.msra.mxu0 %v6609_v9  ;;  %v8269_v9 = vld [vmem:[#allocation31 + $0xe8] ss:$16 sps:$4 sm:$0xff]  }
0x171c   :  { %4118 = vmatpush1.bf16.msra.mxu1 %v6612_v31  ;;  %4076 = vmatprep.subr.bf16.mxu0 %v6617_v33  ;;  %v3882_v31 = vld [vmem:[%s7636_s5] sm:$0xf]  ;;  %s7477_s5 = smov [#allocation34]  }
0x171d   :  { %4119 = vmatprep.subr.bf16.mxu1 %v6620_v41 }
0x171f   :  { %4077 = vmatpush1.bf16.msra.mxu0 %v6615_v44  ;;  %v3887_v44 = vrot.slane %v3882_v31, %v7850_v15 }
0x1720   :  { %4120 = vmatpush1.bf16.msra.mxu1 %v6618_v42  ;;  %4078 = vmatprep.subr.bf16.mxu0 %v6623_v34  ;;  %v3895_v42 = vrot.slane %v3882_v31, %v7853_v16 }
0x1721   :  { %4121 = vmatprep.subr.bf16.mxu1 %v6626_v43 }
0x1723   :  { %4079 = vmatpush1.bf16.msra.mxu0 %v6621_v45  ;;  %v3891_v45 = vrot.slane %v3882_v31, %v7857_v18 }
0x17d8   :  { %v5995_v6 = vpop.f32.mrb[36].mxu0 }
0x17d9   :  { %v5996_v20 = vpop.f32.mrb[37].mxu0 }
0x17da   :  { %v6017_v48 = vpop.f32.mrb[60].mxu1  ;;  %v5997_v51 = vadd.f32 %v5996_v20, %v5995_v6  ;;  %v5998_v14 = vpop.f32.mrb[38].mxu0  ;;  %v6624_v6 = vld [vmem:[#allocation29 + $0xe8] ss:$16 sps:$4 sm:$0xff]   ;;  %v8175_v20 = vld [vmem:[#allocation31 + $0xc] ss:$16 sps:$4 sm:$0xff]  }
0x17db   :  { %v6018_v46 = vpop.f32.mrb[61].mxu1  ;;  %v5999_v52 = vpop.f32.mrb[39].mxu0  ;;  %4122 = vmatpush1.bf16.msra.mxu1 %v6624_v6  ;;  %v3899_v6 = vrot.slane %v3882_v31, %v7860_v19 }
0x17dc   :  { %v3760_v53 = vadd.f32 %v5997_v51, %v5751_v55  ;;  %v6019_v56 = vadd.f32 %v6018_v46, %v6017_v48  ;;  %v6020_v49 = vpop.f32.mrb[62].mxu1  ;;  %v6000_v57 = vadd.f32 %v5999_v52, %v5998_v14  ;;  %4383 = vmatprep.subr.bf16.mxu1 %v8175_v20 }
0x17dd   :  { %v6021_v50 = vpop.f32.mrb[63].mxu1 }
0x17de   :  { %v3801_v58 = vadd.f32 %v6019_v56, %v3760_v53  ;;  %v3763_v60 = vadd.f32 %v6000_v57, %v5751_v55  ;;  %v6022_v59 = vadd.f32 %v6021_v50, %v6020_v49  ;;  %v8173_v55 = vld [vmem:[#allocation31 + $0x4] ss:$16 sps:$4 sm:$0xff]   ;;  %v5784_v49 = vld [vmem:[%s8625_s26] ss:$0 sm:$0xff] }
0x17df   :  { %4342 = vmatprep.subr.bf16.mxu0 %v8173_v55 }
0x17e0   :  { %v3804_v61 = vadd.f32 %v6022_v59, %v3763_v60  ;;  %v3807_v62 = vadd.f32 %v3801_v58, %v8109_v32  ;;  %v5785_v59 = vld [vmem:[%s8626_s21] ss:$0 sm:$0xff] }
0x17e2   :  { %3811 = vadd.xlane.f32.xlu0 %v3807_v62  ;;  %v3808_v63 = vadd.f32 %v3804_v61, %v8111_v54 }
0x17e4   :  { %3813 = vadd.xlane.f32.xlu1 %v3808_v63 }
0x186f   :  { %v3812_v32 = vpop.xlane.xlu0 %3811 }
0x1870   :  { %v3815_v10 = vmul.f32 0.0078125, %v3812_v32  ;;  %v8201_v32 = vld [vmem:[#allocation31 + $0x4c] ss:$16 sps:$4 sm:$0xff]  }
0x1871   :  { %v3814_v54 = vpop.xlane.xlu1 %3813 }
0x1872   :  { %v8165_v37 = vsub.f32 %v3807_v62, %v3815_v10  ;;  %v3816_v11 = vmul.f32 0.0078125, %v3814_v54  ;;  %v8207_v10 = vld [vmem:[#allocation31 + $0x40] ss:$16 sps:$4 sm:$0xff]   ;;  %v8209_v54 = vld [vmem:[#allocation31 + $0x48] ss:$16 sps:$4 sm:$0xff]  }
0x1874   :  { %v8167_v13 = vsub.f32 %v3808_v63, %v3816_v11  ;;  %v3819_v17 = vmul.f32 %v8165_v37, %v8165_v37  ;;  %v8215_v11 = vld [vmem:[#allocation31 + $0x6c] ss:$16 sps:$4 sm:$0xff]  }
0x1876   :  { %3821 = vadd.xlane.f32.xlu0 %v3819_v17  ;;  %v3820_v21 = vmul.f32 %v8167_v13, %v8167_v13  ;;  %v8221_v17 = vld [vmem:[#allocation31 + $0x68] ss:$16 sps:$4 sm:$0xff]  }
0x1878   :  { %3823 = vadd.xlane.f32.xlu1 %v3820_v21  ;;  %v8225_v21 = vld [vmem:[#allocation31 + $0x84] ss:$16 sps:$4 sm:$0xff]  }
0x1903   :  { %v3822_v48 = vpop.xlane.xlu0 %3821 }
0x1904   :  { %v3825_v51 = vmul.f32 0.0078125, %v3822_v48 }
0x1905   :  { %v3824_v14 = vpop.xlane.xlu1 %3823 }
0x1906   :  { %v3827_v46 = vadd.f32 1e-12, %v3825_v51  ;;  %v3826_v52 = vmul.f32 0.0078125, %v3824_v14 }
0x1908   :  { %6763 = vrsqrt.f32 %v3827_v46  ;;  %v3828_v53 = vadd.f32 1e-12, %v3826_v52 }
0x190a   :  { %6765 = vrsqrt.f32 %v3828_v53 }
0x1912   :  { %v6764_v56 = vpop.eup %6763 }
0x1913   :  { %v3831_v57 = vmul.f32 %v6764_v56, %v8165_v37  ;;  %v8213_v37 = vld [vmem:[#allocation31 + $0x64] ss:$16 sps:$4 sm:$0xff]  }
0x1914   :  { %v6766_v50 = vpop.eup %6765 }
0x1915   :  { %v3832_v58 = vmul.f32 %v6766_v50, %v8167_v13  ;;  %v3839_v60 = vmul.f32 %v5784_v49, %v3831_v57  ;;  %v8219_v13 = vld [vmem:[#allocation31 + $0x60] ss:$16 sps:$4 sm:$0xff]  }
0x1917   :  { %v3840_v61 = vmul.f32 %v5784_v49, %v3832_v58  ;;  %v3847_v62 = vadd.f32 %v5785_v59, %v3839_v60 }
0x1919   :  { %v3848_v63 = vadd.f32 %v5785_v59, %v3840_v61 }
0x191b   :  { %v3881_v2 = vpack.c.bf16 %v3848_v63, %v3847_v62 }
0x191d   :  { %4097 = vmatmul.mubr.bf16.vlgmr.msra.gmra.mrb[40].mxu0 %v3881_v2  ;;  %4140 = vmatmul.mubr.bf16.vlgmr.msra.gmra.mrb[64].mxu1 %v3881_v2 }
0x191e   :  { %4343 = vmatpush1.bf16.msra.mxu0 %v8183_v0  ;;  %4384 = vmatpush1.bf16.msra.mxu1 %v8185_v1 }
0x191f   :  { %4344 = vmatprep.subr.bf16.mxu0 %v8187_v5  ;;  %4385 = vmatprep.subr.bf16.mxu1 %v8189_v38 }
0x1920   :  { %4374 = vmatprep.mubr.bf16.mxu0 %v7474_v36  ;;  %4415 = vmatprep.mubr.bf16.mxu1 %v7474_v36 }
0x1922   :  { %4345 = vmatpush1.bf16.msra.mxu0 %v8193_v40  ;;  %4386 = vmatpush1.bf16.msra.mxu1 %v8195_v47 }
0x1923   :  { %4346 = vmatprep.subr.bf16.mxu0 %v8199_v8  ;;  %4387 = vmatprep.subr.bf16.mxu1 %v8201_v32 }
0x1926   :  { %4347 = vmatpush1.bf16.msra.mxu0 %v8207_v10  ;;  %4388 = vmatpush1.bf16.msra.mxu1 %v8209_v54 }
0x1927   :  { %4348 = vmatprep.subr.bf16.mxu0 %v8213_v37  ;;  %4389 = vmatprep.subr.bf16.mxu1 %v8215_v11 }
0x192a   :  { %4349 = vmatpush1.bf16.msra.mxu0 %v8219_v13  ;;  %4390 = vmatpush1.bf16.msra.mxu1 %v8221_v17 }
0x192b   :  { %4350 = vmatprep.subr.bf16.mxu0 %v8225_v21  ;;  %4391 = vmatprep.subr.bf16.mxu1 %v8227_v22 }
0x192e   :  { %4351 = vmatpush1.bf16.msra.mxu0 %v8231_v23  ;;  %4392 = vmatpush1.bf16.msra.mxu1 %v8233_v24 }
0x192f   :  { %4352 = vmatprep.subr.bf16.mxu0 %v8237_v25  ;;  %4393 = vmatprep.subr.bf16.mxu1 %v8239_v26 }
0x1932   :  { %4353 = vmatpush1.bf16.msra.mxu0 %v8243_v27  ;;  %4394 = vmatpush1.bf16.msra.mxu1 %v8245_v28 }
0x1933   :  { %4354 = vmatprep.subr.bf16.mxu0 %v8249_v35  ;;  %4395 = vmatprep.subr.bf16.mxu1 %v8251_v29 }
0x1936   :  { %4355 = vmatpush1.bf16.msra.mxu0 %v8255_v39  ;;  %4396 = vmatpush1.bf16.msra.mxu1 %v8257_v3 }
0x1937   :  { %4356 = vmatprep.subr.bf16.mxu0 %v8261_v7  ;;  %4397 = vmatprep.subr.bf16.mxu1 %v8263_v30 }
0x193a   :  { %4357 = vmatpush1.bf16.msra.mxu0 %v8267_v4  ;;  %4398 = vmatpush1.bf16.msra.mxu1 %v8269_v9 }
0x193b   :  { %4453 = vmatprep.subr.bf16.mxu0 %v8173_v55  ;;  %4494 = vmatprep.subr.bf16.mxu1 %v8175_v20 }
0x193d   :  { %4375 = vmatmul.mubr.bf16.vlgmr.msra.gmra.mrb[44].mxu0 %v7474_v36  ;;  %4416 = vmatmul.mubr.bf16.vlgmr.msra.gmra.mrb[68].mxu1 %v7474_v36 }
0x193e   :  { %4454 = vmatpush1.bf16.msra.mxu0 %v8183_v0  ;;  %4495 = vmatpush1.bf16.msra.mxu1 %v8185_v1 }
0x193f   :  { %4455 = vmatprep.subr.bf16.mxu0 %v8187_v5  ;;  %4496 = vmatprep.subr.bf16.mxu1 %v8189_v38 }
0x1940   :  { %4485 = vmatprep.mubr.bf16.mxu0 %v7474_v36  ;;  %4526 = vmatprep.mubr.bf16.mxu1 %v7474_v36 }
0x1942   :  { %4456 = vmatpush1.bf16.msra.mxu0 %v8193_v40  ;;  %4497 = vmatpush1.bf16.msra.mxu1 %v8195_v47 }
0x1943   :  { %4457 = vmatprep.subr.bf16.mxu0 %v8199_v8  ;;  %4498 = vmatprep.subr.bf16.mxu1 %v8201_v32 }
0x1946   :  { %4458 = vmatpush1.bf16.msra.mxu0 %v8207_v10  ;;  %4499 = vmatpush1.bf16.msra.mxu1 %v8209_v54 }
0x1947   :  { %4459 = vmatprep.subr.bf16.mxu0 %v8213_v37  ;;  %4500 = vmatprep.subr.bf16.mxu1 %v8215_v11 }
0x194a   :  { %4460 = vmatpush1.bf16.msra.mxu0 %v8219_v13  ;;  %4501 = vmatpush1.bf16.msra.mxu1 %v8221_v17 }
0x194b   :  { %4461 = vmatprep.subr.bf16.mxu0 %v8225_v21  ;;  %4502 = vmatprep.subr.bf16.mxu1 %v8227_v22 }
0x194e   :  { %4462 = vmatpush1.bf16.msra.mxu0 %v8231_v23  ;;  %4503 = vmatpush1.bf16.msra.mxu1 %v8233_v24 }
0x194f   :  { %4463 = vmatprep.subr.bf16.mxu0 %v8237_v25  ;;  %4504 = vmatprep.subr.bf16.mxu1 %v8239_v26 }
0x1952   :  { %4464 = vmatpush1.bf16.msra.mxu0 %v8243_v27  ;;  %4505 = vmatpush1.bf16.msra.mxu1 %v8245_v28 }
0x1953   :  { %4465 = vmatprep.subr.bf16.mxu0 %v8249_v35  ;;  %4506 = vmatprep.subr.bf16.mxu1 %v8251_v29 }
0x1956   :  { %4466 = vmatpush1.bf16.msra.mxu0 %v8255_v39  ;;  %4507 = vmatpush1.bf16.msra.mxu1 %v8257_v3 }
0x1957   :  { %4467 = vmatprep.subr.bf16.mxu0 %v8261_v7  ;;  %4508 = vmatprep.subr.bf16.mxu1 %v8263_v30 }
0x195a   :  { %4468 = vmatpush1.bf16.msra.mxu0 %v8267_v4  ;;  %4509 = vmatpush1.bf16.msra.mxu1 %v8269_v9 }
0x195b   :  { %4582 = vmatprep.subr.bf16.mxu0 %v8173_v55  ;;  %4623 = vmatprep.subr.bf16.mxu1 %v8175_v20 }
0x19f0   :  { %v4098_v33 = vpop.f32.mrb[40].mxu0  ;;  %v4141_v41 = vpop.f32.mrb[64].mxu1 }
0x19f1   :  { %v4100_v34 = vpop.f32.mrb[41].mxu0  ;;  %v4143_v43 = vpop.f32.mrb[65].mxu1  ;;  %v8326_v15 = vadd.f32 %v4098_v33, %v3887_v44 }
0x19f2   :  { %v4102_v48 = vpop.f32.mrb[42].mxu0  ;;  %v4145_v51 = vpop.f32.mrb[66].mxu1  ;;  %v8328_v16 = vadd.f32 %v4100_v34, %v3891_v45 }
0x19f3   :  { %v8318_v14 = vadd.f32 %v4102_v48, %v3887_v44  ;;  %v8320_v46 = vadd.f32 %v4145_v51, %v3895_v42  ;;  %v4104_v52 = vpop.f32.mrb[43].mxu0  ;;  %v4147_v53 = vpop.f32.mrb[67].mxu1  ;;  %v8332_v48 = vadd.f32 %v4143_v43, %v3899_v6  ;;  %v8335_v44 = vadd.f32 %v4141_v41, %v3895_v42 }
0x19f4   :  { %v8322_v56 = vadd.f32 %v4104_v52, %v3891_v45  ;;  %v8324_v49 = vadd.f32 %v4147_v53, %v3899_v6 }
0x1a10   :  { %v4376_v57 = vpop.f32.mrb[44].mxu0  ;;  %v4417_v18 = vpop.f32.mrb[68].mxu1 }
0x1a11   :  { %v4424_v19 = vadd.f32 %v4376_v57, %v8326_v15  ;;  %v4378_v50 = vpop.f32.mrb[45].mxu0  ;;  %v4419_v58 = vpop.f32.mrb[69].mxu1  ;;  %v4426_v45 = vadd.f32 %v4417_v18, %v8335_v44 }
0x1a12   :  { %v4425_v60 = vadd.f32 %v4378_v50, %v8328_v16  ;;  %v4380_v59 = vpop.f32.mrb[46].mxu0  ;;  %v4421_v61 = vpop.f32.mrb[70].mxu1  ;;  %v4427_v33 = vadd.f32 %v4419_v58, %v8332_v48 }
0x1a13   :  { %v5850_v62 = vmul.f32 -1.442695, %v4424_v19  ;;  %v4381_v63 = vpop.f32.mrb[47].mxu0  ;;  %v4422_v2 = vpop.f32.mrb[71].mxu1 }
0x1a14   :  { %v5851_v31 = vmul.f32 -1.442695, %v4425_v60  ;;  %v5852_v34 = vmul.f32 -1.442695, %v4427_v33 }
0x1a15   :  { %6767 = vpow2.f32 %v5850_v62 }
0x1a16   :  { %6769 = vpow2.f32 %v5851_v31 }
0x1a17   :  { %6771 = vpow2.f32 %v5852_v34 }
0x1a18   :  { %6773 = vtanh.f32 %v4426_v45 }
0x1a1f   :  { %v6768_v51 = vpop.eup %6767 }
0x1a20   :  { %v6770_v52 = vpop.eup %6769  ;;  %v4431_v53 = vadd.f32 1.0, %v6768_v51 }
0x1a21   :  { %v4437_v57 = vadd.f32 1.0, %v6770_v52  ;;  %v6772_v19 = vpop.eup %6771 }
0x1a22   :  { %6775 = vrcp.f32 %v4431_v53  ;;  %v6774_v50 = vpop.eup %6773  ;;  %v4444_v59 = vadd.f32 1.0, %v6772_v19 }
0x1a23   :  { %6777 = vrcp.f32 %v4437_v57 }
0x1a24   :  { %6779 = vrcp.f32 %v4444_v59 }
0x1a2c   :  { %v6776_v43 = vpop.eup %6775 }
0x1a2d   :  { %v6778_v6 = vpop.eup %6777  ;;  %v4448_v60 = vmul.f32 %v6776_v43, %v6774_v50 }
0x1a2e   :  { %v4447_v58 = vmul.f32 0.0, %v6778_v6  ;;  %v6780_v42 = vpop.eup %6779 }
0x1a30   :  { %v8338_v41 = vadd.f32 %v4448_v60, %v4447_v58 }
0x1a32   :  { %6781 = vtanh.f32 %v8338_v41 }
0x1a3c   :  { %v6782_v18 = vpop.eup %6781 }
0x1a3d   :  { %v4451_v61 = vmul.f32 %v6782_v18, %v6780_v42 }
0x1a3f   :  { %v4452_v62 = vpack.c.bf16 %v4451_v61, %v4451_v61 }
0x1a41   :  { %4486 = vmatmul.mubr.bf16.vlgmr.msra.gmra.mrb[48].mxu0 %v4452_v62  ;;  %4527 = vmatmul.mubr.bf16.vlgmr.msra.gmra.mrb[72].mxu1 %v4452_v62 }
0x1a42   :  { %4583 = vmatpush1.bf16.msra.mxu0 %v8183_v0  ;;  %4624 = vmatpush1.bf16.msra.mxu1 %v8185_v1 }
0x1a43   :  { %4584 = vmatprep.subr.bf16.mxu0 %v8187_v5  ;;  %4625 = vmatprep.subr.bf16.mxu1 %v8189_v38 }
0x1a44   :  { %4614 = vmatprep.mubr.bf16.mxu0 %v7474_v36  ;;  %4655 = vmatprep.mubr.bf16.mxu1 %v7474_v36 }
0x1a46   :  { %4585 = vmatpush1.bf16.msra.mxu0 %v8193_v40  ;;  %4626 = vmatpush1.bf16.msra.mxu1 %v8195_v47 }
0x1a47   :  { %4586 = vmatprep.subr.bf16.mxu0 %v8199_v8  ;;  %4627 = vmatprep.subr.bf16.mxu1 %v8201_v32 }
0x1a4a   :  { %4587 = vmatpush1.bf16.msra.mxu0 %v8207_v10  ;;  %4628 = vmatpush1.bf16.msra.mxu1 %v8209_v54 }
0x1a4b   :  { %4588 = vmatprep.subr.bf16.mxu0 %v8213_v37  ;;  %4629 = vmatprep.subr.bf16.mxu1 %v8215_v11 }
0x1a4e   :  { %4589 = vmatpush1.bf16.msra.mxu0 %v8219_v13  ;;  %4630 = vmatpush1.bf16.msra.mxu1 %v8221_v17 }
0x1a4f   :  { %4590 = vmatprep.subr.bf16.mxu0 %v8225_v21  ;;  %4631 = vmatprep.subr.bf16.mxu1 %v8227_v22 }
0x1a52   :  { %4591 = vmatpush1.bf16.msra.mxu0 %v8231_v23  ;;  %4632 = vmatpush1.bf16.msra.mxu1 %v8233_v24 }
0x1a53   :  { %4592 = vmatprep.subr.bf16.mxu0 %v8237_v25  ;;  %4633 = vmatprep.subr.bf16.mxu1 %v8239_v26 }
0x1a56   :  { %4593 = vmatpush1.bf16.msra.mxu0 %v8243_v27  ;;  %4634 = vmatpush1.bf16.msra.mxu1 %v8245_v28 }
0x1a57   :  { %4594 = vmatprep.subr.bf16.mxu0 %v8249_v35  ;;  %4635 = vmatprep.subr.bf16.mxu1 %v8251_v29 }
0x1a5a   :  { %4595 = vmatpush1.bf16.msra.mxu0 %v8255_v39  ;;  %4636 = vmatpush1.bf16.msra.mxu1 %v8257_v3 }
0x1a5b   :  { %4596 = vmatprep.subr.bf16.mxu0 %v8261_v7  ;;  %4637 = vmatprep.subr.bf16.mxu1 %v8263_v30 }
0x1a5e   :  { %4597 = vmatpush1.bf16.msra.mxu0 %v8267_v4  ;;  %4638 = vmatpush1.bf16.msra.mxu1 %v8269_v9 }
0x1a5f   :  { %4711 = vmatprep.subr.bf16.mxu0 %v8173_v55  ;;  %4752 = vmatprep.subr.bf16.mxu1 %v8175_v20 }
0x1b14   :  { %v4487_v63 = vpop.f32.mrb[48].mxu0  ;;  %v4528_v2 = vpop.f32.mrb[72].mxu1 }
0x1b15   :  { %v4539_v31 = vrot.slane %v4487_v63, 6  ;;  %v4489_v33 = vpop.f32.mrb[49].mxu0  ;;  %v4530_v34 = vpop.f32.mrb[73].mxu1  ;;  %v4541_v58 = vrot.slane %v4528_v2, 6 }
0x1b16   :  { %v4540_v45 = vrot.slane %v4489_v33, 6  ;;  %v4491_v51 = vpop.f32.mrb[50].mxu0  ;;  %v4532_v52 = vpop.f32.mrb[74].mxu1  ;;  %v4542_v60 = vrot.slane %v4530_v34, 6  ;;  %v4571_v34 = vrot.slane %v8338_v41, 6 }
0x1b17   :  { %v4547_v53 = vadd.f32 %v4539_v31, %v8326_v15  ;;  %v4492_v57 = vpop.f32.mrb[51].mxu0  ;;  %v4533_v19 = vpop.f32.mrb[75].mxu1  ;;  %v4549_v18 = vadd.f32 %v4541_v58, %v8335_v44 }
0x1b18   :  { %v4548_v50 = vadd.f32 %v4540_v45, %v8328_v16  ;;  %v4550_v59 = vadd.f32 %v4542_v60, %v8332_v48 }
0x1b19   :  { %v5853_v43 = vmul.f32 -1.442695, %v4547_v53 }
0x1b1a   :  { %v5854_v6 = vmul.f32 -1.442695, %v4548_v50  ;;  %v5855_v42 = vmul.f32 -1.442695, %v4550_v59 }
0x1b1b   :  { %6783 = vpow2.f32 %v5853_v43 }
0x1b1c   :  { %6785 = vpow2.f32 %v5854_v6 }
0x1b1d   :  { %6787 = vpow2.f32 %v5855_v42 }
0x1b1e   :  { %6789 = vtanh.f32 %v4549_v18 }
0x1b25   :  { %v6784_v61 = vpop.eup %6783 }
0x1b26   :  { %v6786_v62 = vpop.eup %6785  ;;  %v4554_v63 = vadd.f32 1.0, %v6784_v61 }
0x1b27   :  { %v4560_v31 = vadd.f32 1.0, %v6786_v62  ;;  %v6788_v33 = vpop.eup %6787 }
0x1b28   :  { %6791 = vrcp.f32 %v4554_v63  ;;  %v6790_v45 = vpop.eup %6789  ;;  %v4567_v57 = vadd.f32 1.0, %v6788_v33 }
0x1b29   :  { %6793 = vrcp.f32 %v4560_v31 }
0x1b2a   :  { %6795 = vrcp.f32 %v4567_v57 }
0x1b32   :  { %v6792_v51 = vpop.eup %6791 }
0x1b33   :  { %v6794_v52 = vpop.eup %6793  ;;  %v4574_v53 = vmul.f32 %v6792_v51, %v6790_v45 }
0x1b34   :  { %v4573_v2 = vmul.f32 %v6794_v52, %v4571_v34  ;;  %v6796_v50 = vpop.eup %6795 }
0x1b36   :  { %v8380_v19 = vadd.f32 %v4574_v53, %v4573_v2 }
0x1b38   :  { %6797 = vtanh.f32 %v8380_v19 }
0x1b42   :  { %v6798_v43 = vpop.eup %6797 }
0x1b43   :  { %v4577_v6 = vmul.f32 %v6798_v43, %v6796_v50 }
0x1b45   :  { %v4578_v60 = vpack.c.bf16 %v4577_v6, %v4577_v6 }
0x1b47   :  { %v4580_v59 = vrot.slane %v4578_v60, 1 }
0x1b49   :  { %4615 = vmatmul.mubr.bf16.vlgmr.msra.gmra.mrb[52].mxu0 %v4580_v59  ;;  %4656 = vmatmul.mubr.bf16.vlgmr.msra.gmra.mrb[76].mxu1 %v4580_v59 }
0x1b4a   :  { %4712 = vmatpush1.bf16.msra.mxu0 %v8183_v0  ;;  %4753 = vmatpush1.bf16.msra.mxu1 %v8185_v1 }
0x1b4b   :  { %4713 = vmatprep.subr.bf16.mxu0 %v8187_v5  ;;  %4754 = vmatprep.subr.bf16.mxu1 %v8189_v38 }
0x1b4c   :  { %4743 = vmatprep.mubr.bf16.mxu0 %v7474_v36  ;;  %4784 = vmatprep.mubr.bf16.mxu1 %v7474_v36 }
0x1b4e   :  { %4714 = vmatpush1.bf16.msra.mxu0 %v8193_v40  ;;  %4755 = vmatpush1.bf16.msra.mxu1 %v8195_v47 }
0x1b4f   :  { %4715 = vmatprep.subr.bf16.mxu0 %v8199_v8  ;;  %4756 = vmatprep.subr.bf16.mxu1 %v8201_v32 }
0x1b52   :  { %4716 = vmatpush1.bf16.msra.mxu0 %v8207_v10  ;;  %4757 = vmatpush1.bf16.msra.mxu1 %v8209_v54 }
0x1b53   :  { %4717 = vmatprep.subr.bf16.mxu0 %v8213_v37  ;;  %4758 = vmatprep.subr.bf16.mxu1 %v8215_v11 }
0x1b56   :  { %4718 = vmatpush1.bf16.msra.mxu0 %v8219_v13  ;;  %4759 = vmatpush1.bf16.msra.mxu1 %v8221_v17 }
0x1b57   :  { %4719 = vmatprep.subr.bf16.mxu0 %v8225_v21  ;;  %4760 = vmatprep.subr.bf16.mxu1 %v8227_v22 }
0x1b5a   :  { %4720 = vmatpush1.bf16.msra.mxu0 %v8231_v23  ;;  %4761 = vmatpush1.bf16.msra.mxu1 %v8233_v24 }
0x1b5b   :  { %4721 = vmatprep.subr.bf16.mxu0 %v8237_v25  ;;  %4762 = vmatprep.subr.bf16.mxu1 %v8239_v26 }
0x1b5e   :  { %4722 = vmatpush1.bf16.msra.mxu0 %v8243_v27  ;;  %4763 = vmatpush1.bf16.msra.mxu1 %v8245_v28 }
0x1b5f   :  { %4723 = vmatprep.subr.bf16.mxu0 %v8249_v35  ;;  %4764 = vmatprep.subr.bf16.mxu1 %v8251_v29 }
0x1b62   :  { %4724 = vmatpush1.bf16.msra.mxu0 %v8255_v39  ;;  %4765 = vmatpush1.bf16.msra.mxu1 %v8257_v3 }
0x1b63   :  { %4725 = vmatprep.subr.bf16.mxu0 %v8261_v7  ;;  %4766 = vmatprep.subr.bf16.mxu1 %v8263_v30 }
0x1b66   :  { %4726 = vmatpush1.bf16.msra.mxu0 %v8267_v4  ;;  %4767 = vmatpush1.bf16.msra.mxu1 %v8269_v9 }
0x1b67   :  { %4840 = vmatprep.subr.bf16.mxu0 %v8173_v55  ;;  %4881 = vmatprep.subr.bf16.mxu1 %v8175_v20 }
0x1c1c   :  { %v4616_v41 = vpop.f32.mrb[52].mxu0  ;;  %v4657_v58 = vpop.f32.mrb[76].mxu1 }
0x1c1d   :  { %v4668_v42 = vrot.slane %v4616_v41, 4  ;;  %v4618_v18 = vpop.f32.mrb[53].mxu0  ;;  %v4659_v61 = vpop.f32.mrb[77].mxu1  ;;  %v4670_v50 = vrot.slane %v4657_v58, 4 }
0x1c1e   :  { %v4669_v62 = vrot.slane %v4618_v18, 4  ;;  %v4620_v63 = vpop.f32.mrb[54].mxu0  ;;  %v4661_v31 = vpop.f32.mrb[78].mxu1  ;;  %v4671_v57 = vrot.slane %v4659_v61, 4  ;;  %v4700_v61 = vrot.slane %v8380_v19, 6 }
0x1c1f   :  { %v4676_v33 = vadd.f32 %v4668_v42, %v8326_v15  ;;  %v4621_v45 = vpop.f32.mrb[55].mxu0  ;;  %v4662_v51 = vpop.f32.mrb[79].mxu1  ;;  %v4678_v6 = vadd.f32 %v4670_v50, %v8335_v44 }
0x1c20   :  { %v4677_v34 = vadd.f32 %v4669_v62, %v8328_v16  ;;  %v4679_v2 = vadd.f32 %v4671_v57, %v8332_v48 }
0x1c21   :  { %v5856_v52 = vmul.f32 -1.442695, %v4676_v33 }
0x1c22   :  { %v5857_v53 = vmul.f32 -1.442695, %v4677_v34  ;;  %v5858_v43 = vmul.f32 -1.442695, %v4679_v2 }
0x1c23   :  { %6799 = vpow2.f32 %v5856_v52 }
0x1c24   :  { %6801 = vpow2.f32 %v5857_v53 }
0x1c25   :  { %6803 = vpow2.f32 %v5858_v43 }
0x1c26   :  { %6805 = vtanh.f32 %v4678_v6 }
0x1c2d   :  { %v6800_v60 = vpop.eup %6799 }
0x1c2e   :  { %v6802_v59 = vpop.eup %6801  ;;  %v4683_v41 = vadd.f32 1.0, %v6800_v60 }
0x1c2f   :  { %v4689_v42 = vadd.f32 1.0, %v6802_v59  ;;  %v6804_v18 = vpop.eup %6803 }
0x1c30   :  { %6807 = vrcp.f32 %v4683_v41  ;;  %v6806_v62 = vpop.eup %6805  ;;  %v4696_v45 = vadd.f32 1.0, %v6804_v18 }
0x1c31   :  { %6809 = vrcp.f32 %v4689_v42 }
0x1c32   :  { %6811 = vrcp.f32 %v4696_v45 }
0x1c3a   :  { %v6808_v63 = vpop.eup %6807 }
0x1c3b   :  { %v6810_v31 = vpop.eup %6809  ;;  %v4703_v33 = vmul.f32 %v6808_v63, %v6806_v62 }
0x1c3c   :  { %v4702_v58 = vmul.f32 %v6810_v31, %v4700_v61  ;;  %v6812_v34 = vpop.eup %6811 }
0x1c3e   :  { %v8422_v51 = vadd.f32 %v4703_v33, %v4702_v58 }
0x1c40   :  { %6813 = vtanh.f32 %v8422_v51 }
0x1c4a   :  { %v6814_v52 = vpop.eup %6813 }
0x1c4b   :  { %v4706_v53 = vmul.f32 %v6814_v52, %v6812_v34 }
0x1c4d   :  { %v4707_v57 = vpack.c.bf16 %v4706_v53, %v4706_v53 }
0x1c4f   :  { %v4709_v2 = vrot.slane %v4707_v57, 2 }
0x1c51   :  { %4744 = vmatmul.mubr.bf16.vlgmr.msra.gmra.mrb[56].mxu0 %v4709_v2  ;;  %4785 = vmatmul.mubr.bf16.vlgmr.msra.gmra.mrb[80].mxu1 %v4709_v2 }
0x1c52   :  { %4841 = vmatpush1.bf16.msra.mxu0 %v8183_v0  ;;  %4882 = vmatpush1.bf16.msra.mxu1 %v8185_v1 }
0x1c53   :  { %4842 = vmatprep.subr.bf16.mxu0 %v8187_v5  ;;  %4883 = vmatprep.subr.bf16.mxu1 %v8189_v38 }
0x1c54   :  { %4872 = vmatprep.mubr.bf16.mxu0 %v7474_v36  ;;  %4913 = vmatprep.mubr.bf16.mxu1 %v7474_v36 }
0x1c56   :  { %4843 = vmatpush1.bf16.msra.mxu0 %v8193_v40  ;;  %4884 = vmatpush1.bf16.msra.mxu1 %v8195_v47 }
0x1c57   :  { %4844 = vmatprep.subr.bf16.mxu0 %v8199_v8  ;;  %4885 = vmatprep.subr.bf16.mxu1 %v8201_v32 }
0x1c5a   :  { %4845 = vmatpush1.bf16.msra.mxu0 %v8207_v10  ;;  %4886 = vmatpush1.bf16.msra.mxu1 %v8209_v54 }
0x1c5b   :  { %4846 = vmatprep.subr.bf16.mxu0 %v8213_v37  ;;  %4887 = vmatprep.subr.bf16.mxu1 %v8215_v11 }
0x1c5e   :  { %4847 = vmatpush1.bf16.msra.mxu0 %v8219_v13  ;;  %4888 = vmatpush1.bf16.msra.mxu1 %v8221_v17 }
0x1c5f   :  { %4848 = vmatprep.subr.bf16.mxu0 %v8225_v21  ;;  %4889 = vmatprep.subr.bf16.mxu1 %v8227_v22 }
0x1c62   :  { %4849 = vmatpush1.bf16.msra.mxu0 %v8231_v23  ;;  %4890 = vmatpush1.bf16.msra.mxu1 %v8233_v24 }
0x1c63   :  { %4850 = vmatprep.subr.bf16.mxu0 %v8237_v25  ;;  %4891 = vmatprep.subr.bf16.mxu1 %v8239_v26 }
0x1c66   :  { %4851 = vmatpush1.bf16.msra.mxu0 %v8243_v27  ;;  %4892 = vmatpush1.bf16.msra.mxu1 %v8245_v28 }
0x1c67   :  { %4852 = vmatprep.subr.bf16.mxu0 %v8249_v35  ;;  %4893 = vmatprep.subr.bf16.mxu1 %v8251_v29 }
0x1c6a   :  { %4853 = vmatpush1.bf16.msra.mxu0 %v8255_v39  ;;  %4894 = vmatpush1.bf16.msra.mxu1 %v8257_v3 }
0x1c6b   :  { %4854 = vmatprep.subr.bf16.mxu0 %v8261_v7  ;;  %4895 = vmatprep.subr.bf16.mxu1 %v8263_v30 }
0x1c6e   :  { %4855 = vmatpush1.bf16.msra.mxu0 %v8267_v4  ;;  %4896 = vmatpush1.bf16.msra.mxu1 %v8269_v9 }
0x1c6f   :  { %4954 = vmatprep.subr.bf16.mxu0 %v8173_v55  ;;  %4995 = vmatprep.subr.bf16.mxu1 %v8175_v20 }
0x1d24   :  { %v4745_v19 = vpop.f32.mrb[56].mxu0  ;;  %v4786_v50 = vpop.f32.mrb[80].mxu1 }
0x1d25   :  { %v4797_v43 = vrot.slane %v4745_v19, 2  ;;  %v4747_v6 = vpop.f32.mrb[57].mxu0  ;;  %v4788_v60 = vpop.f32.mrb[81].mxu1  ;;  %v4799_v34 = vrot.slane %v4786_v50, 2 }
0x1d26   :  { %v4798_v59 = vrot.slane %v4747_v6, 2  ;;  %v4749_v41 = vpop.f32.mrb[58].mxu0  ;;  %v4790_v42 = vpop.f32.mrb[82].mxu1  ;;  %v4800_v45 = vrot.slane %v4788_v60, 2  ;;  %v4829_v60 = vrot.slane %v8422_v51, 6 }
0x1d27   :  { %v4805_v18 = vadd.f32 %v4797_v43, %v8326_v15  ;;  %v4750_v62 = vpop.f32.mrb[59].mxu0  ;;  %v4791_v63 = vpop.f32.mrb[83].mxu1  ;;  %v4807_v53 = vadd.f32 %v4799_v34, %v8335_v44 }
0x1d28   :  { %v4806_v61 = vadd.f32 %v4798_v59, %v8328_v16  ;;  %v4808_v58 = vadd.f32 %v4800_v45, %v8332_v48 }
0x1d29   :  { %v5859_v31 = vmul.f32 -1.442695, %v4805_v18 }
0x1d2a   :  { %v5860_v33 = vmul.f32 -1.442695, %v4806_v61  ;;  %v5861_v52 = vmul.f32 -1.442695, %v4808_v58 }
0x1d2b   :  { %6815 = vpow2.f32 %v5859_v31 }
0x1d2c   :  { %6817 = vpow2.f32 %v5860_v33 }
0x1d2d   :  { %6819 = vpow2.f32 %v5861_v52 }
0x1d2e   :  { %6821 = vtanh.f32 %v4807_v53 }
0x1d35   :  { %v6816_v57 = vpop.eup %6815 }
0x1d36   :  { %v6818_v2 = vpop.eup %6817  ;;  %v4812_v19 = vadd.f32 1.0, %v6816_v57 }
0x1d37   :  { %v4818_v15 = vadd.f32 1.0, %v6818_v2  ;;  %v6820_v16 = vpop.eup %6819 }
0x1d38   :  { %6823 = vrcp.f32 %v4812_v19  ;;  %v6822_v43 = vpop.eup %6821  ;;  %v4825_v48 = vadd.f32 1.0, %v6820_v16 }
0x1d39   :  { %6825 = vrcp.f32 %v4818_v15 }
0x1d3a   :  { %6827 = vrcp.f32 %v4825_v48 }
0x1d42   :  { %v6824_v6 = vpop.eup %6823 }
0x1d43   :  { %v6826_v59 = vpop.eup %6825  ;;  %v4832_v41 = vmul.f32 %v6824_v6, %v6822_v43 }
0x1d44   :  { %v4831_v50 = vmul.f32 %v6826_v59, %v4829_v60  ;;  %v6828_v44 = vpop.eup %6827 }
0x1d46   :  { %v8464_v42 = vadd.f32 %v4832_v41, %v4831_v50 }
0x1d48   :  { %6829 = vtanh.f32 %v8464_v42 }
0x1d52   :  { %v6830_v18 = vpop.eup %6829 }
0x1d53   :  { %v4835_v62 = vmul.f32 %v6830_v18, %v6828_v44  ;;  %v4946_v44 = vrot.slane %v8464_v42, 6 }
0x1d55   :  { %v4836_v63 = vpack.c.bf16 %v4835_v62, %v4835_v62 }
0x1d57   :  { %v4838_v61 = vrot.slane %v4836_v63, 3 }
0x1d59   :  { %4873 = vmatmul.mubr.bf16.vlgmr.msra.gmra.mrb[60].mxu0 %v4838_v61  ;;  %4914 = vmatmul.mubr.bf16.vlgmr.msra.gmra.mrb[84].mxu1 %v4838_v61 }
0x1d5a   :  { %4955 = vmatpush1.bf16.msra.mxu0 %v8183_v0  ;;  %4996 = vmatpush1.bf16.msra.mxu1 %v8185_v1 }
0x1d5b   :  { %4956 = vmatprep.subr.bf16.mxu0 %v8187_v5  ;;  %4997 = vmatprep.subr.bf16.mxu1 %v8189_v38 }
0x1d5c   :  { %4986 = vmatprep.mubr.bf16.mxu0 %v7474_v36  ;;  %5027 = vmatprep.mubr.bf16.mxu1 %v7474_v36 }
0x1d5e   :  { %4957 = vmatpush1.bf16.msra.mxu0 %v8193_v40  ;;  %4998 = vmatpush1.bf16.msra.mxu1 %v8195_v47 }
0x1d5f   :  { %4958 = vmatprep.subr.bf16.mxu0 %v8199_v8  ;;  %4999 = vmatprep.subr.bf16.mxu1 %v8201_v32 }
0x1d62   :  { %4959 = vmatpush1.bf16.msra.mxu0 %v8207_v10  ;;  %5000 = vmatpush1.bf16.msra.mxu1 %v8209_v54 }
0x1d63   :  { %4960 = vmatprep.subr.bf16.mxu0 %v8213_v37  ;;  %5001 = vmatprep.subr.bf16.mxu1 %v8215_v11 }
0x1d66   :  { %4961 = vmatpush1.bf16.msra.mxu0 %v8219_v13  ;;  %5002 = vmatpush1.bf16.msra.mxu1 %v8221_v17 }
0x1d67   :  { %4962 = vmatprep.subr.bf16.mxu0 %v8225_v21  ;;  %5003 = vmatprep.subr.bf16.mxu1 %v8227_v22 }
0x1d6a   :  { %4963 = vmatpush1.bf16.msra.mxu0 %v8231_v23  ;;  %5004 = vmatpush1.bf16.msra.mxu1 %v8233_v24 }
0x1d6b   :  { %4964 = vmatprep.subr.bf16.mxu0 %v8237_v25  ;;  %5005 = vmatprep.subr.bf16.mxu1 %v8239_v26 }
0x1d6e   :  { %4965 = vmatpush1.bf16.msra.mxu0 %v8243_v27  ;;  %5006 = vmatpush1.bf16.msra.mxu1 %v8245_v28 }
0x1d6f   :  { %4966 = vmatprep.subr.bf16.mxu0 %v8249_v35  ;;  %5007 = vmatprep.subr.bf16.mxu1 %v8251_v29 }
0x1d72   :  { %4967 = vmatpush1.bf16.msra.mxu0 %v8255_v39  ;;  %5008 = vmatpush1.bf16.msra.mxu1 %v8257_v3 }
0x1d73   :  { %4968 = vmatprep.subr.bf16.mxu0 %v8261_v7  ;;  %5009 = vmatprep.subr.bf16.mxu1 %v8263_v30 }
0x1d76   :  { %4969 = vmatpush1.bf16.msra.mxu0 %v8267_v4  ;;  %5010 = vmatpush1.bf16.msra.mxu1 %v8269_v9 }
0x1d77   :  { %5083 = vmatprep.subr.bf16.mxu0 %v8173_v55  ;;  %5124 = vmatprep.subr.bf16.mxu1 %v8175_v20 }
0x1e2c   :  { %v4874_v51 = vpop.f32.mrb[60].mxu0  ;;  %v4915_v31 = vpop.f32.mrb[84].mxu1 }
0x1e2d   :  { %v4922_v33 = vadd.f32 %v4874_v51, %v8318_v14  ;;  %v4876_v45 = vpop.f32.mrb[61].mxu0  ;;  %v4917_v58 = vpop.f32.mrb[85].mxu1  ;;  %v4924_v20 = vadd.f32 %v4915_v31, %v8320_v46 }
0x1e2e   :  { %v4923_v34 = vadd.f32 %v4876_v45, %v8322_v56  ;;  %v4878_v52 = vpop.f32.mrb[62].mxu0  ;;  %v4919_v53 = vpop.f32.mrb[86].mxu1  ;;  %v4925_v55 = vadd.f32 %v4917_v58, %v8324_v49 }
0x1e2f   :  { %v5862_v57 = vmul.f32 -1.442695, %v4922_v33  ;;  %v4879_v2 = vpop.f32.mrb[63].mxu0  ;;  %v4920_v19 = vpop.f32.mrb[87].mxu1 }
0x1e30   :  { %v5863_v15 = vmul.f32 -1.442695, %v4923_v34  ;;  %v5864_v16 = vmul.f32 -1.442695, %v4925_v55 }
0x1e31   :  { %6831 = vpow2.f32 %v5862_v57 }
0x1e32   :  { %6833 = vpow2.f32 %v5863_v15 }
0x1e33   :  { %6835 = vpow2.f32 %v5864_v16  ;;  %v6899_v16 = vld [vmem:[#allocation31] ss:$16 sps:$4 sm:$0xff]  }
0x1e34   :  { %6837 = vtanh.f32 %v4924_v20  ;;  %v6900_v20 = vld [vmem:[#allocation31 + $0x8] ss:$16 sps:$4 sm:$0xff]  }
0x1e3b   :  { %v6832_v43 = vpop.eup %6831 }
0x1e3c   :  { %v6834_v6 = vpop.eup %6833  ;;  %v4929_v60 = vadd.f32 1.0, %v6832_v43  ;;  %v6901_v43 = vld [vmem:[#allocation31 + $0x24] ss:$16 sps:$4 sm:$0xff]  }
0x1e3d   :  { %v4935_v59 = vadd.f32 1.0, %v6834_v6  ;;  %v6836_v41 = vpop.eup %6835  ;;  %v6902_v6 = vld [vmem:[#allocation31 + $0x2c] ss:$16 sps:$4 sm:$0xff]  }
0x1e3e   :  { %6839 = vrcp.f32 %v4929_v60  ;;  %v6838_v48 = vpop.eup %6837  ;;  %v4942_v63 = vadd.f32 1.0, %v6836_v41  ;;  %v6903_v60 = vld [vmem:[#allocation31 + $0x20] ss:$16 sps:$4 sm:$0xff]   ;;  %v6905_v41 = vld [vmem:[#allocation31 + $0x44] ss:$16 sps:$4 sm:$0xff]  }
0x1e3f   :  { %6841 = vrcp.f32 %v4935_v59  ;;  %v6904_v59 = vld [vmem:[#allocation31 + $0x28] ss:$16 sps:$4 sm:$0xff]  }
0x1e40   :  { %6843 = vrcp.f32 %v4942_v63  ;;  %v6911_v63 = vld [vmem:[#allocation31 + $0x60] ss:$16 sps:$4 sm:$0xff]  }
0x1e48   :  { %v6840_v50 = vpop.eup %6839 }
0x1e49   :  { %v6842_v18 = vpop.eup %6841  ;;  %v4949_v62 = vmul.f32 %v6840_v50, %v6838_v48  ;;  %v6906_v48 = vld [vmem:[#allocation31 + $0x4c] ss:$16 sps:$4 sm:$0xff]   ;;  %v6907_v50 = vld [vmem:[#allocation31 + $0x40] ss:$16 sps:$4 sm:$0xff]  }
0x1e4a   :  { %v4948_v61 = vmul.f32 %v6842_v18, %v4946_v44  ;;  %v6844_v31 = vpop.eup %6843  ;;  %v6908_v44 = vld [vmem:[#allocation31 + $0x48] ss:$16 sps:$4 sm:$0xff]   ;;  %v6909_v18 = vld [vmem:[#allocation31 + $0x64] ss:$16 sps:$4 sm:$0xff]  }
0x1e4c   :  { %v8506_v51 = vadd.f32 %v4949_v62, %v4948_v61  ;;  %v6910_v62 = vld [vmem:[#allocation31 + $0x6c] ss:$16 sps:$4 sm:$0xff]   ;;  %v6912_v61 = vld [vmem:[#allocation31 + $0x68] ss:$16 sps:$4 sm:$0xff]  }
0x1e4e   :  { %6845 = vtanh.f32 %v8506_v51 }
0x1e58   :  { %v6846_v33 = vpop.eup %6845 }
0x1e59   :  { %v4952_v45 = vmul.f32 %v6846_v33, %v6844_v31  ;;  %v6915_v31 = vld [vmem:[#allocation31 + $0x80] ss:$16 sps:$4 sm:$0xff]   ;;  %v6916_v33 = vld [vmem:[#allocation31 + $0x88] ss:$16 sps:$4 sm:$0xff]  }
0x1e5b   :  { %v4953_v58 = vpack.c.bf16 %v4952_v45, %v4952_v45  ;;  %v6917_v45 = vld [vmem:[#allocation31 + $0xa4] ss:$16 sps:$4 sm:$0xff]  }
0x1e5d   :  { %4987 = vmatmul.mubr.bf16.vlgmr.msra.gmra.mrb[64].mxu0 %v4953_v58  ;;  %5028 = vmatmul.mubr.bf16.vlgmr.msra.gmra.mrb[88].mxu1 %v4953_v58  ;;  %v6918_v58 = vld [vmem:[#allocation31 + $0xac] ss:$16 sps:$4 sm:$0xff]  }
0x1e5e   :  { %5084 = vmatpush1.bf16.msra.mxu0 %v8183_v0  ;;  %5125 = vmatpush1.bf16.msra.mxu1 %v8185_v1  ;;  %v6897_v0 = vld [vmem:[#allocation31 + $0x4] ss:$16 sps:$4 sm:$0xff]   ;;  %v6898_v1 = vld [vmem:[#allocation31 + $0xc] ss:$16 sps:$4 sm:$0xff]  }
0x1e5f   :  { %5085 = vmatprep.subr.bf16.mxu0 %v8187_v5  ;;  %5126 = vmatprep.subr.bf16.mxu1 %v8189_v38 }
0x1e60   :  { %5115 = vmatprep.mubr.bf16.mxu0 %v7474_v36  ;;  %5156 = vmatprep.mubr.bf16.mxu1 %v7474_v36 }
0x1e62   :  { %5086 = vmatpush1.bf16.msra.mxu0 %v8193_v40  ;;  %5127 = vmatpush1.bf16.msra.mxu1 %v8195_v47 }
0x1e63   :  { %5087 = vmatprep.subr.bf16.mxu0 %v8199_v8  ;;  %5128 = vmatprep.subr.bf16.mxu1 %v8201_v32 }
0x1e66   :  { %5088 = vmatpush1.bf16.msra.mxu0 %v8207_v10  ;;  %5129 = vmatpush1.bf16.msra.mxu1 %v8209_v54 }
0x1e67   :  { %5089 = vmatprep.subr.bf16.mxu0 %v8213_v37  ;;  %5130 = vmatprep.subr.bf16.mxu1 %v8215_v11 }
0x1e6a   :  { %5090 = vmatpush1.bf16.msra.mxu0 %v8219_v13  ;;  %5131 = vmatpush1.bf16.msra.mxu1 %v8221_v17 }
0x1e6b   :  { %5091 = vmatprep.subr.bf16.mxu0 %v8225_v21  ;;  %5132 = vmatprep.subr.bf16.mxu1 %v8227_v22 }
0x1e6e   :  { %5092 = vmatpush1.bf16.msra.mxu0 %v8231_v23  ;;  %5133 = vmatpush1.bf16.msra.mxu1 %v8233_v24 }
0x1e6f   :  { %5093 = vmatprep.subr.bf16.mxu0 %v8237_v25  ;;  %5134 = vmatprep.subr.bf16.mxu1 %v8239_v26 }
0x1e72   :  { %5094 = vmatpush1.bf16.msra.mxu0 %v8243_v27  ;;  %5135 = vmatpush1.bf16.msra.mxu1 %v8245_v28 }
0x1e73   :  { %5095 = vmatprep.subr.bf16.mxu0 %v8249_v35  ;;  %5136 = vmatprep.subr.bf16.mxu1 %v8251_v29 }
0x1e76   :  { %5096 = vmatpush1.bf16.msra.mxu0 %v8255_v39  ;;  %5137 = vmatpush1.bf16.msra.mxu1 %v8257_v3 }
0x1e77   :  { %5097 = vmatprep.subr.bf16.mxu0 %v8261_v7  ;;  %5138 = vmatprep.subr.bf16.mxu1 %v8263_v30 }
0x1e7a   :  { %5098 = vmatpush1.bf16.msra.mxu0 %v8267_v4  ;;  %5139 = vmatpush1.bf16.msra.mxu1 %v8269_v9  ;;  %v5072_v4 = vrot.slane %v8506_v51, 6  ;;  %v6914_v51 = vld [vmem:[#allocation31 + $0x8c] ss:$16 sps:$4 sm:$0xff]  }
0x1e7b   :  { %5212 = vmatprep.subr.bf16.mxu0 %v6897_v0  ;;  %5253 = vmatprep.subr.bf16.mxu1 %v6898_v1  ;;  %v6919_v0 = vld [vmem:[#allocation31 + $0xa0] ss:$16 sps:$4 sm:$0xff]   ;;  %v6920_v1 = vld [vmem:[#allocation31 + $0xa8] ss:$16 sps:$4 sm:$0xff]  }
0x1f30   :  { %v4988_v5 = vpop.f32.mrb[64].mxu0  ;;  %v5029_v38 = vpop.f32.mrb[88].mxu1 }
0x1f31   :  { %v5040_v40 = vrot.slane %v4988_v5, 6  ;;  %v4990_v47 = vpop.f32.mrb[65].mxu0  ;;  %v5031_v8 = vpop.f32.mrb[89].mxu1  ;;  %v5042_v25 = vrot.slane %v5029_v38, 6  ;;  %v6921_v5 = vld [vmem:[#allocation31 + $0xc4] ss:$16 sps:$4 sm:$0xff]  }
0x1f32   :  { %v5041_v32 = vrot.slane %v4990_v47, 6  ;;  %v4992_v10 = vpop.f32.mrb[66].mxu0  ;;  %v5033_v54 = vpop.f32.mrb[90].mxu1  ;;  %v5043_v23 = vrot.slane %v5031_v8, 6  ;;  %v6922_v38 = vld [vmem:[#allocation31 + $0xcc] ss:$16 sps:$4 sm:$0xff]  }
0x1f33   :  { %v5048_v37 = vadd.f32 %v5040_v40, %v8318_v14  ;;  %v4993_v11 = vpop.f32.mrb[67].mxu0  ;;  %v5034_v13 = vpop.f32.mrb[91].mxu1  ;;  %v5050_v27 = vadd.f32 %v5042_v25, %v8320_v46  ;;  %v6923_v40 = vld [vmem:[#allocation31 + $0xc0] ss:$16 sps:$4 sm:$0xff]   ;;  %v6924_v47 = vld [vmem:[#allocation31 + $0xc8] ss:$16 sps:$4 sm:$0xff]  }
0x1f34   :  { %v5049_v17 = vadd.f32 %v5041_v32, %v8322_v56  ;;  %v5051_v24 = vadd.f32 %v5043_v23, %v8324_v49  ;;  %v6925_v8 = vld [vmem:[#allocation31 + $0xe4] ss:$16 sps:$4 sm:$0xff]   ;;  %v6926_v32 = vld [vmem:[#allocation31 + $0xec] ss:$16 sps:$4 sm:$0xff]   ;;  %v6927_v10 = vld [vmem:[#allocation31 + $0xe0] ss:$16 sps:$4 sm:$0xff]  }
0x1f35   :  { %v5865_v21 = vmul.f32 -1.442695, %v5048_v37  ;;  %v6928_v54 = vld [vmem:[#allocation31 + $0xe8] ss:$16 sps:$4 sm:$0xff]  }
0x1f36   :  { %v5866_v22 = vmul.f32 -1.442695, %v5049_v17  ;;  %v5867_v26 = vmul.f32 -1.442695, %v5051_v24 }
0x1f37   :  { %6847 = vpow2.f32 %v5865_v21 }
0x1f38   :  { %6849 = vpow2.f32 %v5866_v22 }
0x1f39   :  { %6851 = vpow2.f32 %v5867_v26 }
0x1f3a   :  { %6853 = vtanh.f32 %v5050_v27 }
0x1f41   :  { %v6848_v28 = vpop.eup %6847 }
0x1f42   :  { %v6850_v35 = vpop.eup %6849  ;;  %v5055_v29 = vadd.f32 1.0, %v6848_v28 }
0x1f43   :  { %v5061_v39 = vadd.f32 1.0, %v6850_v35  ;;  %v6852_v3 = vpop.eup %6851 }
0x1f44   :  { %6855 = vrcp.f32 %v5055_v29  ;;  %v6854_v7 = vpop.eup %6853  ;;  %v5068_v34 = vadd.f32 1.0, %v6852_v3 }
0x1f45   :  { %6857 = vrcp.f32 %v5061_v39 }
0x1f46   :  { %6859 = vrcp.f32 %v5068_v34 }
0x1f4e   :  { %v6856_v30 = vpop.eup %6855 }
0x1f4f   :  { %v6858_v9 = vpop.eup %6857  ;;  %v5075_v42 = vmul.f32 %v6856_v30, %v6854_v7 }
0x1f50   :  { %v5074_v52 = vmul.f32 %v6858_v9, %v5072_v4  ;;  %v6860_v57 = vpop.eup %6859 }
0x1f52   :  { %v8546_v53 = vadd.f32 %v5075_v42, %v5074_v52 }
0x1f54   :  { %6861 = vtanh.f32 %v8546_v53 }
0x1f5e   :  { %v6862_v2 = vpop.eup %6861 }
0x1f5f   :  { %v5078_v19 = vmul.f32 %v6862_v2, %v6860_v57 }
0x1f61   :  { %v5079_v15 = vpack.c.bf16 %v5078_v19, %v5078_v19 }
0x1f63   :  { %v5081_v55 = vrot.slane %v5079_v15, 1  ;;  %v5201_v15 = vrot.slane %v8546_v53, 6  ;;  %v6675_v53 = vld [vmem:[%s7641_s25] sm:$0xff]  }
0x1f65   :  { %5116 = vmatmul.mubr.bf16.vlgmr.msra.gmra.mrb[68].mxu0 %v5081_v55  ;;  %5157 = vmatmul.mubr.bf16.vlgmr.msra.gmra.mrb[92].mxu1 %v5081_v55 }
0x1f66   :  { %5213 = vmatpush1.bf16.msra.mxu0 %v6899_v16  ;;  %5254 = vmatpush1.bf16.msra.mxu1 %v6900_v20 }
0x1f67   :  { %5214 = vmatprep.subr.bf16.mxu0 %v6901_v43  ;;  %5255 = vmatprep.subr.bf16.mxu1 %v6902_v6 }
0x1f68   :  { %5244 = vmatprep.mubr.bf16.mxu0 %v7474_v36  ;;  %5285 = vmatprep.mubr.bf16.mxu1 %v7474_v36  ;;  %v6913_v36 = vld [vmem:[#allocation31 + $0x84] ss:$16 sps:$4 sm:$0xff]  }
0x1f6a   :  { %5215 = vmatpush1.bf16.msra.mxu0 %v6903_v60  ;;  %5256 = vmatpush1.bf16.msra.mxu1 %v6904_v59 }
0x1f6b   :  { %5216 = vmatprep.subr.bf16.mxu0 %v6905_v41  ;;  %5257 = vmatprep.subr.bf16.mxu1 %v6906_v48 }
0x1f6e   :  { %5217 = vmatpush1.bf16.msra.mxu0 %v6907_v50  ;;  %5258 = vmatpush1.bf16.msra.mxu1 %v6908_v44  ;;  %v6676_v44 = vld [vmem:[%s7641_s25 + $0x8] sm:$0xff]  }
0x1f6f   :  { %5218 = vmatprep.subr.bf16.mxu0 %v6909_v18  ;;  %5259 = vmatprep.subr.bf16.mxu1 %v6910_v62  ;;  %v6677_v18 = vld [vmem:[%s7641_s25 + $0x10] sm:$0xff]   ;;  %v6678_v62 = vld [vmem:[%s7641_s25 + $0x18] sm:$0xff]  }
0x1f72   :  { %5219 = vmatpush1.bf16.msra.mxu0 %v6911_v63  ;;  %5260 = vmatpush1.bf16.msra.mxu1 %v6912_v61  ;;  %v6679_v63 = vld [vmem:[%s7641_s25 + $0x20] sm:$0xff]   ;;  %v6680_v61 = vld [vmem:[%s7641_s25 + $0x28] sm:$0xff]  }
0x1f73   :  { %5220 = vmatprep.subr.bf16.mxu0 %v6913_v36  ;;  %5261 = vmatprep.subr.bf16.mxu1 %v6914_v51  ;;  %v6681_v36 = vld [vmem:[%s7641_s25 + $0x30] sm:$0xff]   ;;  %v6682_v51 = vld [vmem:[%s7641_s25 + $0x38] sm:$0xff]   ;;  %s5460_s25 = sshll.u32 %s7477_s5, 4  ;;  %s5461_s25 = int_to_ptr.vmem [resolvable:$true] %s5460_s25 }
0x1f74   :  { %s7369_s3 = scalar_lea.vmem %s5461_s25, 32  ;;  %p7374_p7 = scmp.lt.s32.totalorder %s5461_s25, %s5461_s25 }
0x1f75   :  { %p7370_p6 = scmp.ne.s32.totalorder %s5461_s25, %s7369_s3  ;;  %p7375_p8 = scmp.lt.s32.totalorder %s7369_s3, %s7369_s3 }
0x1f76   :  { %5221 = vmatpush1.bf16.msra.mxu0 %v6915_v31  ;;  %5262 = vmatpush1.bf16.msra.mxu1 %v6916_v33 }
0x1f77   :  { %5222 = vmatprep.subr.bf16.mxu0 %v6917_v45  ;;  %5263 = vmatprep.subr.bf16.mxu1 %v6918_v58  ;;  %p7376_p9 = por %p7375_p8, %p7374_p7 }
0x1f79   :  { %p7377_p10 = pnand %p7376_p9, %p7370_p6 }
0x1f7a   :  { %5223 = vmatpush1.bf16.msra.mxu0 %v6919_v0  ;;  %5264 = vmatpush1.bf16.msra.mxu1 %v6920_v1 }
0x1f7b   :  { %5224 = vmatprep.subr.bf16.mxu0 %v6921_v5  ;;  %5265 = vmatprep.subr.bf16.mxu1 %v6922_v38 }
0x1f7e   :  { %5225 = vmatpush1.bf16.msra.mxu0 %v6923_v40  ;;  %5266 = vmatpush1.bf16.msra.mxu1 %v6924_v47 }
0x1f7f   :  { %5226 = vmatprep.subr.bf16.mxu0 %v6925_v8  ;;  %5267 = vmatprep.subr.bf16.mxu1 %v6926_v32 }
0x1f82   :  { %5227 = vmatpush1.bf16.msra.mxu0 %v6927_v10  ;;  %5268 = vmatpush1.bf16.msra.mxu1 %v6928_v54 }
0x1f83   :  { %6160 = vmatprep.subr.bf16.mxu0 %v7475_v12 }
0x2038   :  { %v5117_v37 = vpop.f32.mrb[68].mxu0  ;;  %v5158_v11 = vpop.f32.mrb[92].mxu1 }
0x2039   :  { %v5169_v13 = vrot.slane %v5117_v37, 4  ;;  %v5119_v17 = vpop.f32.mrb[69].mxu0  ;;  %v5160_v21 = vpop.f32.mrb[93].mxu1  ;;  %v5171_v7 = vrot.slane %v5158_v11, 4 }
0x203a   :  { %v5170_v22 = vrot.slane %v5119_v17, 4  ;;  %v5121_v23 = vpop.f32.mrb[70].mxu0  ;;  %v5162_v24 = vpop.f32.mrb[94].mxu1  ;;  %v5172_v39 = vrot.slane %v5160_v21, 4 }
0x203b   :  { %v5177_v25 = vadd.f32 %v5169_v13, %v8318_v14  ;;  %v5122_v26 = vpop.f32.mrb[71].mxu0  ;;  %v5163_v27 = vpop.f32.mrb[95].mxu1  ;;  %v5179_v4 = vadd.f32 %v5171_v7, %v8320_v46 }
0x203c   :  { %v5178_v28 = vadd.f32 %v5170_v22, %v8322_v56  ;;  %v5180_v3 = vadd.f32 %v5172_v39, %v8324_v49 }
0x203d   :  { %v5868_v35 = vmul.f32 -1.442695, %v5177_v25 }
0x203e   :  { %v5869_v29 = vmul.f32 -1.442695, %v5178_v28  ;;  %v5870_v30 = vmul.f32 -1.442695, %v5180_v3 }
0x203f   :  { %6863 = vpow2.f32 %v5868_v35 }
0x2040   :  { %6865 = vpow2.f32 %v5869_v29 }
0x2041   :  { %6867 = vpow2.f32 %v5870_v30 }
0x2042   :  { %6869 = vtanh.f32 %v5179_v4  ;;  %v5874_v4 = vld [vmem:[#allocation32] ss:$0 sm:$0xff] }
0x2049   :  { %v6864_v9 = vpop.eup %6863 }
0x204a   :  { %v6866_v42 = vpop.eup %6865  ;;  %v5184_v34 = vadd.f32 1.0, %v6864_v9 }
0x204b   :  { %v5190_v52 = vadd.f32 1.0, %v6866_v42  ;;  %v6868_v57 = vpop.eup %6867 }
0x204c   :  { %6871 = vrcp.f32 %v5184_v34  ;;  %v6870_v2 = vpop.eup %6869  ;;  %v5197_v20 = vadd.f32 1.0, %v6868_v57 }
0x204d   :  { %6873 = vrcp.f32 %v5190_v52 }
0x204e   :  { %6875 = vrcp.f32 %v5197_v20 }
0x2056   :  { %v6872_v19 = vpop.eup %6871 }
0x2057   :  { %v6874_v55 = vpop.eup %6873  ;;  %v5204_v16 = vmul.f32 %v6872_v19, %v6870_v2 }
0x2058   :  { %v5203_v43 = vmul.f32 %v6874_v55, %v5201_v15  ;;  %v6876_v60 = vpop.eup %6875 }
0x205a   :  { %v8557_v6 = vadd.f32 %v5204_v16, %v5203_v43 }
0x205c   :  { %6877 = vtanh.f32 %v8557_v6  ;;  %v5330_v26 = vrot.slane %v8557_v6, 6 }
0x2066   :  { %v6878_v59 = vpop.eup %6877 }
0x2067   :  { %v5207_v41 = vmul.f32 %v6878_v59, %v6876_v60 }
0x2069   :  { %v5208_v48 = vpack.c.bf16 %v5207_v41, %v5207_v41 }
0x206b   :  { %v5210_v50 = vrot.slane %v5208_v48, 2 }
0x206d   :  { %5245 = vmatmul.mubr.bf16.vlgmr.msra.gmra.mrb[72].mxu0 %v5210_v50  ;;  %5286 = vmatmul.mubr.bf16.vlgmr.msra.gmra.mrb[96].mxu1 %v5210_v50 }
0x206e   :  { %6176 = vmatprep.mubr.msk.bf16.mxu0 %vm7476_vm0, %v7475_v12  ;;  %6161 = vmatpush3.bf16.msra.mxu0 %v6675_v53 }
0x206f   :  { %6162 = vmatprep.subr.bf16.mxu0 %v7475_v12 }
0x2072   :  { %6163 = vmatpush3.bf16.msra.mxu0 %v6676_v44 }
0x2073   :  { %6164 = vmatprep.subr.bf16.mxu0 %v7475_v12 }
0x2076   :  { %6165 = vmatpush3.bf16.msra.mxu0 %v6677_v18 }
0x2077   :  { %6166 = vmatprep.subr.bf16.mxu0 %v7475_v12 }
0x207a   :  { %6167 = vmatpush3.bf16.msra.mxu0 %v6678_v62 }
0x207b   :  { %6168 = vmatprep.subr.bf16.mxu0 %v7475_v12 }
0x207e   :  { %6169 = vmatpush3.bf16.msra.mxu0 %v6679_v63 }
0x207f   :  { %6170 = vmatprep.subr.bf16.mxu0 %v7475_v12 }
0x2082   :  { %6171 = vmatpush3.bf16.msra.mxu0 %v6680_v61 }
0x2083   :  { %6172 = vmatprep.subr.bf16.mxu0 %v7475_v12 }
0x2086   :  { %6173 = vmatpush3.bf16.msra.mxu0 %v6681_v36 }
0x2087   :  { %6174 = vmatprep.subr.bf16.mxu0 %v7475_v12 }
0x208a   :  { %6175 = vmatpush3.bf16.msra.mxu0 %v6682_v51 }
0x2140   :  { %v5246_v31 = vpop.f32.mrb[72].mxu0  ;;  %v5287_v33 = vpop.f32.mrb[96].mxu1 }
0x2141   :  { %v5298_v45 = vrot.slane %v5246_v31, 2  ;;  %v5248_v58 = vpop.f32.mrb[73].mxu0  ;;  %v5289_v0 = vpop.f32.mrb[97].mxu1  ;;  %v5300_v11 = vrot.slane %v5287_v33, 2 }
0x2142   :  { %v5299_v1 = vrot.slane %v5248_v58, 2  ;;  %v5250_v5 = vpop.f32.mrb[74].mxu0  ;;  %v5291_v38 = vpop.f32.mrb[98].mxu1  ;;  %v5301_v37 = vrot.slane %v5289_v0, 2 }
0x2143   :  { %v5306_v40 = vadd.f32 %v5298_v45, %v8318_v14  ;;  %v5251_v47 = vpop.f32.mrb[75].mxu0  ;;  %v5292_v8 = vpop.f32.mrb[99].mxu1  ;;  %v5308_v17 = vadd.f32 %v5300_v11, %v8320_v46 }
0x2144   :  { %v5307_v32 = vadd.f32 %v5299_v1, %v8322_v56  ;;  %v5309_v12 = vadd.f32 %v5301_v37, %v8324_v49 }
0x2145   :  { %v5871_v10 = vmul.f32 -1.442695, %v5306_v40 }
0x2146   :  { %v5872_v54 = vmul.f32 -1.442695, %v5307_v32  ;;  %v5873_v13 = vmul.f32 -1.442695, %v5309_v12 }
0x2147   :  { %6879 = vpow2.f32 %v5871_v10 }
0x2148   :  { %6881 = vpow2.f32 %v5872_v54 }
0x2149   :  { %6883 = vpow2.f32 %v5873_v13 }
0x214a   :  { %6885 = vtanh.f32 %v5308_v17 }
0x2151   :  { %v6880_v21 = vpop.eup %6879 }
0x2152   :  { %v6882_v22 = vpop.eup %6881  ;;  %v5313_v23 = vadd.f32 1.0, %v6880_v21 }
0x2153   :  { %v5319_v14 = vadd.f32 1.0, %v6882_v22  ;;  %v6884_v56 = vpop.eup %6883 }
0x2154   :  { %6887 = vrcp.f32 %v5313_v23  ;;  %v6886_v24 = vpop.eup %6885  ;;  %v5326_v49 = vadd.f32 1.0, %v6884_v56 }
0x2155   :  { %6889 = vrcp.f32 %v5319_v14 }
0x2156   :  { %6891 = vrcp.f32 %v5326_v49 }
0x215e   :  { %v6888_v25 = vpop.eup %6887 }
0x215f   :  { %v6890_v27 = vpop.eup %6889  ;;  %v5333_v28 = vmul.f32 %v6888_v25, %v6886_v24 }
0x2160   :  { %v5332_v35 = vmul.f32 %v6890_v27, %v5330_v26  ;;  %v6892_v46 = vpop.eup %6891 }
0x2162   :  { %v5334_v29 = vadd.f32 %v5333_v28, %v5332_v35 }
0x2164   :  { %6893 = vtanh.f32 %v5334_v29 }
0x216e   :  { %v6894_v39 = vpop.eup %6893 }
0x216f   :  { %v5336_v3 = vmul.f32 %v6894_v39, %v6892_v46 }
0x2171   :  { %v5353_v7 = vpack.c.bf16 %v5336_v3, %v5336_v3 }
0x2173   :  { %v5362_v30 = vrot.slane %v5353_v7, 3 }
0x2175   :  { %6177 = vmatmul.mubr.bf16.vlgmr.msra.gmra.mrb[76].mxu0 %v5362_v30 }
0x2248   :  { %v5446_v9 = vpop.f32.mrb[76].mxu0 }
0x2249   :  { %v5447_v42 = vadd.f32 %v5874_v4, %v5446_v9  ;;  %v6178_v34 = vpop.f32.mrb[77].mxu0 }
0x224a   :  { %v5449_v52 = vpop.f32.mrb[78].mxu0 }
0x224b   :  { %v6179_v57 = vpop.f32.mrb[79].mxu0  ;;  %5453 = vst.msk [vmem:[#allocation34] sm:$0x3] %vm5452_vm2, %v5447_v42 }
0x224c   :  { %7380 = shalt.err (!%p7377_p10)
}
0x224d   :  { %s7381_s1 = scalar_lea.hbm %s7651_s4, 32 }
0x224e   :  { %p7382_p11 = scmp.ne.s32.totalorder %s7651_s4, %s7381_s1  ;;  %p7385_p12 = scmp.lt.u32.totalorder %s7381_s1, %s7651_s4 }
0x2250   :  { %p7387_p13 = pnand %p7385_p12, %p7382_p11 }
0x2252   :  { %7390 = shalt.err (!%p7387_p13)
}
0x2253   :  { %5463 = dma.vmem_to_hbm [thread:$0]  %s5461_s25, 32, %s7651_s4, [#allocation4]  }
0x2254   :  { %7413 = dma.done.wait [#allocation4], 32  }
0x2255   :  { %7414 = vsyncadd [#allocation4], 4294967264 }
0x2256   :  { %5467 = vsyncpa [#allocation3], 1 }
0x2257   :  { %5468 = vsyncpa [#allocation6], 1 }
0x2258   :  { %5469 = vsyncpa [#allocation9], 1 }
0x2259   :  { %5470 = vsyncpa [#allocation12], 1 }
0x225a   :  { %5471 = vsyncpa [#allocation15], 1 }
0x225b   :  { %5472 = vsyncpa [#allocation18], 1 }
0x225c   :  { %5473 = vsyncpa [#allocation21], 1 }
0x225d   :  { %5474 = vsyncpa [#allocation24], 1 }
0x225e   :  { %5475 = vsyncpa [#allocation27], 1 }
0x225f   :  { %5476 = vsyncpa [#allocation30], 1 }
0x2260   :  { %5477 = vsyncpa [#allocation33], 1 }
0x2261   :  { %5478 = vsyncpa [#allocation4], 1 }

</bundles_post_ra>
